<compile_context>
chip_gen: v5e
topology: v5e:2x2
jax: 0.10.0
libtpu: 0.0.40
codegen_flags: <defaults>
</compile_context>

<pallas_src>
import jax
import jax.numpy as jnp
from jax.experimental import pallas as pl
from jax.experimental.pallas import tpu as pltpu


def _round_up(n, m):
    return ((n + m - 1) // m) * m


def _soft_q_kernel(x_ref, w1_ref, b1_ref, w2_ref, b2_ref, w3_ref, b3_ref, o_ref):
    """Fused 3-layer MLP on one batch tile.

    x:  (TILE_B, obs_dim) f32   (cast to bf16 in-kernel; MXU pads K internally)
    w1: (obs_dim, 256) bf16     b1: (1, 256)   f32
    w2: (256, 256)     bf16     b2: (1, 256)   f32
    w3: (256, N_PAD)   bf16     b3: (1, N_PAD) f32
    o:  (TILE_B, N_PAD) f32
    """
    x = x_ref[...].astype(jnp.bfloat16)

    # Layer 1: bf16 matmul -> f32 accumulator -> bias + ReLU in f32 -> bf16.
    h1 = jnp.dot(x, w1_ref[...], preferred_element_type=jnp.float32)
    h1 = jnp.maximum(h1 + b1_ref[...], 0.0).astype(jnp.bfloat16)

    # Layer 2.
    h2 = jnp.dot(h1, w2_ref[...], preferred_element_type=jnp.float32)
    h2 = jnp.maximum(h2 + b2_ref[...], 0.0).astype(jnp.bfloat16)

    # Layer 3 (no activation), lane-dense f32 store.
    q = jnp.dot(h2, w3_ref[...], preferred_element_type=jnp.float32) + b3_ref[...]
    o_ref[...] = q.astype(o_ref.dtype)


def prepare_params(params):
    """One-time (per optimizer step) prep: bf16 weights, f32 biases, fc3 padded
    to 128 output lanes.  Hoisted out of the per-call forward on purpose."""
    w1, b1, w2, b2, w3, b3 = (params[k] for k in ("w1", "b1", "w2", "b2", "w3", "b3"))
    hidden = w1.shape[1]
    n_actions = w3.shape[1]
    n_pad = max(128, _round_up(n_actions, 128))

    prepped = {
        "w1": w1.astype(jnp.bfloat16),
        "b1": b1.reshape(1, hidden).astype(jnp.float32),
        "w2": w2.astype(jnp.bfloat16),
        "b2": b2.reshape(1, hidden).astype(jnp.float32),
        "w3": jnp.zeros((hidden, n_pad), jnp.bfloat16).at[:, :n_actions].set(
            w3.astype(jnp.bfloat16)),
        "b3": jnp.zeros((1, n_pad), jnp.float32).at[:, :n_actions].set(
            b3.reshape(1, n_actions).astype(jnp.float32)),
    }
    return prepped, n_actions


def _pick_tiling(B, max_tile=1024):
    """Single grid step on single-TC v5e/v6e; 2 'parallel' steps on dual-TC v7x.
    tile_b is a multiple of 16 (bf16 sublane packing) and capped for huge B."""
    try:
        kind = jax.devices()[0].device_kind.lower()
    except Exception:  # pragma: no cover - defensive
        kind = ""
    dual_tc = "v7" in kind
    n_tiles = 2 if (dual_tc and B >= 32) else 1
    tile_b = _round_up(pl.cdiv(B, n_tiles), 16)
    while tile_b > max_tile:
        n_tiles *= 2
        tile_b = _round_up(pl.cdiv(B, n_tiles), 16)
    return tile_b, n_tiles


def soft_q_forward(x, prepped, n_actions):
    """x: [B, obs_dim] float32.  prepped: output of prepare_params."""
    B, obs_dim = x.shape
    n_pad = prepped["w3"].shape[1]

    tile_b, n_tiles = _pick_tiling(B)
    b_pad = tile_b * n_tiles
    xp = x if b_pad == B else jnp.zeros((b_pad, obs_dim), x.dtype).at[:B].set(x)

    # Weights/biases VMEM-resident across grid steps (constant index_map);
    # only the x / out tiles move per step.
    resident = lambda a: pl.BlockSpec(a.shape, lambda i: (0, 0))

    out = pl.pallas_call(
        _soft_q_kernel,
        out_shape=jax.ShapeDtypeStruct((b_pad, n_pad), jnp.float32),
        grid=(n_tiles,),
        in_specs=[
            pl.BlockSpec((tile_b, obs_dim), lambda i: (i, 0)),   # x tile
            resident(prepped["w1"]), resident(prepped["b1"]),
            resident(prepped["w2"]), resident(prepped["b2"]),
            resident(prepped["w3"]), resident(prepped["b3"]),
        ],
        out_specs=pl.BlockSpec((tile_b, n_pad), lambda i: (i, 0)),
        compiler_params=pltpu.CompilerParams(
            dimension_semantics=("parallel",)),  # v7x: one tile per TensorCore
    )(xp, prepped["w1"], prepped["b1"], prepped["w2"], prepped["b2"],
      prepped["w3"], prepped["b3"])

    # TODO(synk): in a full SAC step this slice could be fused into the consumer.
    return out[:B, :n_actions]


def init_params(key, obs_dim, n_actions, hidden=256):
    """Deterministic init mirroring torch.nn.Linear default (uniform +-1/sqrt(fan_in))."""
    ks = jax.random.split(key, 6)

    def linear(kw, kb, fan_in, fan_out):
        bound = 1.0 / jnp.sqrt(fan_in)
        w = jax.random.uniform(kw, (fan_in, fan_out), jnp.float32, -bound, bound)
        b = jax.random.uniform(kb, (1, fan_out), jnp.float32, -bound, bound)
        return w, b

    w1, b1 = linear(ks[0], ks[1], obs_dim, hidden)
    w2, b2 = linear(ks[2], ks[3], hidden, hidden)
    w3, b3 = linear(ks[4], ks[5], hidden, n_actions)
    return {"w1": w1, "b1": b1, "w2": w2, "b2": b2, "w3": w3, "b3": b3}


if __name__ == "__main__":
    key = jax.random.PRNGKey(0)
    k_x, k_p = jax.random.split(key)

    # Replay-buffer-sized minibatch (SAC Q update), small obs / discrete actions.
    B, OBS_DIM, N_ACTIONS = 512, 16, 6
    x = jax.random.normal(k_x, (B, OBS_DIM), jnp.float32)
    params = init_params(k_p, OBS_DIM, N_ACTIONS)

    # One-time param prep (would be redone only after an optimizer step).
    prepped, n_act = prepare_params(params)
    jax.block_until_ready(prepped)

    q_vals = soft_q_forward(x, prepped, n_act)
    jax.block_until_ready(q_vals)

    # Pure-JAX reference with the same bf16-weight / f32-accumulate recipe.
    xb = x.astype(jnp.bfloat16)
    w1b = params["w1"].astype(jnp.bfloat16)
    w2b = params["w2"].astype(jnp.bfloat16)
    w3b = params["w3"].astype(jnp.bfloat16)
    h = jnp.maximum(
        jnp.dot(xb, w1b, preferred_element_type=jnp.float32) + params["b1"], 0.0
    ).astype(jnp.bfloat16)
    h = jnp.maximum(
        jnp.dot(h, w2b, preferred_element_type=jnp.float32) + params["b2"], 0.0
    ).astype(jnp.bfloat16)
    ref = jnp.dot(h, w3b, preferred_element_type=jnp.float32) + params["b3"]

    assert q_vals.shape == (B, N_ACTIONS)
    assert jnp.allclose(q_vals, ref, atol=2e-2, rtol=2e-2), (
        float(jnp.max(jnp.abs(q_vals - ref))))

    # Sanity vs the full-f32 math (looser tolerance for bf16 weights).
    hf = jnp.maximum(x @ params["w1"] + params["b1"], 0.0)
    hf = jnp.maximum(hf @ params["w2"] + params["b2"], 0.0)
    ref_f32 = hf @ params["w3"] + params["b3"]
    assert jnp.allclose(q_vals, ref_f32, atol=5e-2, rtol=5e-2)

    print("KERNEL_OK")
</pallas_src>

<mosaic_0001>
module attributes {stable_mosaic.version = 11 : i64} {
  func.func @_soft_q_kernel(%arg0: i32, %arg1: memref<512x16xf32, #tpu.memory_space<vmem>>, %arg2: memref<16x256xbf16, #tpu.memory_space<vmem>>, %arg3: memref<1x256xf32, #tpu.memory_space<vmem>>, %arg4: memref<256x256xbf16, #tpu.memory_space<vmem>>, %arg5: memref<1x256xf32, #tpu.memory_space<vmem>>, %arg6: memref<256x128xbf16, #tpu.memory_space<vmem>>, %arg7: memref<1x128xf32, #tpu.memory_space<vmem>>, %arg8: memref<512x128xf32, #tpu.memory_space<vmem>>) attributes {dimension_semantics = [#tpu.dimension_semantics<parallel>], iteration_bounds = array<i64: 1>, scalar_prefetch = 0 : i64, scratch_operands = 0 : i64, tpu.core_type = #tpu.core_type<tc>, window_params = [{transform_indices = @transform_0, window_bounds = array<i64: 512, 16>}, {pipeline_mode = #tpu.pipeline_mode<synchronous>, transform_indices = @transform_1, window_bounds = array<i64: 16, 256>}, {pipeline_mode = #tpu.pipeline_mode<synchronous>, transform_indices = @transform_2, window_bounds = array<i64: 1, 256>}, {pipeline_mode = #tpu.pipeline_mode<synchronous>, transform_indices = @transform_3, window_bounds = array<i64: 256, 256>}, {pipeline_mode = #tpu.pipeline_mode<synchronous>, transform_indices = @transform_4, window_bounds = array<i64: 1, 256>}, {pipeline_mode = #tpu.pipeline_mode<synchronous>, transform_indices = @transform_5, window_bounds = array<i64: 256, 128>}, {pipeline_mode = #tpu.pipeline_mode<synchronous>, transform_indices = @transform_6, window_bounds = array<i64: 1, 128>}, {transform_indices = @transform_7, window_bounds = array<i64: 512, 128>}]} {
    %c0 = arith.constant 0 : index
    %c0_0 = arith.constant 0 : index
    %0 = vector.load %arg1[%c0, %c0_0] : memref<512x16xf32, #tpu.memory_space<vmem>>, vector<512x16xf32>
    %1 = arith.truncf %0 : vector<512x16xf32> to vector<512x16xbf16>
    %c0_1 = arith.constant 0 : index
    %c0_2 = arith.constant 0 : index
    %2 = vector.load %arg2[%c0_1, %c0_2] : memref<16x256xbf16, #tpu.memory_space<vmem>>, vector<16x256xbf16>
    %cst = arith.constant dense<0.000000e+00> : vector<512x256xf32>
    %3 = tpu.matmul %1, %2, %cst {dimension_numbers = #tpu.dot_dimension_numbers<[1], [0], [0], [1], [0, 0, 1, 1], [], []>} : vector<512x16xbf16>, vector<16x256xbf16>, vector<512x256xf32> -> vector<512x256xf32>
    %c0_3 = arith.constant 0 : index
    %c0_4 = arith.constant 0 : index
    %4 = vector.load %arg3[%c0_3, %c0_4] : memref<1x256xf32, #tpu.memory_space<vmem>>, vector<1x256xf32>
    %5 = vector.broadcast %4 : vector<1x256xf32> to vector<512x256xf32>
    %6 = arith.addf %3, %5 : vector<512x256xf32>
    %cst_5 = arith.constant 0.000000e+00 : f32
    %7 = vector.broadcast %cst_5 : f32 to vector<512x256xf32>
    %8 = arith.maximumf %6, %7 : vector<512x256xf32>
    %9 = arith.truncf %8 : vector<512x256xf32> to vector<512x256xbf16>
    %c0_6 = arith.constant 0 : index
    %c0_7 = arith.constant 0 : index
    %10 = vector.load %arg4[%c0_6, %c0_7] : memref<256x256xbf16, #tpu.memory_space<vmem>>, vector<256x256xbf16>
    %cst_8 = arith.constant dense<0.000000e+00> : vector<512x256xf32>
    %11 = tpu.matmul %9, %10, %cst_8 {dimension_numbers = #tpu.dot_dimension_numbers<[1], [0], [0], [1], [0, 0, 1, 1], [], []>} : vector<512x256xbf16>, vector<256x256xbf16>, vector<512x256xf32> -> vector<512x256xf32>
    %c0_9 = arith.constant 0 : index
    %c0_10 = arith.constant 0 : index
    %12 = vector.load %arg5[%c0_9, %c0_10] : memref<1x256xf32, #tpu.memory_space<vmem>>, vector<1x256xf32>
    %13 = vector.broadcast %12 : vector<1x256xf32> to vector<512x256xf32>
    %14 = arith.addf %11, %13 : vector<512x256xf32>
    %cst_11 = arith.constant 0.000000e+00 : f32
    %15 = vector.broadcast %cst_11 : f32 to vector<512x256xf32>
    %16 = arith.maximumf %14, %15 : vector<512x256xf32>
    %17 = arith.truncf %16 : vector<512x256xf32> to vector<512x256xbf16>
    %c0_12 = arith.constant 0 : index
    %c0_13 = arith.constant 0 : index
    %18 = vector.load %arg6[%c0_12, %c0_13] : memref<256x128xbf16, #tpu.memory_space<vmem>>, vector<256x128xbf16>
    %cst_14 = arith.constant dense<0.000000e+00> : vector<512x128xf32>
    %19 = tpu.matmul %17, %18, %cst_14 {dimension_numbers = #tpu.dot_dimension_numbers<[1], [0], [0], [1], [0, 0, 1, 1], [], []>} : vector<512x256xbf16>, vector<256x128xbf16>, vector<512x128xf32> -> vector<512x128xf32>
    %c0_15 = arith.constant 0 : index
    %c0_16 = arith.constant 0 : index
    %20 = vector.load %arg7[%c0_15, %c0_16] : memref<1x128xf32, #tpu.memory_space<vmem>>, vector<1x128xf32>
    %21 = vector.broadcast %20 : vector<1x128xf32> to vector<512x128xf32>
    %22 = arith.addf %19, %21 : vector<512x128xf32>
    %c0_17 = arith.constant 0 : index
    %c0_18 = arith.constant 0 : index
    %23 = vector.load %arg8[%c0_17, %c0_18] : memref<512x128xf32, #tpu.memory_space<vmem>>, vector<512x128xf32>
    tpu.vector_store %arg8[%c0_17, %c0_18], %22 {strides = array<i32>} : memref<512x128xf32, #tpu.memory_space<vmem>>, vector<512x128xf32>,
    return
  }
  func.func @transform_0(%arg0: i32) -> (i32, i32) {
    %c0_i32 = arith.constant 0 : i32
    %c0_i32_0 = arith.constant 0 : i32
    return %arg0, %c0_i32 : i32, i32
  }
  func.func @transform_1(%arg0: i32) -> (i32, i32) {
    %c0_i32 = arith.constant 0 : i32
    %c0_i32_0 = arith.constant 0 : i32
    %c0_i32_1 = arith.constant 0 : i32
    return %c0_i32, %c0_i32_0 : i32, i32
  }
  func.func @transform_2(%arg0: i32) -> (i32, i32) {
    %c0_i32 = arith.constant 0 : i32
    %c0_i32_0 = arith.constant 0 : i32
    %c0_i32_1 = arith.constant 0 : i32
    return %c0_i32, %c0_i32_0 : i32, i32
  }
  func.func @transform_3(%arg0: i32) -> (i32, i32) {
    %c0_i32 = arith.constant 0 : i32
    %c0_i32_0 = arith.constant 0 : i32
    %c0_i32_1 = arith.constant 0 : i32
    return %c0_i32, %c0_i32_0 : i32, i32
  }
  func.func @transform_4(%arg0: i32) -> (i32, i32) {
    %c0_i32 = arith.constant 0 : i32
    %c0_i32_0 = arith.constant 0 : i32
    %c0_i32_1 = arith.constant 0 : i32
    return %c0_i32, %c0_i32_0 : i32, i32
  }
  func.func @transform_5(%arg0: i32) -> (i32, i32) {
    %c0_i32 = arith.constant 0 : i32
    %c0_i32_0 = arith.constant 0 : i32
    %c0_i32_1 = arith.constant 0 : i32
    return %c0_i32, %c0_i32_0 : i32, i32
  }
  func.func @transform_6(%arg0: i32) -> (i32, i32) {
    %c0_i32 = arith.constant 0 : i32
    %c0_i32_0 = arith.constant 0 : i32
    %c0_i32_1 = arith.constant 0 : i32
    return %c0_i32, %c0_i32_0 : i32, i32
  }
  func.func @transform_7(%arg0: i32) -> (i32, i32) {
    %c0_i32 = arith.constant 0 : i32
    %c0_i32_0 = arith.constant 0 : i32
    return %arg0, %c0_i32 : i32, i32
  }
}

</mosaic_0001>

<bundles_post_ra>
// kernel: tpu_custom_call.1
= control target key start
LH: loop header
LB: loop body
LE: loop exit
PB: predicated region body
PF: predicated region fallthrough
CT: control target
= control target key end

     0   :  { %vm142_vm0 = vcmask 130048   ;;  %s3986_s0 = inlined_call_operand.vmem [shape: f32[512,16], index: 0, kind: input, shape index: {}]   ;;  %s3987_s1 = inlined_call_operand.vmem [shape: bf16[16,256], index: 1, kind: input, shape index: {}]   ;;  %s3988_s2 = inlined_call_operand.vmem [shape: f32[1,256], index: 2, kind: input, shape index: {}]   ;;  %s3989_s3 = inlined_call_operand.vmem [shape: bf16[256,256], index: 3, kind: input, shape index: {}]   ;;  %s3990_s4 = inlined_call_operand.vmem [shape: f32[1,256], index: 4, kind: input, shape index: {}]   ;;  %s3991_s5 = inlined_call_operand.vmem [shape: bf16[256,128], index: 5, kind: input, shape index: {}]   ;;  %s3992_s6 = inlined_call_operand.vmem [shape: f32[1,128], index: 6, kind: input, shape index: {}]   ;;  %s3993_s7 = inlined_call_operand.hbm [shape: f32[512,128], index: 7, kind: output, shape index: {}]  }
   0x1   :  { %v2389_v0 = vld [vmem:[%s3987_s1] sm:$0xf]  ;;  %v2652_v1 = vld [vmem:[%s3987_s1 + $0x4] sm:$0xf0]  ;;  %v2651_v2 = vld [vmem:[%s3987_s1 + $0x4] sm:$0xf] }
   0x2   :  { %v2390_v3 = vor.u32 %v2652_v1, %v2389_v0  ;;  %v2391_v4 = vld [vmem:[%s3987_s1 + $0x8] sm:$0xf0]  ;;  %v28_v5 = vld [vmem:[%s3986_s0] sm:$0xff]  ;;  %v2667_v9 = vld [vmem:[%s3989_s3 + $0x74] sm:$0xf] }
   0x3   :  { %v29_v6 = vld [vmem:[%s3986_s0 + $0x8] sm:$0xff]  ;;  %v2394_v7 = vor.u32 %v2651_v2, %v2391_v4  ;;  %v2519_v10 = vld [vmem:[%s3989_s3 + $0x78] sm:$0xf0]  ;;  %v2683_v11 = vld [vmem:[%s3989_s3 + $0xf4] sm:$0xf] }
   0x4   :  { %v92_v8 = vpack.c.bf16 %v29_v6, %v28_v5  ;;  %246 = vmatpush.bf16.msra.mxu0 %v2390_v3  ;;  %v2522_v12 = vor.u32 %v2667_v9, %v2519_v10  ;;  %v2583_v13 = vld [vmem:[%s3989_s3 + $0xf8] sm:$0xf0] }
   0x5   :  { %415 = vmatpush.bf16.msra.mxu1 %v2394_v7  ;;  %v2586_v14 = vor.u32 %v2683_v11, %v2583_v13 }
   0x8   :  { %1305 = vmatpush.bf16.msrb.mxu0 %v2522_v12 }
   0x9   :  { %12 = vsyncpa [#allocation3], 0  ;;  %2395 = vmatmul.msk.bf16.vlgmr.msra.gmra.mxu0 %vm142_vm0, %v92_v8  ;;  %1474 = vmatpush.bf16.msrb.mxu1 %v2586_v14  ;;  %v30_v15 = vld [vmem:[%s3986_s0 + $0x10] sm:$0xff]  ;;  %v31_v16 = vld [vmem:[%s3986_s0 + $0x18] sm:$0xff]  ;;  %s2375_s10 = sshll.u32 %s3993_s7, 4  ;;  %s2734_s11 = smov 128   ;;  %s2376_s10 = int_to_ptr.hbm [resolvable:$true] %s2375_s10 }
   0xa   :  { %2427 = vmatmul.msk.bf16.vlgmr.msra.gmra.mxu1 %vm142_vm0, %v92_v8  ;;  %v93_v17 = vpack.c.bf16 %v31_v16, %v30_v15  ;;  %v32_v18 = vld [vmem:[%s3986_s0 + $0x20] sm:$0xff]  ;;  %v33_v19 = vld [vmem:[%s3986_s0 + $0x28] sm:$0xff]  ;;  %v34_v27 = vld [vmem:[%s3986_s0 + $0x30] sm:$0xff]  ;;  %s2735_s12 = smov 8  }
   0xb   :  { %v94_v20 = vpack.c.bf16 %v33_v19, %v32_v18  ;;  %v2665_v21 = vld [vmem:[%s3989_s3 + $0x64] sm:$0xf]  ;;  %v2511_v22 = vld [vmem:[%s3989_s3 + $0x68] sm:$0xf0]  ;;  %v35_v28 = vld [vmem:[%s3986_s0 + $0x38] sm:$0xff] }
   0xc   :  { %v2681_v23 = vld [vmem:[%s3989_s3 + $0xe4] sm:$0xf]  ;;  %v2514_v24 = vor.u32 %v2665_v21, %v2511_v22  ;;  %v2575_v25 = vld [vmem:[%s3989_s3 + $0xe8] sm:$0xf0]  ;;  %v95_v29 = vpack.c.bf16 %v35_v28, %v34_v27  ;;  %v2517_v33 = vld [vmem:[%s3989_s3 + $0x70] sm:$0xf] }
   0xd   :  { %v2578_v26 = vor.u32 %v2681_v23, %v2575_v25  ;;  %v36_v30 = vld [vmem:[%s3986_s0 + $0x40] sm:$0xff]  ;;  %v37_v31 = vld [vmem:[%s3986_s0 + $0x48] sm:$0xff]  ;;  %v2668_v34 = vld [vmem:[%s3989_s3 + $0x74] sm:$0xf0] }
   0xe   :  { %1306 = vmatpush.bf16.msrb.mxu0 %v2514_v24  ;;  %v96_v32 = vpack.c.bf16 %v37_v31, %v36_v30  ;;  %v2581_v35 = vld [vmem:[%s3989_s3 + $0xf0] sm:$0xf]  ;;  %v2518_v36 = vor.u32 %v2668_v34, %v2517_v33  ;;  %v2684_v37 = vld [vmem:[%s3989_s3 + $0xf4] sm:$0xf0]  ;;  %v2509_v42 = vld [vmem:[%s3989_s3 + $0x60] sm:$0xf] }
   0xf   :  { %1475 = vmatpush.bf16.msrb.mxu1 %v2578_v26  ;;  %v2582_v38 = vor.u32 %v2684_v37, %v2581_v35  ;;  %v38_v39 = vld [vmem:[%s3986_s0 + $0x50] sm:$0xff]  ;;  %v39_v40 = vld [vmem:[%s3986_s0 + $0x58] sm:$0xff]  ;;  %v2666_v43 = vld [vmem:[%s3989_s3 + $0x64] sm:$0xf0] }
  0x10   :  { %967 = vmatpush.bf16.msra.mxu2 %v2518_v36  ;;  %v97_v41 = vpack.c.bf16 %v39_v40, %v38_v39  ;;  %v2573_v44 = vld [vmem:[%s3989_s3 + $0xe0] sm:$0xf]  ;;  %v2510_v45 = vor.u32 %v2666_v43, %v2509_v42  ;;  %v2682_v46 = vld [vmem:[%s3989_s3 + $0xe4] sm:$0xf0]  ;;  %v2501_v48 = vld [vmem:[%s3989_s3 + $0x50] sm:$0xf] }
  0x11   :  { %1136 = vmatpush.bf16.msra.mxu3 %v2582_v38  ;;  %v2574_v47 = vor.u32 %v2682_v46, %v2573_v44  ;;  %v2664_v49 = vld [vmem:[%s3989_s3 + $0x54] sm:$0xf0]  ;;  %v2565_v50 = vld [vmem:[%s3989_s3 + $0xd0] sm:$0xf]  ;;  %v2493_v54 = vld [vmem:[%s3989_s3 + $0x40] sm:$0xf] }
  0x12   :  { %v2502_v51 = vor.u32 %v2664_v49, %v2501_v48  ;;  %v2680_v52 = vld [vmem:[%s3989_s3 + $0xd4] sm:$0xf0]  ;;  %v2662_v55 = vld [vmem:[%s3989_s3 + $0x44] sm:$0xf0]  ;;  %v2557_v56 = vld [vmem:[%s3989_s3 + $0xc0] sm:$0xf] }
  0x13   :  { %v2566_v53 = vor.u32 %v2680_v52, %v2565_v50  ;;  %v2678_v57 = vld [vmem:[%s3989_s3 + $0xc4] sm:$0xf0]  ;;  %v2494_v58 = vor.u32 %v2662_v55, %v2493_v54  ;;  %v40_v60 = vld [vmem:[%s3986_s0 + $0x60] sm:$0xff]  ;;  %v2485_v62 = vld [vmem:[%s3989_s3 + $0x30] sm:$0xf] }
  0x14   :  { %968 = vmatpush.bf16.msra.mxu2 %v2510_v45  ;;  %v2558_v59 = vor.u32 %v2678_v57, %v2557_v56  ;;  %v41_v61 = vld [vmem:[%s3986_s0 + $0x68] sm:$0xff]  ;;  %v2660_v63 = vld [vmem:[%s3989_s3 + $0x34] sm:$0xf0]  ;;  %v2549_v0 = vld [vmem:[%s3989_s3 + $0xb0] sm:$0xf] }
  0x15   :  { %1137 = vmatpush.bf16.msra.mxu3 %v2574_v47  ;;  %v98_v1 = vpack.c.bf16 %v41_v61, %v40_v60  ;;  %v2486_v2 = vor.u32 %v2660_v63, %v2485_v62  ;;  %v2676_v3 = vld [vmem:[%s3989_s3 + $0xb4] sm:$0xf0]  ;;  %v2477_v5 = vld [vmem:[%s3989_s3 + $0x20] sm:$0xf]  ;;  %v2658_v6 = vld [vmem:[%s3989_s3 + $0x24] sm:$0xf0] }
  0x16   :  { %v2550_v4 = vor.u32 %v2676_v3, %v2549_v0  ;;  %v2478_v7 = vor.u32 %v2658_v6, %v2477_v5  ;;  %v2541_v8 = vld [vmem:[%s3989_s3 + $0xa0] sm:$0xf]  ;;  %v2674_v9 = vld [vmem:[%s3989_s3 + $0xa4] sm:$0xf0]  ;;  %v2663_v10 = vld [vmem:[%s3989_s3 + $0x54] sm:$0xf] }
  0x17   :  { %v2503_v11 = vld [vmem:[%s3989_s3 + $0x58] sm:$0xf0]  ;;  %v2542_v12 = vor.u32 %v2674_v9, %v2541_v8  ;;  %v2679_v13 = vld [vmem:[%s3989_s3 + $0xd4] sm:$0xf]  ;;  %v2656_v18 = vld [vmem:[%s3989_s3 + $0x14] sm:$0xf0] }
  0x18   :  { %969 = vmatpush.bf16.msra.mxu2 %v2502_v51  ;;  %v2506_v14 = vor.u32 %v2663_v10, %v2503_v11  ;;  %v2567_v15 = vld [vmem:[%s3989_s3 + $0xd8] sm:$0xf0]  ;;  %v2533_v19 = vld [vmem:[%s3989_s3 + $0x90] sm:$0xf]  ;;  %v2672_v21 = vld [vmem:[%s3989_s3 + $0x94] sm:$0xf0] }
  0x19   :  { %2396 = vmatmul.msk.bf16.gmra.mxu0 %vm142_vm0, %v93_v17  ;;  %1138 = vmatpush.bf16.msra.mxu3 %v2566_v53  ;;  %v2570_v16 = vor.u32 %v2679_v13, %v2567_v15  ;;  %v2534_v22 = vor.u32 %v2672_v21, %v2533_v19  ;;  %v2461_v23 = vld [vmem:[%s3989_s3] sm:$0xf]  ;;  %v2654_v24 = vld [vmem:[%s3989_s3 + $0x4] sm:$0xf0]  ;;  %v42_v28 = vld [vmem:[%s3986_s0 + $0x70] sm:$0xff] }
  0x1a   :  { %2428 = vmatmul.msk.bf16.gmra.mxu1 %vm142_vm0, %v93_v17  ;;  %v2469_v17 = vld [vmem:[%s3989_s3 + $0x10] sm:$0xf]  ;;  %1307 = vmatpush.bf16.msrb.mxu0 %v2506_v14  ;;  %v2525_v25 = vld [vmem:[%s3989_s3 + $0x80] sm:$0xf]  ;;  %v2462_v26 = vor.u32 %v2654_v24, %v2461_v23  ;;  %v2670_v27 = vld [vmem:[%s3989_s3 + $0x84] sm:$0xf0] }
  0x1b   :  { %1476 = vmatpush.bf16.msrb.mxu1 %v2570_v16  ;;  %v2526_v30 = vor.u32 %v2670_v27, %v2525_v25  ;;  %v2700_v33 = vld [vmem:[%s3991_s5 + $0x78] sm:$0xff]  ;;  %v44_v34 = vld [vmem:[%s3986_s0 + $0x80] sm:$0xff]  ;;  %v45_v35 = vld [vmem:[%s3986_s0 + $0x88] sm:$0xff] }
  0x1c   :  { %970 = vmatpush.bf16.msra.mxu2 %v2494_v58  ;;  %v100_v36 = vpack.c.bf16 %v45_v35, %v44_v34  ;;  %v126_v37 = vld [vmem:[%s3988_s2] sm:$0x3]  ;;  %v46_v52 = vld [vmem:[%s3986_s0 + $0x90] sm:$0xff]  ;;  %v47_v53 = vld [vmem:[%s3986_s0 + $0x98] sm:$0xff] }
  0x1d   :  { %1139 = vmatpush.bf16.msra.mxu3 %v2558_v59  ;;  %v2999_v40 = vperm.slane %v126_v37, 0  ;;  %v101_v56 = vpack.c.bf16 %v47_v53, %v46_v52  ;;  %v48_v5 = vld [vmem:[%s3986_s0 + $0xa0] sm:$0xff]  ;;  %v49_v6 = vld [vmem:[%s3986_s0 + $0xa8] sm:$0xff]  ;;  %v2691_v34 = vld [vmem:[%s3991_s5 + $0x30] sm:$0xff] }
  0x1e   :  { %v102_v9 = vpack.c.bf16 %v49_v6, %v48_v5  ;;  %v2495_v13 = vld [vmem:[%s3989_s3 + $0x48] sm:$0xf0]  ;;  %v2677_v15 = vld [vmem:[%s3989_s3 + $0xc4] sm:$0xf]  ;;  %v55_v5 = vld [vmem:[%s3986_s0 + $0xd8] sm:$0xff] }
  0x1f   :  { %v2559_v16 = vld [vmem:[%s3989_s3 + $0xc8] sm:$0xf0] }
  0x20   :  { %971 = vmatpush.bf16.msra.mxu2 %v2486_v2 }
  0x21   :  { %1140 = vmatpush.bf16.msra.mxu3 %v2550_v4 }
  0x24   :  { %972 = vmatpush.bf16.msra.mxu2 %v2478_v7 }
  0x25   :  { %1141 = vmatpush.bf16.msra.mxu3 %v2542_v12  ;;  %v2661_v12 = vld [vmem:[%s3989_s3 + $0x44] sm:$0xf] }
  0x26   :  { %v2498_v14 = vor.u32 %v2661_v12, %v2495_v13 }
  0x28   :  { %1308 = vmatpush.bf16.msrb.mxu0 %v2498_v14 }
  0x29   :  { %2397 = vmatmul.msk.bf16.gmra.mxu0 %vm142_vm0, %v94_v20  ;;  %1142 = vmatpush.bf16.msra.mxu3 %v2534_v22 }
  0x2a   :  { %2429 = vmatmul.msk.bf16.gmra.mxu1 %vm142_vm0, %v94_v20  ;;  %v2470_v20 = vor.u32 %v2656_v18, %v2469_v17  ;;  %v2562_v17 = vor.u32 %v2677_v15, %v2559_v16 }
  0x2c   :  { %973 = vmatpush.bf16.msra.mxu2 %v2470_v20  ;;  %1477 = vmatpush.bf16.msrb.mxu1 %v2562_v17 }
  0x2d   :  { %1143 = vmatpush.bf16.msra.mxu3 %v2526_v30 }
  0x30   :  { %974 = vmatpush.bf16.msra.mxu2 %v2462_v26 }
  0x31   :  { %2136 = vmatpush.bf16.msrb.mxu3 %v2700_v33 }
  0x39   :  { %2398 = vmatmul.msk.bf16.gmra.mxu0 %vm142_vm0, %v95_v29 }
  0x3a   :  { %2430 = vmatmul.msk.bf16.gmra.mxu1 %vm142_vm0, %v95_v29  ;;  %v43_v29 = vld [vmem:[%s3986_s0 + $0x78] sm:$0xff] }
  0x3b   :  { %v99_v31 = vpack.c.bf16 %v43_v29, %v42_v28  ;;  %v50_v28 = vld [vmem:[%s3986_s0 + $0xb0] sm:$0xff]  ;;  %v51_v29 = vld [vmem:[%s3986_s0 + $0xb8] sm:$0xff] }
  0x49   :  { %2399 = vmatmul.msk.bf16.gmra.mxu0 %vm142_vm0, %v96_v32 }
  0x4a   :  { %2431 = vmatmul.msk.bf16.gmra.mxu1 %vm142_vm0, %v96_v32  ;;  %v2692_v32 = vld [vmem:[%s3991_s5 + $0x38] sm:$0xff] }
  0x4b   :  { %1967 = vmatpush.bf16.msrb.mxu2 %v2692_v32  ;;  %v103_v32 = vpack.c.bf16 %v51_v29, %v50_v28 }
  0x4f   :  { %1968 = vmatpush.bf16.msrb.mxu2 %v2691_v34 }
  0x59   :  { %2400 = vmatmul.msk.bf16.gmra.mxu0 %vm142_vm0, %v97_v41 }
  0x5a   :  { %2432 = vmatmul.msk.bf16.gmra.mxu1 %vm142_vm0, %v97_v41  ;;  %v3002_v41 = vperm.slane %v126_v37, 1 }
  0x69   :  { %2401 = vmatmul.msk.bf16.gmra.mxu0 %vm142_vm0, %v98_v1 }
  0x6a   :  { %2433 = vmatmul.msk.bf16.gmra.mxu1 %vm142_vm0, %v98_v1 }
  0x79   :  { %2402 = vmatmul.msk.bf16.gmra.mxu0 %vm142_vm0, %v99_v31 }
  0x7a   :  { %2434 = vmatmul.msk.bf16.gmra.mxu1 %vm142_vm0, %v99_v31 }
  0x86   :  { %v248_v38 = vpop.f32.mrf.mxu0 }
  0x87   :  { %v417_v39 = vpop.f32.mrf.mxu1  ;;  %v249_v42 = vadd.f32 %v248_v38, %v2999_v40 }
  0x88   :  { %v418_v43 = vadd.f32 %v417_v39, %v3002_v41 }
  0x89   :  { %2403 = vmatmul.msk.bf16.gmra.mxu0 %vm142_vm0, %v100_v36  ;;  %v577_v48 = vmax.f32 %v249_v42, 0.0 }
  0x8a   :  { %2435 = vmatmul.msk.bf16.gmra.mxu1 %vm142_vm0, %v100_v36  ;;  %v578_v50 = vmax.f32 %v418_v43, 0.0  ;;  %v2699_v36 = vld [vmem:[%s3991_s5 + $0x70] sm:$0xff] }
  0x8b   :  { %2137 = vmatpush.bf16.msrb.mxu3 %v2699_v36  ;;  %v2551_v36 = vld [vmem:[%s3989_s3 + $0xb8] sm:$0xf0] }
  0x8e   :  { %v250_v44 = vpop.f32.mrf.mxu0 }
  0x8f   :  { %v251_v45 = vadd.f32 %v250_v44, %v2999_v40  ;;  %v419_v46 = vpop.f32.mrf.mxu1 }
  0x90   :  { %v420_v47 = vadd.f32 %v419_v46, %v3002_v41 }
  0x91   :  { %v579_v49 = vmax.f32 %v251_v45, 0.0 }
  0x92   :  { %v580_v51 = vmax.f32 %v420_v47, 0.0 }
  0x93   :  { %v3015_v54 = vpack.c.bf16 %v579_v49, %v577_v48  ;;  %v52_v49 = vld [vmem:[%s3986_s0 + $0xc0] sm:$0xff] }
  0x94   :  { %v3017_v55 = vpack.c.bf16 %v580_v51, %v578_v50  ;;  %v53_v50 = vld [vmem:[%s3986_s0 + $0xc8] sm:$0xff] }
  0x95   :  { %975 = vmatmul.bf16.vlgmr.msra.gmra.mxu2 %v3015_v54  ;;  %v104_v53 = vpack.c.bf16 %v53_v50, %v52_v49  ;;  %v58_v50 = vld [vmem:[%s3986_s0 + $0xf0] sm:$0xff] }
  0x96   :  { %1144 = vmatmul.bf16.vlgmr.msra.gmra.mxu3 %v3017_v55  ;;  %v253_v57 = vpop.f32.mrf.mxu0 }
  0x97   :  { %v422_v58 = vpop.f32.mrf.mxu1  ;;  %v254_v59 = vadd.f32 %v253_v57, %v2999_v40 }
  0x98   :  { %v423_v60 = vadd.f32 %v422_v58, %v3002_v41 }
  0x99   :  { %2404 = vmatmul.msk.bf16.gmra.mxu0 %vm142_vm0, %v101_v56  ;;  %v581_v1 = vmax.f32 %v254_v59, 0.0 }
  0x9a   :  { %2436 = vmatmul.msk.bf16.gmra.mxu1 %vm142_vm0, %v101_v56  ;;  %v582_v3 = vmax.f32 %v423_v60, 0.0 }
  0x9e   :  { %v255_v61 = vpop.f32.mrf.mxu0 }
  0x9f   :  { %v256_v62 = vadd.f32 %v255_v61, %v2999_v40  ;;  %v424_v63 = vpop.f32.mrf.mxu1 }
  0xa0   :  { %v425_v0 = vadd.f32 %v424_v63, %v3002_v41 }
  0xa1   :  { %v583_v2 = vmax.f32 %v256_v62, 0.0 }
  0xa2   :  { %v584_v4 = vmax.f32 %v425_v0, 0.0 }
  0xa3   :  { %v3033_v7 = vpack.c.bf16 %v583_v2, %v581_v1 }
  0xa4   :  { %v3035_v8 = vpack.c.bf16 %v584_v4, %v582_v3  ;;  %v54_v4 = vld [vmem:[%s3986_s0 + $0xd0] sm:$0xff] }
  0xa5   :  { %980 = vmatmul.bf16.gmra.mxu2 %v3033_v7 }
  0xa6   :  { %1149 = vmatmul.bf16.gmra.mxu3 %v3035_v8  ;;  %v258_v10 = vpop.f32.mrf.mxu0 }
  0xa7   :  { %v427_v11 = vpop.f32.mrf.mxu1  ;;  %v259_v18 = vadd.f32 %v258_v10, %v2999_v40  ;;  %v105_v10 = vpack.c.bf16 %v55_v5, %v54_v4 }
  0xa8   :  { %v428_v19 = vadd.f32 %v427_v11, %v3002_v41 }
  0xa9   :  { %2405 = vmatmul.msk.bf16.gmra.mxu0 %vm142_vm0, %v102_v9  ;;  %v585_v24 = vmax.f32 %v259_v18, 0.0 }
  0xaa   :  { %2437 = vmatmul.msk.bf16.gmra.mxu1 %vm142_vm0, %v102_v9  ;;  %v586_v26 = vmax.f32 %v428_v19, 0.0 }
  0xae   :  { %v260_v20 = vpop.f32.mrf.mxu0 }
  0xaf   :  { %v261_v21 = vadd.f32 %v260_v20, %v2999_v40  ;;  %v429_v22 = vpop.f32.mrf.mxu1 }
  0xb0   :  { %v430_v23 = vadd.f32 %v429_v22, %v3002_v41 }
  0xb1   :  { %v587_v25 = vmax.f32 %v261_v21, 0.0 }
  0xb2   :  { %v588_v27 = vmax.f32 %v430_v23, 0.0  ;;  %v56_v23 = vld [vmem:[%s3986_s0 + $0xe0] sm:$0xff] }
  0xb3   :  { %v3063_v30 = vpack.c.bf16 %v587_v25, %v585_v24  ;;  %v57_v24 = vld [vmem:[%s3986_s0 + $0xe8] sm:$0xff] }
  0xb4   :  { %v3065_v31 = vpack.c.bf16 %v588_v27, %v586_v26  ;;  %v106_v27 = vpack.c.bf16 %v57_v24, %v56_v23 }
  0xb5   :  { %985 = vmatmul.bf16.gmra.mxu2 %v3063_v30 }
  0xb6   :  { %1154 = vmatmul.bf16.gmra.mxu3 %v3065_v31  ;;  %v263_v33 = vpop.f32.mrf.mxu0 }
  0xb7   :  { %v432_v35 = vpop.f32.mrf.mxu1  ;;  %v264_v37 = vadd.f32 %v263_v33, %v2999_v40  ;;  %v2487_v33 = vld [vmem:[%s3989_s3 + $0x38] sm:$0xf0] }
  0xb8   :  { %v433_v38 = vadd.f32 %v432_v35, %v3002_v41  ;;  %v2675_v35 = vld [vmem:[%s3989_s3 + $0xb4] sm:$0xf] }
  0xb9   :  { %2406 = vmatmul.msk.bf16.gmra.mxu0 %vm142_vm0, %v103_v32  ;;  %v589_v45 = vmax.f32 %v264_v37, 0.0  ;;  %v2554_v37 = vor.u32 %v2675_v35, %v2551_v36  ;;  %v62_v35 = vld [vmem:[%s3986_s0 + $0x110] sm:$0xff]  ;;  %v63_v36 = vld [vmem:[%s3986_s0 + $0x118] sm:$0xff] }
  0xba   :  { %2438 = vmatmul.msk.bf16.gmra.mxu1 %vm142_vm0, %v103_v32  ;;  %v590_v47 = vmax.f32 %v433_v38, 0.0  ;;  %v2659_v32 = vld [vmem:[%s3989_s3 + $0x34] sm:$0xf] }
  0xbb   :  { %v2490_v34 = vor.u32 %v2659_v32, %v2487_v33  ;;  %1478 = vmatpush.bf16.msrb.mxu1 %v2554_v37 }
  0xbd   :  { %1309 = vmatpush.bf16.msrb.mxu0 %v2490_v34  ;;  %v801_v34 = vld [vmem:[%s3990_s4] sm:$0x3] }
  0xbe   :  { %v265_v39 = vpop.f32.mrf.mxu0 }
  0xbf   :  { %v266_v42 = vadd.f32 %v265_v39, %v2999_v40  ;;  %v434_v43 = vpop.f32.mrf.mxu1 }
  0xc0   :  { %v435_v44 = vadd.f32 %v434_v43, %v3002_v41 }
  0xc1   :  { %v591_v46 = vmax.f32 %v266_v42, 0.0 }
  0xc2   :  { %v592_v48 = vmax.f32 %v435_v44, 0.0 }
  0xc3   :  { %v3087_v51 = vpack.c.bf16 %v591_v46, %v589_v45 }
  0xc4   :  { %v3089_v52 = vpack.c.bf16 %v592_v48, %v590_v47 }
  0xc5   :  { %990 = vmatmul.bf16.gmra.mxu2 %v3087_v51 }
  0xc6   :  { %1159 = vmatmul.bf16.gmra.mxu3 %v3089_v52  ;;  %v268_v56 = vpop.f32.mrf.mxu0 }
  0xc7   :  { %v437_v57 = vpop.f32.mrf.mxu1  ;;  %v269_v58 = vadd.f32 %v268_v56, %v2999_v40 }
  0xc8   :  { %v438_v59 = vadd.f32 %v437_v57, %v3002_v41 }
  0xc9   :  { %2407 = vmatmul.msk.bf16.gmra.mxu0 %vm142_vm0, %v104_v53  ;;  %v593_v0 = vmax.f32 %v269_v58, 0.0 }
  0xca   :  { %2439 = vmatmul.msk.bf16.gmra.mxu1 %vm142_vm0, %v104_v53  ;;  %v594_v2 = vmax.f32 %v438_v59, 0.0  ;;  %v59_v53 = vld [vmem:[%s3986_s0 + $0xf8] sm:$0xff] }
  0xcb   :  { %v107_v58 = vpack.c.bf16 %v59_v53, %v58_v50 }
  0xce   :  { %v270_v60 = vpop.f32.mrf.mxu0 }
  0xcf   :  { %v271_v61 = vadd.f32 %v270_v60, %v2999_v40  ;;  %v439_v62 = vpop.f32.mrf.mxu1  ;;  %v2690_v60 = vld [vmem:[%s3991_s5 + $0x28] sm:$0xff] }
  0xd0   :  { %v440_v63 = vadd.f32 %v439_v62, %v3002_v41  ;;  %1969 = vmatpush.bf16.msrb.mxu2 %v2690_v60  ;;  %v2698_v62 = vld [vmem:[%s3991_s5 + $0x68] sm:$0xff] }
  0xd1   :  { %v595_v1 = vmax.f32 %v271_v61, 0.0  ;;  %2138 = vmatpush.bf16.msrb.mxu3 %v2698_v62 }
  0xd2   :  { %v596_v3 = vmax.f32 %v440_v63, 0.0 }
  0xd3   :  { %v3105_v6 = vpack.c.bf16 %v595_v1, %v593_v0 }
  0xd4   :  { %v3107_v9 = vpack.c.bf16 %v596_v3, %v594_v2 }
  0xd5   :  { %995 = vmatmul.bf16.gmra.mxu2 %v3105_v6 }
  0xd6   :  { %1164 = vmatmul.bf16.gmra.mxu3 %v3107_v9  ;;  %v273_v11 = vpop.f32.mrf.mxu0 }
  0xd7   :  { %v442_v12 = vpop.f32.mrf.mxu1  ;;  %v274_v13 = vadd.f32 %v273_v11, %v2999_v40 }
  0xd8   :  { %v443_v14 = vadd.f32 %v442_v12, %v3002_v41 }
  0xd9   :  { %2408 = vmatmul.msk.bf16.gmra.mxu0 %vm142_vm0, %v105_v10  ;;  %v597_v19 = vmax.f32 %v274_v13, 0.0  ;;  %v60_v13 = vld [vmem:[%s3986_s0 + $0x100] sm:$0xff] }
  0xda   :  { %2440 = vmatmul.msk.bf16.gmra.mxu1 %vm142_vm0, %v105_v10  ;;  %v598_v21 = vmax.f32 %v443_v14, 0.0  ;;  %v61_v14 = vld [vmem:[%s3986_s0 + $0x108] sm:$0xff] }
  0xde   :  { %v275_v15 = vpop.f32.mrf.mxu0 }
  0xdf   :  { %v276_v16 = vadd.f32 %v275_v15, %v2999_v40  ;;  %v444_v17 = vpop.f32.mrf.mxu1 }
  0xe0   :  { %v445_v18 = vadd.f32 %v444_v17, %v3002_v41  ;;  %v108_v17 = vpack.c.bf16 %v61_v14, %v60_v13 }
  0xe1   :  { %v599_v20 = vmax.f32 %v276_v16, 0.0 }
  0xe2   :  { %v600_v22 = vmax.f32 %v445_v18, 0.0 }
  0xe3   :  { %v3123_v25 = vpack.c.bf16 %v599_v20, %v597_v19 }
  0xe4   :  { %v3125_v26 = vpack.c.bf16 %v600_v22, %v598_v21 }
  0xe5   :  { %1000 = vmatmul.bf16.gmra.mxu2 %v3123_v25 }
  0xe6   :  { %1169 = vmatmul.bf16.gmra.mxu3 %v3125_v26  ;;  %v278_v28 = vpop.f32.mrf.mxu0 }
  0xe7   :  { %v447_v29 = vpop.f32.mrf.mxu1  ;;  %v279_v38 = vadd.f32 %v278_v28, %v2999_v40 }
  0xe8   :  { %v448_v39 = vadd.f32 %v447_v29, %v3002_v41 }
  0xe9   :  { %2409 = vmatmul.msk.bf16.gmra.mxu0 %vm142_vm0, %v106_v27  ;;  %v601_v46 = vmax.f32 %v279_v38, 0.0 }
  0xea   :  { %2441 = vmatmul.msk.bf16.gmra.mxu1 %vm142_vm0, %v106_v27  ;;  %v602_v48 = vmax.f32 %v448_v39, 0.0  ;;  %v3203_v39 = vperm.slane %v801_v34, 0 }
  0xee   :  { %v280_v42 = vpop.f32.mrf.mxu0 }
  0xef   :  { %v281_v43 = vadd.f32 %v280_v42, %v2999_v40  ;;  %v449_v44 = vpop.f32.mrf.mxu1  ;;  %v109_v42 = vpack.c.bf16 %v63_v36, %v62_v35  ;;  %v2673_v35 = vld [vmem:[%s3989_s3 + $0xa4] sm:$0xf]  ;;  %v2543_v36 = vld [vmem:[%s3989_s3 + $0xa8] sm:$0xf0] }
  0xf0   :  { %v450_v45 = vadd.f32 %v449_v44, %v3002_v41 }
  0xf1   :  { %v603_v47 = vmax.f32 %v281_v43, 0.0 }
  0xf2   :  { %v604_v49 = vmax.f32 %v450_v45, 0.0 }
  0xf3   :  { %v3153_v56 = vpack.c.bf16 %v603_v47, %v601_v46 }
  0xf4   :  { %v3155_v57 = vpack.c.bf16 %v604_v49, %v602_v48 }
  0xf5   :  { %1005 = vmatmul.bf16.gmra.mxu2 %v3153_v56 }
  0xf6   :  { %1174 = vmatmul.bf16.gmra.mxu3 %v3155_v57  ;;  %v283_v59 = vpop.f32.mrf.mxu0 }
  0xf7   :  { %v452_v61 = vpop.f32.mrf.mxu1  ;;  %v284_v63 = vadd.f32 %v283_v59, %v2999_v40 }
  0xf8   :  { %v453_v0 = vadd.f32 %v452_v61, %v3002_v41 }
  0xf9   :  { %2410 = vmatmul.msk.bf16.gmra.mxu0 %vm142_vm0, %v107_v58  ;;  %v605_v5 = vmax.f32 %v284_v63, 0.0 }
  0xfa   :  { %2442 = vmatmul.msk.bf16.gmra.mxu1 %vm142_vm0, %v107_v58  ;;  %v606_v11 = vmax.f32 %v453_v0, 0.0 }
  0xfe   :  { %v285_v1 = vpop.f32.mrf.mxu0 }
  0xff   :  { %v286_v2 = vadd.f32 %v285_v1, %v2999_v40  ;;  %v454_v3 = vpop.f32.mrf.mxu1 }
 0x100   :  { %v455_v4 = vadd.f32 %v454_v3, %v3002_v41 }
 0x101   :  { %v607_v10 = vmax.f32 %v286_v2, 0.0 }
 0x102   :  { %v608_v12 = vmax.f32 %v455_v4, 0.0  ;;  %v64_v4 = vld [vmem:[%s3986_s0 + $0x120] sm:$0xff] }
 0x103   :  { %v3177_v15 = vpack.c.bf16 %v607_v10, %v605_v5  ;;  %v65_v5 = vld [vmem:[%s3986_s0 + $0x128] sm:$0xff] }
 0x104   :  { %v3179_v16 = vpack.c.bf16 %v608_v12, %v606_v11 }
 0x105   :  { %1010 = vmatmul.bf16.gmra.mxu2 %v3177_v15 }
 0x106   :  { %1179 = vmatmul.bf16.gmra.mxu3 %v3179_v16  ;;  %v288_v18 = vpop.f32.mrf.mxu0 }
 0x107   :  { %v457_v19 = vpop.f32.mrf.mxu1  ;;  %v289_v20 = vadd.f32 %v288_v18, %v2999_v40 }
 0x108   :  { %v458_v21 = vadd.f32 %v457_v19, %v3002_v41 }
 0x109   :  { %2411 = vmatmul.msk.bf16.gmra.mxu0 %vm142_vm0, %v108_v17  ;;  %v609_v28 = vmax.f32 %v289_v20, 0.0 }
 0x10a   :  { %2443 = vmatmul.msk.bf16.gmra.mxu1 %vm142_vm0, %v108_v17  ;;  %v610_v32 = vmax.f32 %v458_v21, 0.0  ;;  %v110_v17 = vpack.c.bf16 %v65_v5, %v64_v4  ;;  %v2689_v4 = vld [vmem:[%s3991_s5 + $0x20] sm:$0xff] }
 0x10b   :  { %1970 = vmatpush.bf16.msrb.mxu2 %v2689_v4 }
 0x10e   :  { %v290_v22 = vpop.f32.mrf.mxu0 }
 0x10f   :  { %v291_v23 = vadd.f32 %v290_v22, %v2999_v40  ;;  %v459_v24 = vpop.f32.mrf.mxu1 }
 0x110   :  { %v460_v27 = vadd.f32 %v459_v24, %v3002_v41 }
 0x111   :  { %v611_v29 = vmax.f32 %v291_v23, 0.0 }
 0x112   :  { %v612_v33 = vmax.f32 %v460_v27, 0.0 }
 0x113   :  { %v3198_v37 = vpack.c.bf16 %v611_v29, %v609_v28  ;;  %v2657_v28 = vld [vmem:[%s3989_s3 + $0x24] sm:$0xf]  ;;  %v2479_v29 = vld [vmem:[%s3989_s3 + $0x28] sm:$0xf0] }
 0x114   :  { %v3200_v38 = vpack.c.bf16 %v612_v33, %v610_v32  ;;  %v2482_v34 = vor.u32 %v2657_v28, %v2479_v29 }
 0x115   :  { %1015 = vmatmul.bf16.gmra.mxu2 %v3198_v37 }
 0x116   :  { %1184 = vmatmul.bf16.gmra.mxu3 %v3200_v38  ;;  %v293_v43 = vpop.f32.mrf.mxu0  ;;  %1310 = vmatpush.bf16.msrb.mxu0 %v2482_v34 }
 0x117   :  { %v462_v44 = vpop.f32.mrf.mxu1  ;;  %v294_v49 = vadd.f32 %v293_v43, %v2999_v40 }
 0x118   :  { %v976_v45 = vpop.f32.mrf.mxu2  ;;  %v463_v50 = vadd.f32 %v462_v44, %v3002_v41  ;;  %v2546_v44 = vor.u32 %v2673_v35, %v2543_v36 }
 0x119   :  { %v977_v46 = vadd.f32 %v976_v45, %v3203_v39  ;;  %v1145_v47 = vpop.f32.mrf.mxu3  ;;  %2412 = vmatmul.msk.bf16.gmra.mxu0 %vm142_vm0, %v109_v42  ;;  %v613_v62 = vmax.f32 %v294_v49, 0.0 }
 0x11a   :  { %2444 = vmatmul.msk.bf16.gmra.mxu1 %vm142_vm0, %v109_v42  ;;  %v614_v2 = vmax.f32 %v463_v50, 0.0 }
 0x11b   :  { %v1146_v48 = vadd.f32 %v1145_v47, %v977_v46  ;;  %1479 = vmatpush.bf16.msrb.mxu1 %v2546_v44  ;;  %v69_v44 = vld [vmem:[%s3986_s0 + $0x148] sm:$0xff] }
 0x11d   :  { %v1643_v13 = vmax.f32 %v1146_v48, 0.0 }
 0x11e   :  { %v295_v53 = vpop.f32.mrf.mxu0 }
 0x11f   :  { %v296_v58 = vadd.f32 %v295_v53, %v2999_v40  ;;  %v464_v59 = vpop.f32.mrf.mxu1 }
 0x120   :  { %v465_v60 = vadd.f32 %v464_v59, %v3002_v41  ;;  %v978_v61 = vpop.f32.mrf.mxu2  ;;  %v66_v59 = vld [vmem:[%s3986_s0 + $0x130] sm:$0xff] }
 0x121   :  { %v615_v63 = vmax.f32 %v296_v58, 0.0  ;;  %v979_v0 = vadd.f32 %v978_v61, %v3203_v39  ;;  %v1147_v1 = vpop.f32.mrf.mxu3 }
 0x122   :  { %v616_v3 = vmax.f32 %v465_v60, 0.0  ;;  %v67_v60 = vld [vmem:[%s3986_s0 + $0x138] sm:$0xff] }
 0x123   :  { %v1148_v10 = vadd.f32 %v1147_v1, %v979_v0  ;;  %v3220_v11 = vpack.c.bf16 %v615_v63, %v613_v62 }
 0x124   :  { %v3222_v12 = vpack.c.bf16 %v616_v3, %v614_v2  ;;  %v111_v2 = vpack.c.bf16 %v67_v60, %v66_v59 }
 0x125   :  { %v1645_v14 = vmax.f32 %v1148_v10, 0.0  ;;  %1020 = vmatmul.bf16.gmra.mxu2 %v3220_v11 }
 0x126   :  { %1189 = vmatmul.bf16.gmra.mxu3 %v3222_v12  ;;  %v298_v18 = vpop.f32.mrf.mxu0 }
 0x127   :  { %v3226_v19 = vpack.c.bf16 %v1645_v14, %v1643_v13  ;;  %v467_v20 = vpop.f32.mrf.mxu1  ;;  %v299_v27 = vadd.f32 %v298_v18, %v2999_v40  ;;  %v2697_v18 = vld [vmem:[%s3991_s5 + $0x60] sm:$0xff] }
 0x128   :  { %v981_v21 = vpop.f32.mrf.mxu2  ;;  %v468_v32 = vadd.f32 %v467_v20, %v3002_v41  ;;  %2139 = vmatpush.bf16.msrb.mxu3 %v2697_v18 }
 0x129   :  { %v982_v22 = vadd.f32 %v981_v21, %v3203_v39  ;;  %v1150_v23 = vpop.f32.mrf.mxu3  ;;  %2413 = vmatmul.msk.bf16.gmra.mxu0 %vm142_vm0, %v110_v17  ;;  %v617_v47 = vmax.f32 %v299_v27, 0.0 }
 0x12a   :  { %2445 = vmatmul.msk.bf16.gmra.mxu1 %vm142_vm0, %v110_v17  ;;  %v618_v53 = vmax.f32 %v468_v32, 0.0 }
 0x12b   :  { %v1151_v24 = vadd.f32 %v1150_v23, %v982_v22 }
 0x12d   :  { %v1647_v0 = vmax.f32 %v1151_v24, 0.0 }
 0x12e   :  { %v300_v33 = vpop.f32.mrf.mxu0 }
 0x12f   :  { %v301_v42 = vadd.f32 %v300_v33, %v2999_v40  ;;  %v469_v43 = vpop.f32.mrf.mxu1 }
 0x130   :  { %v470_v45 = vadd.f32 %v469_v43, %v3002_v41  ;;  %v983_v46 = vpop.f32.mrf.mxu2  ;;  %v68_v43 = vld [vmem:[%s3986_s0 + $0x140] sm:$0xff] }
 0x131   :  { %v619_v48 = vmax.f32 %v301_v42, 0.0  ;;  %v984_v49 = vadd.f32 %v983_v46, %v3203_v39  ;;  %v1152_v50 = vpop.f32.mrf.mxu3 }
 0x132   :  { %v620_v58 = vmax.f32 %v470_v45, 0.0 }
 0x133   :  { %v1153_v61 = vadd.f32 %v1152_v50, %v984_v49  ;;  %v3254_v62 = vpack.c.bf16 %v619_v48, %v617_v47  ;;  %v112_v50 = vpack.c.bf16 %v69_v44, %v68_v43 }
 0x134   :  { %v3256_v63 = vpack.c.bf16 %v620_v58, %v618_v53 }
 0x135   :  { %v1649_v1 = vmax.f32 %v1153_v61, 0.0  ;;  %1025 = vmatmul.bf16.gmra.mxu2 %v3254_v62 }
 0x136   :  { %1194 = vmatmul.bf16.gmra.mxu3 %v3256_v63  ;;  %v303_v3 = vpop.f32.mrf.mxu0 }
 0x137   :  { %v472_v5 = vpop.f32.mrf.mxu1  ;;  %v3263_v10 = vpack.c.bf16 %v1649_v1, %v1647_v0  ;;  %v304_v21 = vadd.f32 %v303_v3, %v2999_v40 }
 0x138   :  { %v986_v13 = vpop.f32.mrf.mxu2  ;;  %v473_v22 = vadd.f32 %v472_v5, %v3002_v41 }
 0x139   :  { %v987_v14 = vadd.f32 %v986_v13, %v3203_v39  ;;  %v1155_v17 = vpop.f32.mrf.mxu3  ;;  %2414 = vmatmul.msk.bf16.gmra.mxu0 %vm142_vm0, %v111_v2  ;;  %v621_v32 = vmax.f32 %v304_v21, 0.0 }
 0x13a   :  { %2446 = vmatmul.msk.bf16.gmra.mxu1 %vm142_vm0, %v111_v2  ;;  %v622_v36 = vmax.f32 %v473_v22, 0.0 }
 0x13b   :  { %v1156_v20 = vadd.f32 %v1155_v17, %v987_v14 }
 0x13d   :  { %v1651_v48 = vmax.f32 %v1156_v20, 0.0 }
 0x13e   :  { %v305_v23 = vpop.f32.mrf.mxu0 }
 0x13f   :  { %v306_v24 = vadd.f32 %v305_v23, %v2999_v40  ;;  %v474_v27 = vpop.f32.mrf.mxu1 }
 0x140   :  { %v475_v28 = vadd.f32 %v474_v27, %v3002_v41  ;;  %v988_v29 = vpop.f32.mrf.mxu2  ;;  %v70_v27 = vld [vmem:[%s3986_s0 + $0x150] sm:$0xff] }
 0x141   :  { %v623_v33 = vmax.f32 %v306_v24, 0.0  ;;  %v989_v34 = vadd.f32 %v988_v29, %v3203_v39  ;;  %v1157_v35 = vpop.f32.mrf.mxu3 }
 0x142   :  { %v624_v42 = vmax.f32 %v475_v28, 0.0  ;;  %v71_v28 = vld [vmem:[%s3986_s0 + $0x158] sm:$0xff] }
 0x143   :  { %v1158_v45 = vadd.f32 %v1157_v35, %v989_v34  ;;  %v3282_v46 = vpack.c.bf16 %v623_v33, %v621_v32 }
 0x144   :  { %v3284_v47 = vpack.c.bf16 %v624_v42, %v622_v36  ;;  %v113_v36 = vpack.c.bf16 %v71_v28, %v70_v27 }
 0x145   :  { %v1653_v49 = vmax.f32 %v1158_v45, 0.0  ;;  %1030 = vmatmul.bf16.gmra.mxu2 %v3282_v46 }
 0x146   :  { %1199 = vmatmul.bf16.gmra.mxu3 %v3284_v47  ;;  %v308_v53 = vpop.f32.mrf.mxu0 }
 0x147   :  { %v477_v58 = vpop.f32.mrf.mxu1  ;;  %v3288_v59 = vpack.c.bf16 %v1653_v49, %v1651_v48  ;;  %v309_v2 = vadd.f32 %v308_v53, %v2999_v40 }
 0x148   :  { %v991_v60 = vpop.f32.mrf.mxu2  ;;  %v478_v3 = vadd.f32 %v477_v58, %v3002_v41 }
 0x149   :  { %v992_v61 = vadd.f32 %v991_v60, %v3203_v39  ;;  %v1160_v0 = vpop.f32.mrf.mxu3  ;;  %2415 = vmatmul.msk.bf16.gmra.mxu0 %vm142_vm0, %v112_v50  ;;  %v625_v18 = vmax.f32 %v309_v2, 0.0 }
 0x14a   :  { %2447 = vmatmul.msk.bf16.gmra.mxu1 %vm142_vm0, %v112_v50  ;;  %v626_v23 = vmax.f32 %v478_v3, 0.0 }
 0x14b   :  { %v1161_v1 = vadd.f32 %v1160_v0, %v992_v61 }
 0x14d   :  { %v1655_v34 = vmax.f32 %v1161_v1, 0.0 }
 0x14e   :  { %v310_v4 = vpop.f32.mrf.mxu0 }
 0x14f   :  { %v311_v5 = vadd.f32 %v310_v4, %v2999_v40  ;;  %v479_v13 = vpop.f32.mrf.mxu1 }
 0x150   :  { %v480_v14 = vadd.f32 %v479_v13, %v3002_v41  ;;  %v993_v17 = vpop.f32.mrf.mxu2 }
 0x151   :  { %v627_v20 = vmax.f32 %v311_v5, 0.0  ;;  %v994_v21 = vadd.f32 %v993_v17, %v3203_v39  ;;  %v1162_v22 = vpop.f32.mrf.mxu3 }
 0x152   :  { %v628_v24 = vmax.f32 %v480_v14, 0.0 }
 0x153   :  { %v1163_v29 = vadd.f32 %v1162_v22, %v994_v21  ;;  %v3304_v32 = vpack.c.bf16 %v627_v20, %v625_v18  ;;  %v72_v18 = vld [vmem:[%s3986_s0 + $0x160] sm:$0xff]  ;;  %v73_v20 = vld [vmem:[%s3986_s0 + $0x168] sm:$0xff] }
 0x154   :  { %v3306_v33 = vpack.c.bf16 %v628_v24, %v626_v23  ;;  %v114_v28 = vpack.c.bf16 %v73_v20, %v72_v18 }
 0x155   :  { %v1657_v35 = vmax.f32 %v1163_v29, 0.0  ;;  %1035 = vmatmul.bf16.gmra.mxu2 %v3304_v32 }
 0x156   :  { %1204 = vmatmul.bf16.gmra.mxu3 %v3306_v33  ;;  %v313_v42 = vpop.f32.mrf.mxu0 }
 0x157   :  { %v482_v43 = vpop.f32.mrf.mxu1  ;;  %v3310_v44 = vpack.c.bf16 %v1657_v35, %v1655_v34  ;;  %v314_v53 = vadd.f32 %v313_v42, %v2999_v40 }
 0x158   :  { %v996_v45 = vpop.f32.mrf.mxu2  ;;  %v483_v58 = vadd.f32 %v482_v43, %v3002_v41 }
 0x159   :  { %v997_v48 = vadd.f32 %v996_v45, %v3203_v39  ;;  %v1165_v49 = vpop.f32.mrf.mxu3  ;;  %2416 = vmatmul.msk.bf16.gmra.mxu0 %vm142_vm0, %v113_v36  ;;  %v629_v3 = vmax.f32 %v314_v53, 0.0 }
 0x15a   :  { %2448 = vmatmul.msk.bf16.gmra.mxu1 %vm142_vm0, %v113_v36  ;;  %v630_v14 = vmax.f32 %v483_v58, 0.0 }
 0x15b   :  { %v1166_v50 = vadd.f32 %v1165_v49, %v997_v48  ;;  %v2655_v49 = vld [vmem:[%s3989_s3 + $0x14] sm:$0xf] }
 0x15d   :  { %v1659_v24 = vmax.f32 %v1166_v50, 0.0  ;;  %v2471_v50 = vld [vmem:[%s3989_s3 + $0x18] sm:$0xf0] }
 0x15e   :  { %v315_v60 = vpop.f32.mrf.mxu0 }
 0x15f   :  { %v316_v61 = vadd.f32 %v315_v60, %v2999_v40  ;;  %v484_v0 = vpop.f32.mrf.mxu1  ;;  %v2474_v60 = vor.u32 %v2655_v49, %v2471_v50  ;;  %v2688_v49 = vld [vmem:[%s3991_s5 + $0x18] sm:$0xff] }
 0x160   :  { %v485_v1 = vadd.f32 %v484_v0, %v3002_v41  ;;  %v998_v2 = vpop.f32.mrf.mxu2  ;;  %v2535_v0 = vld [vmem:[%s3989_s3 + $0x98] sm:$0xf0]  ;;  %1971 = vmatpush.bf16.msrb.mxu2 %v2688_v49 }
 0x161   :  { %v631_v4 = vmax.f32 %v316_v61, 0.0  ;;  %v999_v5 = vadd.f32 %v998_v2, %v3203_v39  ;;  %v1167_v13 = vpop.f32.mrf.mxu3  ;;  %v2671_v61 = vld [vmem:[%s3989_s3 + $0x94] sm:$0xf]  ;;  %1311 = vmatpush.bf16.msrb.mxu0 %v2474_v60 }
 0x162   :  { %v632_v17 = vmax.f32 %v485_v1, 0.0 }
 0x163   :  { %v1168_v21 = vadd.f32 %v1167_v13, %v999_v5  ;;  %v3326_v22 = vpack.c.bf16 %v631_v4, %v629_v3  ;;  %v2538_v3 = vor.u32 %v2671_v61, %v2535_v0 }
 0x164   :  { %v3328_v23 = vpack.c.bf16 %v632_v17, %v630_v14 }
 0x165   :  { %v1661_v27 = vmax.f32 %v1168_v21, 0.0  ;;  %1040 = vmatmul.bf16.gmra.mxu2 %v3326_v22  ;;  %1480 = vmatpush.bf16.msrb.mxu1 %v2538_v3 }
 0x166   :  { %1209 = vmatmul.bf16.gmra.mxu3 %v3328_v23  ;;  %v318_v29 = vpop.f32.mrf.mxu0 }
 0x167   :  { %v487_v34 = vpop.f32.mrf.mxu1  ;;  %v3332_v35 = vpack.c.bf16 %v1661_v27, %v1659_v24  ;;  %v319_v48 = vadd.f32 %v318_v29, %v2999_v40  ;;  %v74_v24 = vld [vmem:[%s3986_s0 + $0x170] sm:$0xff]  ;;  %v75_v27 = vld [vmem:[%s3986_s0 + $0x178] sm:$0xff] }
 0x168   :  { %v1001_v36 = vpop.f32.mrf.mxu2  ;;  %v488_v53 = vadd.f32 %v487_v34, %v3002_v41 }
 0x169   :  { %v1002_v42 = vadd.f32 %v1001_v36, %v3203_v39  ;;  %v1170_v43 = vpop.f32.mrf.mxu3  ;;  %2417 = vmatmul.msk.bf16.gmra.mxu0 %vm142_vm0, %v114_v28  ;;  %v633_v13 = vmax.f32 %v319_v48, 0.0 }
 0x16a   :  { %2449 = vmatmul.msk.bf16.gmra.mxu1 %vm142_vm0, %v114_v28  ;;  %v634_v20 = vmax.f32 %v488_v53, 0.0 }
 0x16b   :  { %v1171_v45 = vadd.f32 %v1170_v43, %v1002_v42  ;;  %v115_v43 = vpack.c.bf16 %v75_v27, %v74_v24 }
 0x16d   :  { %v1663_v36 = vmax.f32 %v1171_v45, 0.0  ;;  %v2696_v45 = vld [vmem:[%s3991_s5 + $0x58] sm:$0xff] }
 0x16e   :  { %v320_v58 = vpop.f32.mrf.mxu0  ;;  %2140 = vmatpush.bf16.msrb.mxu3 %v2696_v45 }
 0x16f   :  { %v321_v1 = vadd.f32 %v320_v58, %v2999_v40  ;;  %v489_v2 = vpop.f32.mrf.mxu1 }
 0x170   :  { %v490_v4 = vadd.f32 %v489_v2, %v3002_v41  ;;  %v1003_v5 = vpop.f32.mrf.mxu2 }
 0x171   :  { %v635_v14 = vmax.f32 %v321_v1, 0.0  ;;  %v1004_v17 = vadd.f32 %v1003_v5, %v3203_v39  ;;  %v1172_v18 = vpop.f32.mrf.mxu3 }
 0x172   :  { %v636_v21 = vmax.f32 %v490_v4, 0.0 }
 0x173   :  { %v1173_v28 = vadd.f32 %v1172_v18, %v1004_v17  ;;  %v3360_v29 = vpack.c.bf16 %v635_v14, %v633_v13 }
 0x174   :  { %v3362_v34 = vpack.c.bf16 %v636_v21, %v634_v20 }
 0x175   :  { %v1665_v42 = vmax.f32 %v1173_v28, 0.0  ;;  %1045 = vmatmul.bf16.gmra.mxu2 %v3360_v29  ;;  %v76_v28 = vld [vmem:[%s3986_s0 + $0x180] sm:$0xff] }
 0x176   :  { %1214 = vmatmul.bf16.gmra.mxu3 %v3362_v34  ;;  %v323_v48 = vpop.f32.mrf.mxu0 }
 0x177   :  { %v492_v50 = vpop.f32.mrf.mxu1  ;;  %v3369_v53 = vpack.c.bf16 %v1665_v42, %v1663_v36  ;;  %v324_v1 = vadd.f32 %v323_v48, %v2999_v40  ;;  %v77_v36 = vld [vmem:[%s3986_s0 + $0x188] sm:$0xff] }
 0x178   :  { %v1006_v58 = vpop.f32.mrf.mxu2  ;;  %v493_v2 = vadd.f32 %v492_v50, %v3002_v41 }
 0x179   :  { %v1007_v60 = vadd.f32 %v1006_v58, %v3203_v39  ;;  %v1175_v61 = vpop.f32.mrf.mxu3  ;;  %2418 = vmatmul.msk.bf16.gmra.mxu0 %vm142_vm0, %v115_v43  ;;  %v637_v17 = vmax.f32 %v324_v1, 0.0  ;;  %v116_v58 = vpack.c.bf16 %v77_v36, %v76_v28 }
 0x17a   :  { %2450 = vmatmul.msk.bf16.gmra.mxu1 %vm142_vm0, %v115_v43  ;;  %v638_v24 = vmax.f32 %v493_v2, 0.0 }
 0x17b   :  { %v1176_v0 = vadd.f32 %v1175_v61, %v1007_v60 }
 0x17d   :  { %v1667_v49 = vmax.f32 %v1176_v0, 0.0 }
 0x17e   :  { %v325_v3 = vpop.f32.mrf.mxu0 }
 0x17f   :  { %v326_v4 = vadd.f32 %v325_v3, %v2999_v40  ;;  %v494_v5 = vpop.f32.mrf.mxu1 }
 0x180   :  { %v495_v13 = vadd.f32 %v494_v5, %v3002_v41  ;;  %v1008_v14 = vpop.f32.mrf.mxu2 }
 0x181   :  { %v639_v18 = vmax.f32 %v326_v4, 0.0  ;;  %v1009_v20 = vadd.f32 %v1008_v14, %v3203_v39  ;;  %v1177_v21 = vpop.f32.mrf.mxu3 }
 0x182   :  { %v640_v27 = vmax.f32 %v495_v13, 0.0 }
 0x183   :  { %v1178_v42 = vadd.f32 %v1177_v21, %v1009_v20  ;;  %v3388_v43 = vpack.c.bf16 %v639_v18, %v637_v17 }
 0x184   :  { %v3390_v48 = vpack.c.bf16 %v640_v27, %v638_v24 }
 0x185   :  { %v1669_v50 = vmax.f32 %v1178_v42, 0.0  ;;  %1050 = vmatmul.bf16.gmra.mxu2 %v3388_v43 }
 0x186   :  { %1219 = vmatmul.bf16.gmra.mxu3 %v3390_v48  ;;  %v328_v60 = vpop.f32.mrf.mxu0 }
 0x187   :  { %v497_v61 = vpop.f32.mrf.mxu1  ;;  %v3394_v45 = vpack.c.bf16 %v1669_v50, %v1667_v49  ;;  %v329_v0 = vadd.f32 %v328_v60, %v2999_v40  ;;  %v78_v49 = vld [vmem:[%s3986_s0 + $0x190] sm:$0xff]  ;;  %v79_v50 = vld [vmem:[%s3986_s0 + $0x198] sm:$0xff] }
 0x188   :  { %v1011_v1 = vpop.f32.mrf.mxu2  ;;  %v498_v5 = vadd.f32 %v497_v61, %v3002_v41 }
 0x189   :  { %v1012_v2 = vadd.f32 %v1011_v1, %v3203_v39  ;;  %v1180_v3 = vpop.f32.mrf.mxu3  ;;  %2419 = vmatmul.msk.bf16.gmra.mxu0 %vm142_vm0, %v116_v58  ;;  %v641_v21 = vmax.f32 %v329_v0, 0.0 }
 0x18a   :  { %2451 = vmatmul.msk.bf16.gmra.mxu1 %vm142_vm0, %v116_v58  ;;  %v642_v36 = vmax.f32 %v498_v5, 0.0 }
 0x18b   :  { %v1181_v4 = vadd.f32 %v1180_v3, %v1012_v2  ;;  %v117_v3 = vpack.c.bf16 %v79_v50, %v78_v49 }
 0x18d   :  { %v1671_v1 = vmax.f32 %v1181_v4, 0.0 }
 0x18e   :  { %v330_v13 = vpop.f32.mrf.mxu0 }
 0x18f   :  { %v331_v14 = vadd.f32 %v330_v13, %v2999_v40  ;;  %v499_v17 = vpop.f32.mrf.mxu1 }
 0x190   :  { %v500_v18 = vadd.f32 %v499_v17, %v3002_v41  ;;  %v1013_v20 = vpop.f32.mrf.mxu2 }
 0x191   :  { %v643_v24 = vmax.f32 %v331_v14, 0.0  ;;  %v1014_v27 = vadd.f32 %v1013_v20, %v3203_v39  ;;  %v1182_v28 = vpop.f32.mrf.mxu3 }
 0x192   :  { %v644_v42 = vmax.f32 %v500_v18, 0.0 }
 0x193   :  { %v1183_v58 = vadd.f32 %v1182_v28, %v1014_v27  ;;  %v3410_v60 = vpack.c.bf16 %v643_v24, %v641_v21 }
 0x194   :  { %v3412_v61 = vpack.c.bf16 %v644_v42, %v642_v36 }
 0x195   :  { %4017 = vst [vmem:[#allocation5_spill] sm:$0xff] %v3410_v60  ;;  %v1673_v2 = vmax.f32 %v1183_v58, 0.0  ;;  %1055 = vmatmul.bf16.gmra.mxu2 %v3410_v60 }
 0x196   :  { %4018 = vst [vmem:[#allocation6_spill] sm:$0xff] %v3412_v61  ;;  %1224 = vmatmul.bf16.gmra.mxu3 %v3412_v61  ;;  %v333_v0 = vpop.f32.mrf.mxu0 }
 0x197   :  { %v502_v5 = vpop.f32.mrf.mxu1  ;;  %v3416_v13 = vpack.c.bf16 %v1673_v2, %v1671_v1  ;;  %v334_v4 = vadd.f32 %v333_v0, %v2999_v40  ;;  %v81_v0 = vld [vmem:[%s3986_s0 + $0x1a8] sm:$0xff] }
 0x198   :  { %v1016_v14 = vpop.f32.mrf.mxu2  ;;  %v503_v21 = vadd.f32 %v502_v5, %v3002_v41 }
 0x199   :  { %v1017_v17 = vadd.f32 %v1016_v14, %v3203_v39  ;;  %v1185_v18 = vpop.f32.mrf.mxu3  ;;  %2420 = vmatmul.msk.bf16.gmra.mxu0 %vm142_vm0, %v117_v3  ;;  %v645_v49 = vmax.f32 %v334_v4, 0.0 }
 0x19a   :  { %2452 = vmatmul.msk.bf16.gmra.mxu1 %vm142_vm0, %v117_v3  ;;  %v646_v2 = vmax.f32 %v503_v21, 0.0  ;;  %v80_v3 = vld [vmem:[%s3986_s0 + $0x1a0] sm:$0xff] }
 0x19b   :  { %v1186_v20 = vadd.f32 %v1185_v18, %v1017_v17 }
 0x19d   :  { %v1675_v4 = vmax.f32 %v1186_v20, 0.0 }
 0x19e   :  { %v335_v24 = vpop.f32.mrf.mxu0 }
 0x19f   :  { %v336_v27 = vadd.f32 %v335_v24, %v2999_v40  ;;  %v504_v28 = vpop.f32.mrf.mxu1 }
 0x1a0   :  { %v505_v36 = vadd.f32 %v504_v28, %v3002_v41  ;;  %v1018_v42 = vpop.f32.mrf.mxu2 }
 0x1a1   :  { %v647_v50 = vmax.f32 %v336_v27, 0.0  ;;  %v1019_v58 = vadd.f32 %v1018_v42, %v3203_v39  ;;  %v1187_v1 = vpop.f32.mrf.mxu3  ;;  %v118_v27 = vpack.c.bf16 %v81_v0, %v80_v3  ;;  %v2669_v3 = vld [vmem:[%s3989_s3 + $0x84] sm:$0xf] }
 0x1a2   :  { %v648_v14 = vmax.f32 %v505_v36, 0.0 }
 0x1a3   :  { %v1188_v5 = vadd.f32 %v1187_v1, %v1019_v58  ;;  %v3432_v17 = vpack.c.bf16 %v647_v50, %v645_v49  ;;  %v2653_v50 = vld [vmem:[%s3989_s3 + $0x4] sm:$0xf]  ;;  %v2463_v58 = vld [vmem:[%s3989_s3 + $0x8] sm:$0xf0] }
 0x1a4   :  { %v3434_v18 = vpack.c.bf16 %v648_v14, %v646_v2  ;;  %v2466_v14 = vor.u32 %v2653_v50, %v2463_v58 }
 0x1a5   :  { %4019 = vst [vmem:[#allocation7_spill] sm:$0xff] %v3432_v17  ;;  %v1677_v24 = vmax.f32 %v1188_v5, 0.0  ;;  %1060 = vmatmul.bf16.gmra.mxu2 %v3432_v17 }
 0x1a6   :  { %4020 = vst [vmem:[#allocation8_spill] sm:$0xff] %v3434_v18  ;;  %1229 = vmatmul.bf16.gmra.mxu3 %v3434_v18  ;;  %v338_v21 = vpop.f32.mrf.mxu0  ;;  %1312 = vmatpush.bf16.msrb.mxu0 %v2466_v14  ;;  %v82_v18 = vld [vmem:[%s3986_s0 + $0x1b0] sm:$0xff] }
 0x1a7   :  { %v507_v28 = vpop.f32.mrf.mxu1  ;;  %v3438_v36 = vpack.c.bf16 %v1677_v24, %v1675_v4  ;;  %v339_v20 = vadd.f32 %v338_v21, %v2999_v40 }
 0x1a8   :  { %v1021_v42 = vpop.f32.mrf.mxu2  ;;  %v508_v1 = vadd.f32 %v507_v28, %v3002_v41 }
 0x1a9   :  { %4021 = vst [vmem:[#allocation9_spill] sm:$0xff] %v3438_v36  ;;  %v1022_v61 = vadd.f32 %v1021_v42, %v3203_v39  ;;  %v1190_v60 = vpop.f32.mrf.mxu3  ;;  %2421 = vmatmul.msk.bf16.gmra.mxu0 %vm142_vm0, %v118_v27 }
 0x1aa   :  { %2453 = vmatmul.msk.bf16.gmra.mxu1 %vm142_vm0, %v118_v27  ;;  %v649_v27 = vmax.f32 %v339_v20, 0.0  ;;  %v650_v50 = vmax.f32 %v508_v1, 0.0 }
 0x1ab   :  { %v1191_v49 = vadd.f32 %v1190_v60, %v1022_v61  ;;  %v2527_v60 = vld [vmem:[%s3989_s3 + $0x88] sm:$0xf0] }
 0x1ac   :  { %v2530_v5 = vor.u32 %v2669_v3, %v2527_v60 }
 0x1ad   :  { %v1679_v20 = vmax.f32 %v1191_v49, 0.0 }
 0x1ae   :  { %v340_v2 = vpop.f32.mrf.mxu0  ;;  %1481 = vmatpush.bf16.msrb.mxu1 %v2530_v5  ;;  %v2687_v5 = vld [vmem:[%s3991_s5 + $0x10] sm:$0xff] }
 0x1af   :  { %v341_v61 = vadd.f32 %v340_v2, %v2999_v40  ;;  %v509_v0 = vpop.f32.mrf.mxu1  ;;  %v83_v2 = vld [vmem:[%s3986_s0 + $0x1b8] sm:$0xff]  ;;  %1972 = vmatpush.bf16.msrb.mxu2 %v2687_v5 }
 0x1b0   :  { %v510_v4 = vadd.f32 %v509_v0, %v3002_v41  ;;  %v1023_v24 = vpop.f32.mrf.mxu2  ;;  %v119_v0 = vpack.c.bf16 %v83_v2, %v82_v18  ;;  %v2695_v18 = vld [vmem:[%s3991_s5 + $0x50] sm:$0xff] }
 0x1b1   :  { %v651_v21 = vmax.f32 %v341_v61, 0.0  ;;  %v1024_v28 = vadd.f32 %v1023_v24, %v3203_v39  ;;  %v1192_v42 = vpop.f32.mrf.mxu3  ;;  %2141 = vmatpush.bf16.msrb.mxu3 %v2695_v18 }
 0x1b2   :  { %v652_v58 = vmax.f32 %v510_v4, 0.0 }
 0x1b3   :  { %v1193_v3 = vadd.f32 %v1192_v42, %v1024_v28  ;;  %v3466_v60 = vpack.c.bf16 %v651_v21, %v649_v27 }
 0x1b4   :  { %v3468_v14 = vpack.c.bf16 %v652_v58, %v650_v50 }
 0x1b5   :  { %4022 = vst [vmem:[#allocation10_spill] sm:$0xff] %v3466_v60  ;;  %v1681_v61 = vmax.f32 %v1193_v3, 0.0  ;;  %1065 = vmatmul.bf16.gmra.mxu2 %v3466_v60 }
 0x1b6   :  { %4023 = vst [vmem:[#allocation11_spill] sm:$0xff] %v3468_v14  ;;  %1234 = vmatmul.bf16.gmra.mxu3 %v3468_v14  ;;  %v343_v1 = vpop.f32.mrf.mxu0 }
 0x1b7   :  { %v512_v4 = vpop.f32.mrf.mxu1  ;;  %v3475_v24 = vpack.c.bf16 %v1681_v61, %v1679_v20  ;;  %v344_v42 = vadd.f32 %v343_v1, %v2999_v40  ;;  %v84_v1 = vld [vmem:[%s3986_s0 + $0x1c0] sm:$0xff] }
 0x1b8   :  { %v1026_v28 = vpop.f32.mrf.mxu2  ;;  %v513_v50 = vadd.f32 %v512_v4, %v3002_v41  ;;  %v85_v4 = vld [vmem:[%s3986_s0 + $0x1c8] sm:$0xff] }
 0x1b9   :  { %4024 = vst [vmem:[#allocation12_spill] sm:$0xff] %v3475_v24  ;;  %v1027_v27 = vadd.f32 %v1026_v28, %v3203_v39  ;;  %v1195_v21 = vpop.f32.mrf.mxu3  ;;  %2422 = vmatmul.msk.bf16.gmra.mxu0 %vm142_vm0, %v119_v0  ;;  %v653_v5 = vmax.f32 %v344_v42, 0.0 }
 0x1ba   :  { %2454 = vmatmul.msk.bf16.gmra.mxu1 %vm142_vm0, %v119_v0  ;;  %v654_v60 = vmax.f32 %v513_v50, 0.0 }
 0x1bb   :  { %v1196_v49 = vadd.f32 %v1195_v21, %v1027_v27 }
 0x1bd   :  { %v1683_v42 = vmax.f32 %v1196_v49, 0.0 }
 0x1be   :  { %v345_v58 = vpop.f32.mrf.mxu0 }
 0x1bf   :  { %v346_v2 = vadd.f32 %v345_v58, %v2999_v40  ;;  %v514_v3 = vpop.f32.mrf.mxu1 }
 0x1c0   :  { %v515_v20 = vadd.f32 %v514_v3, %v3002_v41  ;;  %v1028_v61 = vpop.f32.mrf.mxu2 }
 0x1c1   :  { %v655_v28 = vmax.f32 %v346_v2, 0.0  ;;  %v1029_v0 = vadd.f32 %v1028_v61, %v3203_v39  ;;  %v1197_v14 = vpop.f32.mrf.mxu3  ;;  %v120_v2 = vpack.c.bf16 %v85_v4, %v84_v1 }
 0x1c2   :  { %v656_v24 = vmax.f32 %v515_v20, 0.0 }
 0x1c3   :  { %v1198_v27 = vadd.f32 %v1197_v14, %v1029_v0  ;;  %v3494_v21 = vpack.c.bf16 %v655_v28, %v653_v5 }
 0x1c4   :  { %v3496_v18 = vpack.c.bf16 %v656_v24, %v654_v60 }
 0x1c5   :  { %4025 = vst [vmem:[#allocation13_spill] sm:$0xff] %v3494_v21  ;;  %v1685_v58 = vmax.f32 %v1198_v27, 0.0  ;;  %1070 = vmatmul.bf16.gmra.mxu2 %v3494_v21 }
 0x1c6   :  { %4026 = vst [vmem:[#allocation14_spill] sm:$0xff] %v3496_v18  ;;  %1239 = vmatmul.bf16.gmra.mxu3 %v3496_v18  ;;  %v348_v50 = vpop.f32.mrf.mxu0 }
 0x1c7   :  { %v517_v3 = vpop.f32.mrf.mxu1  ;;  %v3500_v20 = vpack.c.bf16 %v1685_v58, %v1683_v42  ;;  %v349_v14 = vadd.f32 %v348_v50, %v2999_v40 }
 0x1c8   :  { %v1031_v61 = vpop.f32.mrf.mxu2  ;;  %v518_v24 = vadd.f32 %v517_v3, %v3002_v41 }
 0x1c9   :  { %4027 = vst [vmem:[#allocation15_spill] sm:$0xff] %v3500_v20  ;;  %v1032_v17 = vadd.f32 %v1031_v61, %v3203_v39  ;;  %v1200_v36 = vpop.f32.mrf.mxu3  ;;  %2423 = vmatmul.msk.bf16.gmra.mxu0 %vm142_vm0, %v120_v2  ;;  %v657_v4 = vmax.f32 %v349_v14, 0.0 }
 0x1ca   :  { %2455 = vmatmul.msk.bf16.gmra.mxu1 %vm142_vm0, %v120_v2  ;;  %v658_v61 = vmax.f32 %v518_v24, 0.0 }
 0x1cb   :  { %v1201_v60 = vadd.f32 %v1200_v36, %v1032_v17  ;;  %v86_v17 = vld [vmem:[%s3986_s0 + $0x1d0] sm:$0xff]  ;;  %v87_v36 = vld [vmem:[%s3986_s0 + $0x1d8] sm:$0xff] }
 0x1cd   :  { %v1687_v14 = vmax.f32 %v1201_v60, 0.0 }
 0x1ce   :  { %v350_v49 = vpop.f32.mrf.mxu0 }
 0x1cf   :  { %v351_v5 = vadd.f32 %v350_v49, %v2999_v40  ;;  %v519_v28 = vpop.f32.mrf.mxu1 }
 0x1d0   :  { %v520_v0 = vadd.f32 %v519_v28, %v3002_v41  ;;  %v1033_v1 = vpop.f32.mrf.mxu2 }
 0x1d1   :  { %v659_v27 = vmax.f32 %v351_v5, 0.0  ;;  %v1034_v42 = vadd.f32 %v1033_v1, %v3203_v39  ;;  %v1202_v58 = vpop.f32.mrf.mxu3  ;;  %v121_v5 = vpack.c.bf16 %v87_v36, %v86_v17 }
 0x1d2   :  { %v660_v18 = vmax.f32 %v520_v0, 0.0 }
 0x1d3   :  { %v1203_v2 = vadd.f32 %v1202_v58, %v1034_v42  ;;  %v3516_v50 = vpack.c.bf16 %v659_v27, %v657_v4 }
 0x1d4   :  { %v3518_v3 = vpack.c.bf16 %v660_v18, %v658_v61 }
 0x1d5   :  { %4028 = vst [vmem:[#allocation16_spill] sm:$0xff] %v3516_v50  ;;  %v1689_v49 = vmax.f32 %v1203_v2, 0.0  ;;  %1075 = vmatmul.bf16.gmra.mxu2 %v3516_v50 }
 0x1d6   :  { %4029 = vst [vmem:[#allocation17_spill] sm:$0xff] %v3518_v3  ;;  %1244 = vmatmul.bf16.gmra.mxu3 %v3518_v3  ;;  %v353_v24 = vpop.f32.mrf.mxu0 }
 0x1d7   :  { %v522_v28 = vpop.f32.mrf.mxu1  ;;  %v3522_v0 = vpack.c.bf16 %v1689_v49, %v1687_v14  ;;  %v354_v60 = vadd.f32 %v353_v24, %v2999_v40 }
 0x1d8   :  { %v1036_v1 = vpop.f32.mrf.mxu2  ;;  %v523_v4 = vadd.f32 %v522_v28, %v3002_v41 }
 0x1d9   :  { %4030 = vst [vmem:[#allocation18_spill] sm:$0xff] %v3522_v0  ;;  %v1037_v21 = vadd.f32 %v1036_v1, %v3203_v39  ;;  %v1205_v20 = vpop.f32.mrf.mxu3  ;;  %2424 = vmatmul.msk.bf16.gmra.mxu0 %vm142_vm0, %v121_v5  ;;  %v661_v36 = vmax.f32 %v354_v60, 0.0 }
 0x1da   :  { %2456 = vmatmul.msk.bf16.gmra.mxu1 %vm142_vm0, %v121_v5  ;;  %v662_v1 = vmax.f32 %v523_v4, 0.0 }
 0x1db   :  { %v1206_v18 = vadd.f32 %v1205_v20, %v1037_v21  ;;  %v88_v21 = vld [vmem:[%s3986_s0 + $0x1e0] sm:$0xff]  ;;  %v89_v20 = vld [vmem:[%s3986_s0 + $0x1e8] sm:$0xff] }
 0x1dd   :  { %v1691_v60 = vmax.f32 %v1206_v18, 0.0 }
 0x1de   :  { %v355_v27 = vpop.f32.mrf.mxu0 }
 0x1df   :  { %v356_v42 = vadd.f32 %v355_v27, %v2999_v40  ;;  %v524_v58 = vpop.f32.mrf.mxu1 }
 0x1e0   :  { %v525_v61 = vadd.f32 %v524_v58, %v3002_v41  ;;  %v1038_v17 = vpop.f32.mrf.mxu2 }
 0x1e1   :  { %v663_v2 = vmax.f32 %v356_v42, 0.0  ;;  %v1039_v14 = vadd.f32 %v1038_v17, %v3203_v39  ;;  %v1207_v49 = vpop.f32.mrf.mxu3  ;;  %v122_v42 = vpack.c.bf16 %v89_v20, %v88_v21 }
 0x1e2   :  { %v664_v3 = vmax.f32 %v525_v61, 0.0 }
 0x1e3   :  { %v1208_v5 = vadd.f32 %v1207_v49, %v1039_v14  ;;  %v3538_v24 = vpack.c.bf16 %v663_v2, %v661_v36 }
 0x1e4   :  { %v3540_v28 = vpack.c.bf16 %v664_v3, %v662_v1 }
 0x1e5   :  { %v1693_v27 = vmax.f32 %v1208_v5, 0.0  ;;  %1080 = vmatmul.bf16.gmra.mxu2 %v3538_v24 }
 0x1e6   :  { %4031 = vst [vmem:[#allocation19_spill] sm:$0xff] %v3540_v28  ;;  %1249 = vmatmul.bf16.gmra.mxu3 %v3540_v28  ;;  %v358_v4 = vpop.f32.mrf.mxu0 }
 0x1e7   :  { %v527_v58 = vpop.f32.mrf.mxu1  ;;  %v3544_v61 = vpack.c.bf16 %v1693_v27, %v1691_v60  ;;  %v359_v18 = vadd.f32 %v358_v4, %v2999_v40 }
 0x1e8   :  { %v1041_v17 = vpop.f32.mrf.mxu2  ;;  %v528_v36 = vadd.f32 %v527_v58, %v3002_v41 }
 0x1e9   :  { %v1042_v50 = vadd.f32 %v1041_v17, %v3203_v39  ;;  %v1210_v0 = vpop.f32.mrf.mxu3  ;;  %2425 = vmatmul.msk.bf16.gmra.mxu0 %vm142_vm0, %v122_v42  ;;  %v665_v20 = vmax.f32 %v359_v18, 0.0 }
 0x1ea   :  { %2457 = vmatmul.msk.bf16.gmra.mxu1 %vm142_vm0, %v122_v42  ;;  %v666_v17 = vmax.f32 %v528_v36, 0.0 }
 0x1eb   :  { %v1211_v3 = vadd.f32 %v1210_v0, %v1042_v50  ;;  %v90_v50 = vld [vmem:[%s3986_s0 + $0x1f0] sm:$0xff]  ;;  %v91_v0 = vld [vmem:[%s3986_s0 + $0x1f8] sm:$0xff] }
 0x1ed   :  { %v1695_v18 = vmax.f32 %v1211_v3, 0.0  ;;  %v2694_v3 = vld [vmem:[%s3991_s5 + $0x48] sm:$0xff] }
 0x1ee   :  { %v360_v2 = vpop.f32.mrf.mxu0  ;;  %2142 = vmatpush.bf16.msrb.mxu3 %v2694_v3 }
 0x1ef   :  { %v361_v14 = vadd.f32 %v360_v2, %v2999_v40  ;;  %v529_v49 = vpop.f32.mrf.mxu1 }
 0x1f0   :  { %v530_v1 = vadd.f32 %v529_v49, %v3002_v41  ;;  %v1043_v21 = vpop.f32.mrf.mxu2  ;;  %v2686_v49 = vld [vmem:[%s3991_s5 + $0x8] sm:$0xff] }
 0x1f1   :  { %v667_v5 = vmax.f32 %v361_v14, 0.0  ;;  %v1044_v60 = vadd.f32 %v1043_v21, %v3203_v39  ;;  %v1212_v27 = vpop.f32.mrf.mxu3  ;;  %v123_v14 = vpack.c.bf16 %v91_v0, %v90_v50  ;;  %1973 = vmatpush.bf16.msrb.mxu2 %v2686_v49 }
 0x1f2   :  { %v668_v28 = vmax.f32 %v530_v1, 0.0 }
 0x1f3   :  { %v1213_v42 = vadd.f32 %v1212_v27, %v1044_v60  ;;  %v3560_v4 = vpack.c.bf16 %v667_v5, %v665_v20 }
 0x1f4   :  { %v3562_v58 = vpack.c.bf16 %v668_v28, %v666_v17 }
 0x1f5   :  { %4032 = vst [vmem:[#allocation20_spill] sm:$0xff] %v3560_v4  ;;  %v1697_v2 = vmax.f32 %v1213_v42, 0.0  ;;  %1085 = vmatmul.bf16.gmra.mxu2 %v3560_v4 }
 0x1f6   :  { %4033 = vst [vmem:[#allocation21_spill] sm:$0xff] %v3562_v58  ;;  %1254 = vmatmul.bf16.gmra.mxu3 %v3562_v58  ;;  %v363_v36 = vpop.f32.mrf.mxu0 }
 0x1f7   :  { %v532_v1 = vpop.f32.mrf.mxu1  ;;  %v3569_v21 = vpack.c.bf16 %v1697_v2, %v1695_v18  ;;  %v364_v27 = vadd.f32 %v363_v36, %v2999_v40 }
 0x1f8   :  { %v1046_v60 = vpop.f32.mrf.mxu2  ;;  %v533_v17 = vadd.f32 %v532_v1, %v3002_v41 }
 0x1f9   :  { %4034 = vst [vmem:[#allocation22_spill] sm:$0xff] %v3569_v21  ;;  %v1047_v28 = vadd.f32 %v1046_v60, %v3203_v39  ;;  %v1215_v20 = vpop.f32.mrf.mxu3  ;;  %2426 = vmatmul.msk.bf16.gmra.mxu0 %vm142_vm0, %v123_v14  ;;  %v669_v49 = vmax.f32 %v364_v27, 0.0 }
 0x1fa   :  { %2458 = vmatmul.msk.bf16.gmra.mxu1 %vm142_vm0, %v123_v14  ;;  %v670_v4 = vmax.f32 %v533_v17, 0.0 }
 0x1fb   :  { %v1216_v5 = vadd.f32 %v1215_v20, %v1047_v28 }
 0x1fd   :  { %v1699_v1 = vmax.f32 %v1216_v5, 0.0 }
 0x1fe   :  { %v365_v50 = vpop.f32.mrf.mxu0 }
 0x1ff   :  { %v366_v0 = vadd.f32 %v365_v50, %v2999_v40  ;;  %v534_v42 = vpop.f32.mrf.mxu1 }
 0x200   :  { %v535_v18 = vadd.f32 %v534_v42, %v3002_v41  ;;  %v1048_v2 = vpop.f32.mrf.mxu2 }
 0x201   :  { %v671_v60 = vmax.f32 %v366_v0, 0.0  ;;  %v1049_v14 = vadd.f32 %v1048_v2, %v3203_v39  ;;  %v1217_v58 = vpop.f32.mrf.mxu3 }
 0x202   :  { %v672_v21 = vmax.f32 %v535_v18, 0.0 }
 0x203   :  { %v1218_v28 = vadd.f32 %v1217_v58, %v1049_v14  ;;  %v3582_v20 = vpack.c.bf16 %v671_v60, %v669_v49 }
 0x204   :  { %v3584_v36 = vpack.c.bf16 %v672_v21, %v670_v4 }
 0x205   :  { %v1701_v3 = vmax.f32 %v1218_v28, 0.0  ;;  %1090 = vmatmul.bf16.gmra.mxu2 %v3582_v20 }
 0x206   :  { %4035 = vst [vmem:[#allocation23_spill] sm:$0xff] %v3584_v36  ;;  %1259 = vmatmul.bf16.gmra.mxu3 %v3584_v36  ;;  %v368_v50 = vpop.f32.mrf.mxu0 }
 0x207   :  { %v537_v42 = vpop.f32.mrf.mxu1  ;;  %v3588_v27 = vpack.c.bf16 %v1701_v3, %v1699_v1  ;;  %v369_v58 = vadd.f32 %v368_v50, %v2999_v40 }
 0x208   :  { %v1051_v0 = vpop.f32.mrf.mxu2  ;;  %v538_v21 = vadd.f32 %v537_v42, %v3002_v41 }
 0x209   :  { %v1052_v2 = vadd.f32 %v1051_v0, %v3203_v39  ;;  %v1220_v17 = vpop.f32.mrf.mxu3  ;;  %1313 = vmatmul.bf16.vlgmr.msrb.gmra.mxu0 %v3015_v54  ;;  %v673_v28 = vmax.f32 %v369_v58, 0.0 }
 0x20a   :  { %1482 = vmatmul.bf16.vlgmr.msrb.gmra.mxu1 %v3017_v55  ;;  %v674_v54 = vmax.f32 %v538_v21, 0.0 }
 0x20b   :  { %v1221_v4 = vadd.f32 %v1220_v17, %v1052_v2 }
 0x20d   :  { %v1703_v42 = vmax.f32 %v1221_v4, 0.0 }
 0x20e   :  { %v370_v5 = vpop.f32.mrf.mxu0 }
 0x20f   :  { %v371_v18 = vadd.f32 %v370_v5, %v2999_v40  ;;  %v539_v49 = vpop.f32.mrf.mxu1 }
 0x210   :  { %v540_v60 = vadd.f32 %v539_v49, %v3002_v41  ;;  %v1053_v14 = vpop.f32.mrf.mxu2 }
 0x211   :  { %v675_v1 = vmax.f32 %v371_v18, 0.0  ;;  %v1054_v3 = vadd.f32 %v1053_v14, %v3203_v39  ;;  %v1222_v0 = vpop.f32.mrf.mxu3 }
 0x212   :  { %v676_v36 = vmax.f32 %v540_v60, 0.0 }
 0x213   :  { %v1223_v55 = vadd.f32 %v1222_v0, %v1054_v3  ;;  %v3598_v2 = vpack.c.bf16 %v675_v1, %v673_v28 }
 0x214   :  { %v3600_v50 = vpack.c.bf16 %v676_v36, %v674_v54 }
 0x215   :  { %v1705_v17 = vmax.f32 %v1223_v55, 0.0  ;;  %1095 = vmatmul.bf16.gmra.mxu2 %v3598_v2 }
 0x216   :  { %4036 = vst [vmem:[#allocation24_spill] sm:$0xff] %v3600_v50  ;;  %1264 = vmatmul.bf16.gmra.mxu3 %v3600_v50  ;;  %v373_v5 = vpop.f32.mrf.mxu0 }
 0x217   :  { %v542_v49 = vpop.f32.mrf.mxu1  ;;  %v3604_v58 = vpack.c.bf16 %v1705_v17, %v1703_v42  ;;  %v374_v4 = vadd.f32 %v373_v5, %v2999_v40 }
 0x218   :  { %v1056_v18 = vpop.f32.mrf.mxu2  ;;  %v543_v60 = vadd.f32 %v542_v49, %v3002_v41 }
 0x219   :  { %v1057_v14 = vadd.f32 %v1056_v18, %v3203_v39  ;;  %v1225_v21 = vpop.f32.mrf.mxu3  ;;  %1318 = vmatmul.bf16.gmra.mxu0 %v3033_v7  ;;  %v677_v55 = vmax.f32 %v374_v4, 0.0 }
 0x21a   :  { %1487 = vmatmul.bf16.gmra.mxu1 %v3035_v8  ;;  %v678_v7 = vmax.f32 %v543_v60, 0.0 }
 0x21b   :  { %v1226_v36 = vadd.f32 %v1225_v21, %v1057_v14 }
 0x21d   :  { %v1707_v49 = vmax.f32 %v1226_v36, 0.0 }
 0x21e   :  { %v375_v28 = vpop.f32.mrf.mxu0 }
 0x21f   :  { %v376_v1 = vadd.f32 %v375_v28, %v2999_v40  ;;  %v544_v3 = vpop.f32.mrf.mxu1 }
 0x220   :  { %v545_v0 = vadd.f32 %v544_v3, %v3002_v41  ;;  %v1058_v54 = vpop.f32.mrf.mxu2 }
 0x221   :  { %v679_v42 = vmax.f32 %v376_v1, 0.0  ;;  %v1059_v17 = vadd.f32 %v1058_v54, %v3203_v39  ;;  %v1227_v18 = vpop.f32.mrf.mxu3 }
 0x222   :  { %v680_v50 = vmax.f32 %v545_v0, 0.0 }
 0x223   :  { %v1228_v8 = vadd.f32 %v1227_v18, %v1059_v17  ;;  %v3614_v14 = vpack.c.bf16 %v679_v42, %v677_v55 }
 0x224   :  { %v3616_v5 = vpack.c.bf16 %v680_v50, %v678_v7 }
 0x225   :  { %v1709_v21 = vmax.f32 %v1228_v8, 0.0  ;;  %1100 = vmatmul.bf16.gmra.mxu2 %v3614_v14 }
 0x226   :  { %4037 = vst [vmem:[#allocation25_spill] sm:$0xff] %v3616_v5  ;;  %1269 = vmatmul.bf16.gmra.mxu3 %v3616_v5  ;;  %v378_v28 = vpop.f32.mrf.mxu0 }
 0x227   :  { %v547_v3 = vpop.f32.mrf.mxu1  ;;  %v3620_v4 = vpack.c.bf16 %v1709_v21, %v1707_v49  ;;  %v379_v36 = vadd.f32 %v378_v28, %v2999_v40 }
 0x228   :  { %v1061_v1 = vpop.f32.mrf.mxu2  ;;  %v548_v0 = vadd.f32 %v547_v3, %v3002_v41 }
 0x229   :  { %v1062_v54 = vadd.f32 %v1061_v1, %v3203_v39  ;;  %v1230_v60 = vpop.f32.mrf.mxu3  ;;  %1323 = vmatmul.bf16.gmra.mxu0 %v3063_v30  ;;  %v681_v8 = vmax.f32 %v379_v36, 0.0  ;;  %v2685_v36 = vld [vmem:[%s3991_s5] sm:$0xff] }
 0x22a   :  { %1492 = vmatmul.bf16.gmra.mxu1 %v3065_v31  ;;  %v682_v30 = vmax.f32 %v548_v0, 0.0  ;;  %1974 = vmatpush.bf16.msrb.mxu2 %v2685_v36 }
 0x22b   :  { %v1231_v50 = vadd.f32 %v1230_v60, %v1062_v54 }
 0x22d   :  { %v1711_v3 = vmax.f32 %v1231_v50, 0.0  ;;  %v2693_v50 = vld [vmem:[%s3991_s5 + $0x40] sm:$0xff] }
 0x22e   :  { %v380_v55 = vpop.f32.mrf.mxu0  ;;  %2143 = vmatpush.bf16.msrb.mxu3 %v2693_v50 }
 0x22f   :  { %v381_v42 = vadd.f32 %v380_v55, %v2999_v40  ;;  %v549_v17 = vpop.f32.mrf.mxu1 }
 0x230   :  { %v550_v18 = vadd.f32 %v549_v17, %v3002_v41  ;;  %v1063_v7 = vpop.f32.mrf.mxu2 }
 0x231   :  { %v683_v49 = vmax.f32 %v381_v42, 0.0  ;;  %v1064_v21 = vadd.f32 %v1063_v7, %v3203_v39  ;;  %v1232_v1 = vpop.f32.mrf.mxu3 }
 0x232   :  { %v684_v5 = vmax.f32 %v550_v18, 0.0 }
 0x233   :  { %v1233_v31 = vadd.f32 %v1232_v1, %v1064_v21  ;;  %v3630_v54 = vpack.c.bf16 %v683_v49, %v681_v8 }
 0x234   :  { %v3632_v28 = vpack.c.bf16 %v684_v5, %v682_v30 }
 0x235   :  { %v1713_v60 = vmax.f32 %v1233_v31, 0.0  ;;  %1105 = vmatmul.bf16.gmra.mxu2 %v3630_v54 }
 0x236   :  { %4038 = vst [vmem:[#allocation26_spill] sm:$0xff] %v3632_v28  ;;  %1274 = vmatmul.bf16.gmra.mxu3 %v3632_v28  ;;  %v383_v55 = vpop.f32.mrf.mxu0 }
 0x237   :  { %v552_v42 = vpop.f32.mrf.mxu1  ;;  %v3639_v17 = vpack.c.bf16 %v1713_v60, %v1711_v3  ;;  %v384_v8 = vadd.f32 %v383_v55, %v2999_v40 }
 0x238   :  { %v1066_v0 = vpop.f32.mrf.mxu2  ;;  %v553_v49 = vadd.f32 %v552_v42, %v3002_v41 }
 0x239   :  { %v1067_v18 = vadd.f32 %v1066_v0, %v3203_v39  ;;  %v1235_v5 = vpop.f32.mrf.mxu3  ;;  %1328 = vmatmul.bf16.gmra.mxu0 %v3087_v51  ;;  %v685_v51 = vmax.f32 %v384_v8, 0.0 }
 0x23a   :  { %1497 = vmatmul.bf16.gmra.mxu1 %v3089_v52  ;;  %v686_v0 = vmax.f32 %v553_v49, 0.0 }
 0x23b   :  { %v1236_v7 = vadd.f32 %v1235_v5, %v1067_v18 }
 0x23d   :  { %v1715_v42 = vmax.f32 %v1236_v7, 0.0 }
 0x23e   :  { %v385_v21 = vpop.f32.mrf.mxu0 }
 0x23f   :  { %v386_v1 = vadd.f32 %v385_v21, %v2999_v40  ;;  %v554_v30 = vpop.f32.mrf.mxu1 }
 0x240   :  { %v555_v31 = vadd.f32 %v554_v30, %v3002_v41  ;;  %v1068_v3 = vpop.f32.mrf.mxu2 }
 0x241   :  { %v687_v60 = vmax.f32 %v386_v1, 0.0  ;;  %v1069_v52 = vadd.f32 %v1068_v3, %v3203_v39  ;;  %v1237_v36 = vpop.f32.mrf.mxu3 }
 0x242   :  { %v688_v28 = vmax.f32 %v555_v31, 0.0 }
 0x243   :  { %v1238_v18 = vadd.f32 %v1237_v36, %v1069_v52  ;;  %v3652_v5 = vpack.c.bf16 %v687_v60, %v685_v51 }
 0x244   :  { %v3654_v55 = vpack.c.bf16 %v688_v28, %v686_v0 }
 0x245   :  { %v1717_v50 = vmax.f32 %v1238_v18, 0.0  ;;  %1110 = vmatmul.bf16.gmra.mxu2 %v3652_v5 }
 0x246   :  { %4039 = vst [vmem:[#allocation27_spill] sm:$0xff] %v3654_v55  ;;  %1279 = vmatmul.bf16.gmra.mxu3 %v3654_v55  ;;  %v388_v21 = vpop.f32.mrf.mxu0 }
 0x247   :  { %v557_v30 = vpop.f32.mrf.mxu1  ;;  %v3658_v8 = vpack.c.bf16 %v1717_v50, %v1715_v42  ;;  %v389_v7 = vadd.f32 %v388_v21, %v2999_v40 }
 0x248   :  { %v1071_v1 = vpop.f32.mrf.mxu2  ;;  %v558_v31 = vadd.f32 %v557_v30, %v3002_v41 }
 0x249   :  { %v1072_v3 = vadd.f32 %v1071_v1, %v3203_v39  ;;  %v1240_v49 = vpop.f32.mrf.mxu3  ;;  %1333 = vmatmul.bf16.gmra.mxu0 %v3105_v6  ;;  %v689_v18 = vmax.f32 %v389_v7, 0.0 }
 0x24a   :  { %1502 = vmatmul.bf16.gmra.mxu1 %v3107_v9  ;;  %v690_v6 = vmax.f32 %v558_v31, 0.0 }
 0x24b   :  { %v1241_v28 = vadd.f32 %v1240_v49, %v1072_v3 }
 0x24d   :  { %v1719_v30 = vmax.f32 %v1241_v28, 0.0 }
 0x24e   :  { %v390_v51 = vpop.f32.mrf.mxu0 }
 0x24f   :  { %v391_v60 = vadd.f32 %v390_v51, %v2999_v40  ;;  %v559_v52 = vpop.f32.mrf.mxu1 }
 0x250   :  { %v560_v36 = vadd.f32 %v559_v52, %v3002_v41  ;;  %v1073_v0 = vpop.f32.mrf.mxu2 }
 0x251   :  { %v691_v42 = vmax.f32 %v391_v60, 0.0  ;;  %v1074_v50 = vadd.f32 %v1073_v0, %v3203_v39  ;;  %v1242_v1 = vpop.f32.mrf.mxu3 }
 0x252   :  { %v692_v55 = vmax.f32 %v560_v36, 0.0 }
 0x253   :  { %v1243_v9 = vadd.f32 %v1242_v1, %v1074_v50  ;;  %v3668_v3 = vpack.c.bf16 %v691_v42, %v689_v18 }
 0x254   :  { %v3670_v21 = vpack.c.bf16 %v692_v55, %v690_v6 }
 0x255   :  { %v1721_v49 = vmax.f32 %v1243_v9, 0.0  ;;  %1115 = vmatmul.bf16.gmra.mxu2 %v3668_v3 }
 0x256   :  { %4040 = vst [vmem:[#allocation28_spill] sm:$0xff] %v3670_v21  ;;  %1284 = vmatmul.bf16.gmra.mxu3 %v3670_v21  ;;  %v393_v51 = vpop.f32.mrf.mxu0 }
 0x257   :  { %v562_v52 = vpop.f32.mrf.mxu1  ;;  %v3674_v7 = vpack.c.bf16 %v1721_v49, %v1719_v30  ;;  %v394_v28 = vadd.f32 %v393_v51, %v2999_v40 }
 0x258   :  { %v1076_v60 = vpop.f32.mrf.mxu2  ;;  %v563_v36 = vadd.f32 %v562_v52, %v3002_v41 }
 0x259   :  { %v1077_v0 = vadd.f32 %v1076_v60, %v3203_v39  ;;  %v1245_v31 = vpop.f32.mrf.mxu3  ;;  %1338 = vmatmul.bf16.gmra.mxu0 %v3123_v25  ;;  %v693_v9 = vmax.f32 %v394_v28, 0.0 }
 0x25a   :  { %1507 = vmatmul.bf16.gmra.mxu1 %v3125_v26  ;;  %v694_v25 = vmax.f32 %v563_v36, 0.0 }
 0x25b   :  { %v1246_v55 = vadd.f32 %v1245_v31, %v1077_v0 }
 0x25d   :  { %v1723_v52 = vmax.f32 %v1246_v55, 0.0 }
 0x25e   :  { %v395_v18 = vpop.f32.mrf.mxu0 }
 0x25f   :  { %v396_v42 = vadd.f32 %v395_v18, %v2999_v40  ;;  %v564_v50 = vpop.f32.mrf.mxu1 }
 0x260   :  { %v565_v1 = vadd.f32 %v564_v50, %v3002_v41  ;;  %v1078_v6 = vpop.f32.mrf.mxu2 }
 0x261   :  { %v695_v30 = vmax.f32 %v396_v42, 0.0  ;;  %v1079_v49 = vadd.f32 %v1078_v6, %v3203_v39  ;;  %v1247_v60 = vpop.f32.mrf.mxu3 }
 0x262   :  { %v696_v21 = vmax.f32 %v565_v1, 0.0 }
 0x263   :  { %v1248_v26 = vadd.f32 %v1247_v60, %v1079_v49  ;;  %v3684_v0 = vpack.c.bf16 %v695_v30, %v693_v9 }
 0x264   :  { %v3686_v51 = vpack.c.bf16 %v696_v21, %v694_v25 }
 0x265   :  { %v1725_v31 = vmax.f32 %v1248_v26, 0.0  ;;  %1120 = vmatmul.bf16.gmra.mxu2 %v3684_v0 }
 0x266   :  { %4041 = vst [vmem:[#allocation29_spill] sm:$0xff] %v3686_v51  ;;  %1289 = vmatmul.bf16.gmra.mxu3 %v3686_v51  ;;  %v398_v18 = vpop.f32.mrf.mxu0 }
 0x267   :  { %v567_v50 = vpop.f32.mrf.mxu1  ;;  %v3690_v28 = vpack.c.bf16 %v1725_v31, %v1723_v52  ;;  %v399_v55 = vadd.f32 %v398_v18, %v2999_v40 }
 0x268   :  { %v1081_v42 = vpop.f32.mrf.mxu2  ;;  %v568_v1 = vadd.f32 %v567_v50, %v3002_v41 }
 0x269   :  { %v1082_v6 = vadd.f32 %v1081_v42, %v3203_v39  ;;  %v1250_v36 = vpop.f32.mrf.mxu3  ;;  %1343 = vmatmul.bf16.gmra.mxu0 %v3153_v56  ;;  %v697_v26 = vmax.f32 %v399_v55, 0.0 }
 0x26a   :  { %1512 = vmatmul.bf16.gmra.mxu1 %v3155_v57  ;;  %v698_v56 = vmax.f32 %v568_v1, 0.0 }
 0x26b   :  { %v1251_v21 = vadd.f32 %v1250_v36, %v1082_v6 }
 0x26d   :  { %v1727_v50 = vmax.f32 %v1251_v21, 0.0 }
 0x26e   :  { %v400_v9 = vpop.f32.mrf.mxu0 }
 0x26f   :  { %v401_v30 = vadd.f32 %v400_v9, %v2999_v40  ;;  %v569_v49 = vpop.f32.mrf.mxu1 }
 0x270   :  { %v570_v60 = vadd.f32 %v569_v49, %v3002_v41  ;;  %v1083_v25 = vpop.f32.mrf.mxu2 }
 0x271   :  { %v699_v52 = vmax.f32 %v401_v30, 0.0  ;;  %v1084_v31 = vadd.f32 %v1083_v25, %v3203_v39  ;;  %v1252_v42 = vpop.f32.mrf.mxu3 }
 0x272   :  { %v700_v51 = vmax.f32 %v570_v60, 0.0 }
 0x273   :  { %v1253_v57 = vadd.f32 %v1252_v42, %v1084_v31  ;;  %v3700_v6 = vpack.c.bf16 %v699_v52, %v697_v26 }
 0x274   :  { %v3702_v18 = vpack.c.bf16 %v700_v51, %v698_v56 }
 0x275   :  { %v1729_v36 = vmax.f32 %v1253_v57, 0.0  ;;  %1125 = vmatmul.bf16.gmra.mxu2 %v3700_v6 }
 0x276   :  { %4042 = vst [vmem:[#allocation30_spill] sm:$0xff] %v3702_v18  ;;  %1294 = vmatmul.bf16.gmra.mxu3 %v3702_v18  ;;  %v403_v9 = vpop.f32.mrf.mxu0 }
 0x277   :  { %v572_v49 = vpop.f32.mrf.mxu1  ;;  %v3706_v55 = vpack.c.bf16 %v1729_v36, %v1727_v50  ;;  %v404_v21 = vadd.f32 %v403_v9, %v2999_v40 }
 0x278   :  { %v1086_v30 = vpop.f32.mrf.mxu2  ;;  %v573_v60 = vadd.f32 %v572_v49, %v3002_v41 }
 0x279   :  { %v1087_v25 = vadd.f32 %v1086_v30, %v3203_v39  ;;  %v1255_v1 = vpop.f32.mrf.mxu3  ;;  %1348 = vmatmul.bf16.gmra.mxu0 %v3177_v15  ;;  %v701_v57 = vmax.f32 %v404_v21, 0.0 }
 0x27a   :  { %1517 = vmatmul.bf16.gmra.mxu1 %v3179_v16  ;;  %v702_v15 = vmax.f32 %v573_v60, 0.0 }
 0x27b   :  { %v1256_v51 = vadd.f32 %v1255_v1, %v1087_v25 }
 0x27d   :  { %v1731_v49 = vmax.f32 %v1256_v51, 0.0 }
 0x27e   :  { %v405_v26 = vpop.f32.mrf.mxu0 }
 0x27f   :  { %v406_v52 = vadd.f32 %v405_v26, %v2999_v40  ;;  %v574_v31 = vpop.f32.mrf.mxu1 }
 0x280   :  { %v575_v42 = vadd.f32 %v574_v31, %v3002_v41  ;;  %v1088_v56 = vpop.f32.mrf.mxu2  ;;  %v2705_v41 = vld [vmem:[%s3990_s4] sm:$0x3] }
 0x281   :  { %v703_v50 = vmax.f32 %v406_v52, 0.0  ;;  %v1089_v36 = vadd.f32 %v1088_v56, %v3203_v39  ;;  %v1257_v30 = vpop.f32.mrf.mxu3  ;;  %v3725_v21 = vperm.slane %v2705_v41, 1 }
 0x282   :  { %v704_v18 = vmax.f32 %v575_v42, 0.0 }
 0x283   :  { %v1258_v16 = vadd.f32 %v1257_v30, %v1089_v36  ;;  %v3716_v25 = vpack.c.bf16 %v703_v50, %v701_v57 }
 0x284   :  { %v3718_v9 = vpack.c.bf16 %v704_v18, %v702_v15 }
 0x285   :  { %4043 = vst [vmem:[#allocation31_spill] sm:$0xff] %v3716_v25  ;;  %v1733_v1 = vmax.f32 %v1258_v16, 0.0  ;;  %1130 = vmatmul.bf16.gmra.mxu2 %v3716_v25 }
 0x286   :  { %4044 = vst [vmem:[#allocation32_spill] sm:$0xff] %v3718_v9  ;;  %1299 = vmatmul.bf16.gmra.mxu3 %v3718_v9  ;;  %v1314_v40 = vpop.f32.mrf.mxu0 }
 0x287   :  { %v1483_v60 = vpop.f32.mrf.mxu1  ;;  %v3727_v26 = vpack.c.bf16 %v1733_v1, %v1731_v49  ;;  %v1315_v51 = vadd.f32 %v1314_v40, %v3725_v21 }
 0x288   :  { %v1091_v52 = vpop.f32.mrf.mxu2 }
 0x289   :  { %v1092_v18 = vadd.f32 %v1091_v52, %v3203_v39  ;;  %v1260_v31 = vpop.f32.mrf.mxu3  ;;  %1353 = vmatmul.bf16.gmra.mxu0 %v3198_v37  ;;  %v1484_v57 = vadd.f32 %v1483_v60, %v1315_v51 }
 0x28a   :  { %1522 = vmatmul.bf16.gmra.mxu1 %v3200_v38 }
 0x28b   :  { %v1261_v42 = vadd.f32 %v1260_v31, %v1092_v18  ;;  %v1644_v1 = vmax.f32 %v1484_v57, 0.0 }
 0x28d   :  { %v1735_v9 = vmax.f32 %v1261_v42, 0.0 }
 0x28e   :  { %v1316_v56 = vpop.f32.mrf.mxu0 }
 0x28f   :  { %v1317_v50 = vadd.f32 %v1316_v56, %v3725_v21  ;;  %v1485_v36 = vpop.f32.mrf.mxu1 }
 0x290   :  { %v1093_v30 = vpop.f32.mrf.mxu2 }
 0x291   :  { %v1486_v15 = vadd.f32 %v1485_v36, %v1317_v50  ;;  %v1094_v16 = vadd.f32 %v1093_v30, %v3203_v39  ;;  %v1262_v49 = vpop.f32.mrf.mxu3 }
 0x293   :  { %v1646_v41 = vmax.f32 %v1486_v15, 0.0  ;;  %v1263_v52 = vadd.f32 %v1262_v49, %v1094_v16 }
 0x295   :  { %v1772_v37 = vpack.c.bf16 %v1646_v41, %v1644_v1  ;;  %v1737_v25 = vmax.f32 %v1263_v52, 0.0  ;;  %1975 = vmatmul.bf16.vlgmr.msrb.gmra.mxu2 %v3226_v19 }
 0x296   :  { %v1319_v38 = vpop.f32.mrf.mxu0 }
 0x297   :  { %v1488_v40 = vpop.f32.mrf.mxu1  ;;  %2144 = vmatmul.bf16.vlgmr.msrb.gmra.mxu3 %v1772_v37  ;;  %v3736_v60 = vpack.c.bf16 %v1737_v25, %v1735_v9  ;;  %v1320_v56 = vadd.f32 %v1319_v38, %v3725_v21 }
 0x298   :  { %v1096_v18 = vpop.f32.mrf.mxu2 }
 0x299   :  { %v1097_v31 = vadd.f32 %v1096_v18, %v3203_v39  ;;  %v1265_v51 = vpop.f32.mrf.mxu3  ;;  %1358 = vmatmul.bf16.gmra.mxu0 %v3220_v11  ;;  %v1489_v50 = vadd.f32 %v1488_v40, %v1320_v56 }
 0x29a   :  { %1527 = vmatmul.bf16.gmra.mxu1 %v3222_v12 }
 0x29b   :  { %v1266_v42 = vadd.f32 %v1265_v51, %v1097_v31  ;;  %v1648_v16 = vmax.f32 %v1489_v50, 0.0 }
 0x29d   :  { %v1739_v41 = vmax.f32 %v1266_v42, 0.0 }
 0x29e   :  { %v1321_v57 = vpop.f32.mrf.mxu0 }
 0x29f   :  { %v1322_v19 = vadd.f32 %v1321_v57, %v3725_v21  ;;  %v1490_v36 = vpop.f32.mrf.mxu1 }
 0x2a0   :  { %v1098_v30 = vpop.f32.mrf.mxu2 }
 0x2a1   :  { %v1491_v15 = vadd.f32 %v1490_v36, %v1322_v19  ;;  %v1099_v25 = vadd.f32 %v1098_v30, %v3203_v39  ;;  %v1267_v9 = vpop.f32.mrf.mxu3 }
 0x2a3   :  { %v1650_v49 = vmax.f32 %v1491_v15, 0.0  ;;  %v1268_v1 = vadd.f32 %v1267_v9, %v1099_v25 }
 0x2a5   :  { %v1741_v11 = vmax.f32 %v1268_v1, 0.0  ;;  %1980 = vmatmul.bf16.gmra.mxu2 %v3263_v10  ;;  %v1774_v12 = vpack.c.bf16 %v1650_v49, %v1648_v16 }
 0x2a6   :  { %v1324_v52 = vpop.f32.mrf.mxu0 }
 0x2a7   :  { %v1493_v37 = vpop.f32.mrf.mxu1  ;;  %2149 = vmatmul.bf16.gmra.mxu3 %v1774_v12  ;;  %v3745_v38 = vpack.c.bf16 %v1741_v11, %v1739_v41  ;;  %v1325_v51 = vadd.f32 %v1324_v52, %v3725_v21 }
 0x2a8   :  { %v1101_v40 = vpop.f32.mrf.mxu2 }
 0x2a9   :  { %v1102_v18 = vadd.f32 %v1101_v40, %v3203_v39  ;;  %v1270_v31 = vpop.f32.mrf.mxu3  ;;  %1363 = vmatmul.bf16.gmra.mxu0 %v3254_v62  ;;  %v1494_v57 = vadd.f32 %v1493_v37, %v1325_v51 }
 0x2aa   :  { %1532 = vmatmul.bf16.gmra.mxu1 %v3256_v63 }
 0x2ab   :  { %v1271_v56 = vadd.f32 %v1270_v31, %v1102_v18  ;;  %v1652_v25 = vmax.f32 %v1494_v57, 0.0 }
 0x2ad   :  { %v1743_v49 = vmax.f32 %v1271_v56, 0.0 }
 0x2ae   :  { %v1326_v42 = vpop.f32.mrf.mxu0 }
 0x2af   :  { %v1327_v10 = vadd.f32 %v1326_v42, %v3725_v21  ;;  %v1495_v50 = vpop.f32.mrf.mxu1 }
 0x2b0   :  { %v1103_v19 = vpop.f32.mrf.mxu2 }
 0x2b1   :  { %v1496_v36 = vadd.f32 %v1495_v50, %v1327_v10  ;;  %v1104_v30 = vadd.f32 %v1103_v19, %v3203_v39  ;;  %v1272_v15 = vpop.f32.mrf.mxu3 }
 0x2b3   :  { %v1654_v9 = vmax.f32 %v1496_v36, 0.0  ;;  %v1273_v16 = vadd.f32 %v1272_v15, %v1104_v30 }
 0x2b5   :  { %v1745_v62 = vmax.f32 %v1273_v16, 0.0  ;;  %1985 = vmatmul.bf16.gmra.mxu2 %v3288_v59  ;;  %v1776_v63 = vpack.c.bf16 %v1654_v9, %v1652_v25 }
 0x2b6   :  { %v1329_v1 = vpop.f32.mrf.mxu0 }
 0x2b7   :  { %v1498_v41 = vpop.f32.mrf.mxu1  ;;  %2154 = vmatmul.bf16.gmra.mxu3 %v1776_v63  ;;  %v3754_v11 = vpack.c.bf16 %v1745_v62, %v1743_v49  ;;  %v1330_v40 = vadd.f32 %v1329_v1, %v3725_v21 }
 0x2b8   :  { %v1106_v12 = vpop.f32.mrf.mxu2 }
 0x2b9   :  { %v1107_v52 = vadd.f32 %v1106_v12, %v3203_v39  ;;  %v1275_v37 = vpop.f32.mrf.mxu3  ;;  %1368 = vmatmul.bf16.gmra.mxu0 %v3282_v46  ;;  %v1499_v51 = vadd.f32 %v1498_v41, %v1330_v40 }
 0x2ba   :  { %1537 = vmatmul.bf16.gmra.mxu1 %v3284_v47 }
 0x2bb   :  { %v1276_v18 = vadd.f32 %v1275_v37, %v1107_v52  ;;  %v1656_v19 = vmax.f32 %v1499_v51, 0.0 }
 0x2bd   :  { %v1747_v15 = vmax.f32 %v1276_v18, 0.0 }
 0x2be   :  { %v1331_v31 = vpop.f32.mrf.mxu0 }
 0x2bf   :  { %v1332_v59 = vadd.f32 %v1331_v31, %v3725_v21  ;;  %v1500_v56 = vpop.f32.mrf.mxu1 }
 0x2c0   :  { %v1108_v42 = vpop.f32.mrf.mxu2 }
 0x2c1   :  { %v1501_v57 = vadd.f32 %v1500_v56, %v1332_v59  ;;  %v1109_v10 = vadd.f32 %v1108_v42, %v3203_v39  ;;  %v1277_v50 = vpop.f32.mrf.mxu3 }
 0x2c3   :  { %v1658_v36 = vmax.f32 %v1501_v57, 0.0  ;;  %v1278_v30 = vadd.f32 %v1277_v50, %v1109_v10 }
 0x2c5   :  { %v1749_v46 = vmax.f32 %v1278_v30, 0.0  ;;  %1990 = vmatmul.bf16.gmra.mxu2 %v3310_v44  ;;  %v1778_v47 = vpack.c.bf16 %v1658_v36, %v1656_v19 }
 0x2c6   :  { %v1334_v25 = vpop.f32.mrf.mxu0 }
 0x2c7   :  { %v1503_v9 = vpop.f32.mrf.mxu1  ;;  %2159 = vmatmul.bf16.gmra.mxu3 %v1778_v47  ;;  %v3763_v16 = vpack.c.bf16 %v1749_v46, %v1747_v15  ;;  %v1335_v1 = vadd.f32 %v1334_v25, %v3725_v21 }
 0x2c8   :  { %v1111_v49 = vpop.f32.mrf.mxu2 }
 0x2c9   :  { %v1112_v62 = vadd.f32 %v1111_v49, %v3203_v39  ;;  %v1280_v63 = vpop.f32.mrf.mxu3  ;;  %1373 = vmatmul.bf16.gmra.mxu0 %v3304_v32  ;;  %v1504_v52 = vadd.f32 %v1503_v9, %v1335_v1 }
 0x2ca   :  { %1542 = vmatmul.bf16.gmra.mxu1 %v3306_v33 }
 0x2cb   :  { %v1281_v41 = vadd.f32 %v1280_v63, %v1112_v62  ;;  %v1660_v59 = vmax.f32 %v1504_v52, 0.0 }
 0x2cd   :  { %v1751_v57 = vmax.f32 %v1281_v41, 0.0 }
 0x2ce   :  { %v1336_v12 = vpop.f32.mrf.mxu0 }
 0x2cf   :  { %v1337_v44 = vadd.f32 %v1336_v12, %v3725_v21  ;;  %v1505_v37 = vpop.f32.mrf.mxu1 }
 0x2d0   :  { %v1113_v40 = vpop.f32.mrf.mxu2 }
 0x2d1   :  { %v1506_v18 = vadd.f32 %v1505_v37, %v1337_v44  ;;  %v1114_v31 = vadd.f32 %v1113_v40, %v3203_v39  ;;  %v1282_v51 = vpop.f32.mrf.mxu3 }
 0x2d3   :  { %v1662_v56 = vmax.f32 %v1506_v18, 0.0  ;;  %v1283_v42 = vadd.f32 %v1282_v51, %v1114_v31 }
 0x2d5   :  { %v1753_v32 = vmax.f32 %v1283_v42, 0.0  ;;  %1995 = vmatmul.bf16.gmra.mxu2 %v3332_v35  ;;  %v1780_v33 = vpack.c.bf16 %v1662_v56, %v1660_v59 }
 0x2d6   :  { %v1339_v10 = vpop.f32.mrf.mxu0 }
 0x2d7   :  { %v1508_v50 = vpop.f32.mrf.mxu1  ;;  %2164 = vmatmul.bf16.gmra.mxu3 %v1780_v33  ;;  %v3772_v19 = vpack.c.bf16 %v1753_v32, %v1751_v57  ;;  %v1340_v46 = vadd.f32 %v1339_v10, %v3725_v21 }
 0x2d8   :  { %v1116_v36 = vpop.f32.mrf.mxu2 }
 0x2d9   :  { %v1117_v30 = vadd.f32 %v1116_v36, %v3203_v39  ;;  %v1285_v15 = vpop.f32.mrf.mxu3  ;;  %1378 = vmatmul.bf16.gmra.mxu0 %v3326_v22  ;;  %v1509_v9 = vadd.f32 %v1508_v50, %v1340_v46 }
 0x2da   :  { %1547 = vmatmul.bf16.gmra.mxu1 %v3328_v23 }
 0x2db   :  { %v1286_v47 = vadd.f32 %v1285_v15, %v1117_v30  ;;  %v1664_v12 = vmax.f32 %v1509_v9, 0.0 }
 0x2dd   :  { %v1755_v37 = vmax.f32 %v1286_v47, 0.0 }
 0x2de   :  { %v1341_v25 = vpop.f32.mrf.mxu0 }
 0x2df   :  { %v1342_v35 = vadd.f32 %v1341_v25, %v3725_v21  ;;  %v1510_v49 = vpop.f32.mrf.mxu1 }
 0x2e0   :  { %v1118_v62 = vpop.f32.mrf.mxu2 }
 0x2e1   :  { %v1511_v63 = vadd.f32 %v1510_v49, %v1342_v35  ;;  %v1119_v1 = vadd.f32 %v1118_v62, %v3203_v39  ;;  %v1287_v41 = vpop.f32.mrf.mxu3 }
 0x2e3   :  { %v1666_v52 = vmax.f32 %v1511_v63, 0.0  ;;  %v1288_v44 = vadd.f32 %v1287_v41, %v1119_v1 }
 0x2e5   :  { %v1757_v22 = vmax.f32 %v1288_v44, 0.0  ;;  %2000 = vmatmul.bf16.gmra.mxu2 %v3369_v53  ;;  %v1782_v23 = vpack.c.bf16 %v1666_v52, %v1664_v12 }
 0x2e6   :  { %v1344_v40 = vpop.f32.mrf.mxu0 }
 0x2e7   :  { %v1513_v18 = vpop.f32.mrf.mxu1  ;;  %2169 = vmatmul.bf16.gmra.mxu3 %v1782_v23  ;;  %v3781_v31 = vpack.c.bf16 %v1757_v22, %v1755_v37  ;;  %v1345_v42 = vadd.f32 %v1344_v40, %v3725_v21 }
 0x2e8   :  { %v1121_v51 = vpop.f32.mrf.mxu2 }
 0x2e9   :  { %v1122_v59 = vadd.f32 %v1121_v51, %v3203_v39  ;;  %v1290_v56 = vpop.f32.mrf.mxu3  ;;  %1383 = vmatmul.bf16.gmra.mxu0 %v3360_v29  ;;  %v1514_v33 = vadd.f32 %v1513_v18, %v1345_v42 }
 0x2ea   :  { %1552 = vmatmul.bf16.gmra.mxu1 %v3362_v34 }
 0x2eb   :  { %v1291_v57 = vadd.f32 %v1290_v56, %v1122_v59  ;;  %v1668_v46 = vmax.f32 %v1514_v33, 0.0 }
 0x2ed   :  { %v1759_v9 = vmax.f32 %v1291_v57, 0.0 }
 0x2ee   :  { %v1346_v32 = vpop.f32.mrf.mxu0 }
 0x2ef   :  { %v1347_v53 = vadd.f32 %v1346_v32, %v3725_v21  ;;  %v1515_v10 = vpop.f32.mrf.mxu1 }
 0x2f0   :  { %v1123_v50 = vpop.f32.mrf.mxu2 }
 0x2f1   :  { %v1516_v36 = vadd.f32 %v1515_v10, %v1347_v53  ;;  %v1124_v30 = vadd.f32 %v1123_v50, %v3203_v39  ;;  %v1292_v15 = vpop.f32.mrf.mxu3 }
 0x2f3   :  { %v1670_v47 = vmax.f32 %v1516_v36, 0.0  ;;  %v1293_v25 = vadd.f32 %v1292_v15, %v1124_v30  ;;  %v4045_v30 = vld [vmem:[#allocation5_spill] sm:$0xff]  ;;  %v4046_v15 = vld [vmem:[#allocation6_spill] sm:$0xff] }
 0x2f5   :  { %v1761_v29 = vmax.f32 %v1293_v25, 0.0  ;;  %2005 = vmatmul.bf16.gmra.mxu2 %v3394_v45  ;;  %v1784_v34 = vpack.c.bf16 %v1670_v47, %v1668_v46 }
 0x2f6   :  { %v1349_v35 = vpop.f32.mrf.mxu0 }
 0x2f7   :  { %v1518_v49 = vpop.f32.mrf.mxu1  ;;  %2174 = vmatmul.bf16.gmra.mxu3 %v1784_v34  ;;  %v3790_v62 = vpack.c.bf16 %v1761_v29, %v1759_v9  ;;  %v1350_v12 = vadd.f32 %v1349_v35, %v3725_v21 }
 0x2f8   :  { %v1126_v63 = vpop.f32.mrf.mxu2 }
 0x2f9   :  { %v1127_v1 = vadd.f32 %v1126_v63, %v3203_v39  ;;  %v1295_v41 = vpop.f32.mrf.mxu3  ;;  %1388 = vmatmul.bf16.gmra.mxu0 %v3388_v43  ;;  %v1519_v37 = vadd.f32 %v1518_v49, %v1350_v12 }
 0x2fa   :  { %1557 = vmatmul.bf16.gmra.mxu1 %v3390_v48 }
 0x2fb   :  { %v1296_v52 = vadd.f32 %v1295_v41, %v1127_v1  ;;  %v1672_v59 = vmax.f32 %v1519_v37, 0.0  ;;  %v4047_v37 = vld [vmem:[#allocation9_spill] sm:$0xff] }
 0x2fd   :  { %v1763_v57 = vmax.f32 %v1296_v52, 0.0 }
 0x2fe   :  { %v1351_v44 = vpop.f32.mrf.mxu0 }
 0x2ff   :  { %v1352_v45 = vadd.f32 %v1351_v44, %v3725_v21  ;;  %v1520_v22 = vpop.f32.mrf.mxu1 }
 0x300   :  { %v1128_v23 = vpop.f32.mrf.mxu2 }
 0x301   :  { %v1521_v40 = vadd.f32 %v1520_v22, %v1352_v45  ;;  %v1129_v18 = vadd.f32 %v1128_v23, %v3203_v39  ;;  %v1297_v51 = vpop.f32.mrf.mxu3  ;;  %v3811_v22 = vld [vmem:[%s3992_s6] ss:$0 sm:$0xff] }
 0x303   :  { %v1674_v56 = vmax.f32 %v1521_v40, 0.0  ;;  %v1298_v42 = vadd.f32 %v1297_v51, %v1129_v18 }
 0x305   :  { %v1765_v43 = vmax.f32 %v1298_v42, 0.0  ;;  %2010 = vmatmul.bf16.gmra.mxu2 %v3416_v13  ;;  %v1786_v48 = vpack.c.bf16 %v1674_v56, %v1672_v59  ;;  %v4048_v59 = vld [vmem:[#allocation7_spill] sm:$0xff]  ;;  %v4049_v56 = vld [vmem:[#allocation8_spill] sm:$0xff] }
 0x306   :  { %v1354_v32 = vpop.f32.mrf.mxu0 }
 0x307   :  { %v1523_v33 = vpop.f32.mrf.mxu1  ;;  %2179 = vmatmul.bf16.gmra.mxu3 %v1786_v48  ;;  %v3799_v53 = vpack.c.bf16 %v1765_v43, %v1763_v57  ;;  %v1355_v46 = vadd.f32 %v1354_v32, %v3725_v21 }
 0x308   :  { %v1131_v10 = vpop.f32.mrf.mxu2 }
 0x309   :  { %v1132_v50 = vadd.f32 %v1131_v10, %v3203_v39  ;;  %v1300_v36 = vpop.f32.mrf.mxu3  ;;  %1393 = vmatmul.bf16.gmra.mxu0 %v4045_v30  ;;  %v1524_v9 = vadd.f32 %v1523_v33, %v1355_v46 }
 0x30a   :  { %1562 = vmatmul.bf16.gmra.mxu1 %v4046_v15 }
 0x30b   :  { %v1301_v47 = vadd.f32 %v1300_v36, %v1132_v50  ;;  %v1676_v1 = vmax.f32 %v1524_v9, 0.0  ;;  %v4050_v9 = vld [vmem:[#allocation12_spill] sm:$0xff] }
 0x30d   :  { %v1767_v52 = vmax.f32 %v1301_v47, 0.0 }
 0x30e   :  { %v1356_v25 = vpop.f32.mrf.mxu0 }
 0x30f   :  { %v1357_v13 = vadd.f32 %v1356_v25, %v3725_v21  ;;  %v1525_v29 = vpop.f32.mrf.mxu1 }
 0x310   :  { %v1133_v34 = vpop.f32.mrf.mxu2 }
 0x311   :  { %v1526_v35 = vadd.f32 %v1525_v29, %v1357_v13  ;;  %v1134_v49 = vadd.f32 %v1133_v34, %v3203_v39  ;;  %v1302_v63 = vpop.f32.mrf.mxu3 }
 0x313   :  { %v1678_v41 = vmax.f32 %v1526_v35, 0.0  ;;  %v1303_v12 = vadd.f32 %v1302_v63, %v1134_v49  ;;  %v4051_v63 = vld [vmem:[#allocation10_spill] sm:$0xff] }
 0x315   :  { %v1769_v44 = vmax.f32 %v1303_v12, 0.0  ;;  %2015 = vmatmul.bf16.gmra.mxu2 %v4047_v37  ;;  %v1788_v45 = vpack.c.bf16 %v1678_v41, %v1676_v1  ;;  %v4052_v1 = vld [vmem:[#allocation11_spill] sm:$0xff] }
 0x316   :  { %v1359_v23 = vpop.f32.mrf.mxu0 }
 0x317   :  { %v1528_v40 = vpop.f32.mrf.mxu1  ;;  %2184 = vmatmul.bf16.gmra.mxu3 %v1788_v45  ;;  %v3813_v18 = vpack.c.bf16 %v1769_v44, %v1767_v52  ;;  %v1360_v57 = vadd.f32 %v1359_v23, %v3725_v21 }
 0x318   :  { %v1976_v39 = vpop.f32.mrf.mxu2 }
 0x319   :  { %v1977_v51 = vadd.f32 %v3811_v22, %v1976_v39  ;;  %1398 = vmatmul.bf16.gmra.mxu0 %v4048_v59  ;;  %v1529_v32 = vadd.f32 %v1528_v40, %v1360_v57 }
 0x31a   :  { %1567 = vmatmul.bf16.gmra.mxu1 %v4049_v56  ;;  %v2145_v42 = vpop.f32.mrf.mxu3 }
 0x31b   :  { %v2146_v43 = vadd.f32 %v2145_v42, %v1977_v51  ;;  %v1680_v46 = vmax.f32 %v1529_v32, 0.0 }
 0x31d   :  { %2305 = vst [vmem:[#allocation2] sm:$0xff] %v2146_v43  ;;  %v4053_v43 = vld [vmem:[#allocation15_spill] sm:$0xff] }
 0x31e   :  { %v1361_v48 = vpop.f32.mrf.mxu0 }
 0x31f   :  { %v1362_v33 = vadd.f32 %v1361_v48, %v3725_v21  ;;  %v1530_v10 = vpop.f32.mrf.mxu1 }
 0x320   :  { %v1978_v50 = vpop.f32.mrf.mxu2 }
 0x321   :  { %v1531_v36 = vadd.f32 %v1530_v10, %v1362_v33  ;;  %v1979_v30 = vadd.f32 %v3811_v22, %v1978_v50 }
 0x322   :  { %v2147_v15 = vpop.f32.mrf.mxu3 }
 0x323   :  { %v1682_v47 = vmax.f32 %v1531_v36, 0.0  ;;  %v2148_v25 = vadd.f32 %v2147_v15, %v1979_v30  ;;  %v4054_v36 = vld [vmem:[#allocation13_spill] sm:$0xff]  ;;  %v4055_v30 = vld [vmem:[#allocation14_spill] sm:$0xff] }
 0x325   :  { %2306 = vst [vmem:[#allocation2 + $0x8] sm:$0xff] %v2148_v25  ;;  %2020 = vmatmul.bf16.gmra.mxu2 %v4050_v9  ;;  %v1790_v13 = vpack.c.bf16 %v1682_v47, %v1680_v46 }
 0x326   :  { %v1364_v29 = vpop.f32.mrf.mxu0 }
 0x327   :  { %v1533_v34 = vpop.f32.mrf.mxu1  ;;  %2189 = vmatmul.bf16.gmra.mxu3 %v1790_v13  ;;  %v1365_v12 = vadd.f32 %v1364_v29, %v3725_v21 }
 0x328   :  { %v1981_v35 = vpop.f32.mrf.mxu2 }
 0x329   :  { %v1982_v49 = vadd.f32 %v3811_v22, %v1981_v35  ;;  %1403 = vmatmul.bf16.gmra.mxu0 %v4051_v63  ;;  %v1534_v37 = vadd.f32 %v1533_v34, %v1365_v12 }
 0x32a   :  { %1572 = vmatmul.bf16.gmra.mxu1 %v4052_v1  ;;  %v2150_v41 = vpop.f32.mrf.mxu3 }
 0x32b   :  { %v2151_v52 = vadd.f32 %v2150_v41, %v1982_v49  ;;  %v1684_v56 = vmax.f32 %v1534_v37, 0.0 }
 0x32d   :  { %2307 = vst [vmem:[#allocation2 + $0x10] sm:$0xff] %v2151_v52  ;;  %v4056_v52 = vld [vmem:[#allocation18_spill] sm:$0xff] }
 0x32e   :  { %v1366_v44 = vpop.f32.mrf.mxu0 }
 0x32f   :  { %v1367_v45 = vadd.f32 %v1366_v44, %v3725_v21  ;;  %v1535_v23 = vpop.f32.mrf.mxu1 }
 0x330   :  { %v1983_v40 = vpop.f32.mrf.mxu2 }
 0x331   :  { %v1536_v39 = vadd.f32 %v1535_v23, %v1367_v45  ;;  %v1984_v51 = vadd.f32 %v3811_v22, %v1983_v40 }
 0x332   :  { %v2152_v59 = vpop.f32.mrf.mxu3 }
 0x333   :  { %v1686_v42 = vmax.f32 %v1536_v39, 0.0  ;;  %v2153_v57 = vadd.f32 %v2152_v59, %v1984_v51  ;;  %v4057_v39 = vld [vmem:[#allocation16_spill] sm:$0xff]  ;;  %v4058_v51 = vld [vmem:[#allocation17_spill] sm:$0xff] }
 0x335   :  { %2308 = vst [vmem:[#allocation2 + $0x18] sm:$0xff] %v2153_v57  ;;  %2025 = vmatmul.bf16.gmra.mxu2 %v4053_v43  ;;  %v1792_v48 = vpack.c.bf16 %v1686_v42, %v1684_v56 }
 0x336   :  { %v1369_v32 = vpop.f32.mrf.mxu0 }
 0x337   :  { %v1538_v33 = vpop.f32.mrf.mxu1  ;;  %2194 = vmatmul.bf16.gmra.mxu3 %v1792_v48  ;;  %v1370_v46 = vadd.f32 %v1369_v32, %v3725_v21 }
 0x338   :  { %v1986_v10 = vpop.f32.mrf.mxu2 }
 0x339   :  { %v1987_v50 = vadd.f32 %v3811_v22, %v1986_v10  ;;  %1408 = vmatmul.bf16.gmra.mxu0 %v4054_v36  ;;  %v1539_v9 = vadd.f32 %v1538_v33, %v1370_v46 }
 0x33a   :  { %1577 = vmatmul.bf16.gmra.mxu1 %v4055_v30  ;;  %v2155_v15 = vpop.f32.mrf.mxu3 }
 0x33b   :  { %v2156_v47 = vadd.f32 %v2155_v15, %v1987_v50  ;;  %v1688_v1 = vmax.f32 %v1539_v9, 0.0 }
 0x33d   :  { %2309 = vst [vmem:[#allocation2 + $0x20] sm:$0xff] %v2156_v47 }
 0x33e   :  { %v1371_v25 = vpop.f32.mrf.mxu0 }
 0x33f   :  { %v1372_v13 = vadd.f32 %v1371_v25, %v3725_v21  ;;  %v1540_v29 = vpop.f32.mrf.mxu1 }
 0x340   :  { %v1988_v34 = vpop.f32.mrf.mxu2 }
 0x341   :  { %v1541_v35 = vadd.f32 %v1540_v29, %v1372_v13  ;;  %v1989_v49 = vadd.f32 %v3811_v22, %v1988_v34  ;;  %v4059_v34 = vld [vmem:[#allocation19_spill] sm:$0xff] }
 0x342   :  { %v2157_v63 = vpop.f32.mrf.mxu3 }
 0x343   :  { %v1690_v41 = vmax.f32 %v1541_v35, 0.0  ;;  %v2158_v12 = vadd.f32 %v2157_v63, %v1989_v49 }
 0x345   :  { %2310 = vst [vmem:[#allocation2 + $0x28] sm:$0xff] %v2158_v12  ;;  %2030 = vmatmul.bf16.gmra.mxu2 %v4056_v52  ;;  %v1794_v44 = vpack.c.bf16 %v1690_v41, %v1688_v1 }
 0x346   :  { %v1374_v37 = vpop.f32.mrf.mxu0 }
 0x347   :  { %v1543_v45 = vpop.f32.mrf.mxu1  ;;  %2199 = vmatmul.bf16.gmra.mxu3 %v1794_v44  ;;  %v1375_v56 = vadd.f32 %v1374_v37, %v3725_v21 }
 0x348   :  { %v1991_v23 = vpop.f32.mrf.mxu2 }
 0x349   :  { %v1992_v40 = vadd.f32 %v3811_v22, %v1991_v23  ;;  %1413 = vmatmul.bf16.gmra.mxu0 %v4057_v39  ;;  %v1544_v43 = vadd.f32 %v1543_v45, %v1375_v56  ;;  %v4060_v39 = vld [vmem:[#allocation22_spill] sm:$0xff] }
 0x34a   :  { %1582 = vmatmul.bf16.gmra.mxu1 %v4058_v51  ;;  %v2160_v59 = vpop.f32.mrf.mxu3 }
 0x34b   :  { %v2161_v42 = vadd.f32 %v2160_v59, %v1992_v40  ;;  %v1692_v30 = vmax.f32 %v1544_v43, 0.0  ;;  %v4061_v43 = vld [vmem:[#allocation20_spill] sm:$0xff] }
 0x34d   :  { %2311 = vst [vmem:[#allocation2 + $0x30] sm:$0xff] %v2161_v42 }
 0x34e   :  { %v1376_v57 = vpop.f32.mrf.mxu0 }
 0x34f   :  { %v1377_v48 = vadd.f32 %v1376_v57, %v3725_v21  ;;  %v1545_v32 = vpop.f32.mrf.mxu1 }
 0x350   :  { %v1993_v33 = vpop.f32.mrf.mxu2 }
 0x351   :  { %v1546_v10 = vadd.f32 %v1545_v32, %v1377_v48  ;;  %v1994_v50 = vadd.f32 %v3811_v22, %v1993_v33  ;;  %v4062_v48 = vld [vmem:[#allocation21_spill] sm:$0xff] }
 0x352   :  { %v2162_v36 = vpop.f32.mrf.mxu3 }
 0x353   :  { %v1694_v15 = vmax.f32 %v1546_v10, 0.0  ;;  %v2163_v46 = vadd.f32 %v2162_v36, %v1994_v50 }
 0x355   :  { %2312 = vst [vmem:[#allocation2 + $0x38] sm:$0xff] %v2163_v46  ;;  %2035 = vmatmul.bf16.gmra.mxu2 %v3544_v61  ;;  %v1796_v47 = vpack.c.bf16 %v1694_v15, %v1692_v30 }
 0x356   :  { %v1379_v25 = vpop.f32.mrf.mxu0 }
 0x357   :  { %v1548_v9 = vpop.f32.mrf.mxu1  ;;  %2204 = vmatmul.bf16.gmra.mxu3 %v1796_v47  ;;  %v1380_v49 = vadd.f32 %v1379_v25, %v3725_v21 }
 0x358   :  { %v1996_v13 = vpop.f32.mrf.mxu2 }
 0x359   :  { %v1997_v29 = vadd.f32 %v3811_v22, %v1996_v13  ;;  %1418 = vmatmul.bf16.gmra.mxu0 %v3538_v24  ;;  %v1549_v41 = vadd.f32 %v1548_v9, %v1380_v49 }
 0x35a   :  { %1587 = vmatmul.bf16.gmra.mxu1 %v4059_v34  ;;  %v2165_v35 = vpop.f32.mrf.mxu3 }
 0x35b   :  { %v2166_v63 = vadd.f32 %v2165_v35, %v1997_v29  ;;  %v1696_v23 = vmax.f32 %v1549_v41, 0.0 }
 0x35d   :  { %2313 = vst [vmem:[#allocation2 + $0x40] sm:$0xff] %v2166_v63 }
 0x35e   :  { %v1381_v1 = vpop.f32.mrf.mxu0 }
 0x35f   :  { %v1382_v61 = vadd.f32 %v1381_v1, %v3725_v21  ;;  %v1550_v12 = vpop.f32.mrf.mxu1 }
 0x360   :  { %v1998_v52 = vpop.f32.mrf.mxu2 }
 0x361   :  { %v1551_v44 = vadd.f32 %v1550_v12, %v1382_v61  ;;  %v1999_v37 = vadd.f32 %v3811_v22, %v1998_v52  ;;  %v4063_v61 = vld [vmem:[#allocation23_spill] sm:$0xff] }
 0x362   :  { %v2167_v45 = vpop.f32.mrf.mxu3 }
 0x363   :  { %v1698_v40 = vmax.f32 %v1551_v44, 0.0  ;;  %v2168_v24 = vadd.f32 %v2167_v45, %v1999_v37 }
 0x365   :  { %2314 = vst [vmem:[#allocation2 + $0x48] sm:$0xff] %v2168_v24  ;;  %2040 = vmatmul.bf16.gmra.mxu2 %v4060_v39  ;;  %v1798_v51 = vpack.c.bf16 %v1698_v40, %v1696_v23 }
 0x366   :  { %v1384_v59 = vpop.f32.mrf.mxu0 }
 0x367   :  { %v1553_v56 = vpop.f32.mrf.mxu1  ;;  %2209 = vmatmul.bf16.gmra.mxu3 %v1798_v51  ;;  %v1385_v33 = vadd.f32 %v1384_v59, %v3725_v21 }
 0x368   :  { %v2001_v42 = vpop.f32.mrf.mxu2 }
 0x369   :  { %v2002_v57 = vadd.f32 %v3811_v22, %v2001_v42  ;;  %1423 = vmatmul.bf16.gmra.mxu0 %v4061_v43  ;;  %v1554_v36 = vadd.f32 %v1553_v56, %v1385_v33  ;;  %v4064_v33 = vld [vmem:[#allocation24_spill] sm:$0xff] }
 0x36a   :  { %1592 = vmatmul.bf16.gmra.mxu1 %v4062_v48  ;;  %v2170_v32 = vpop.f32.mrf.mxu3 }
 0x36b   :  { %v2171_v10 = vadd.f32 %v2170_v32, %v2002_v57  ;;  %v1700_v13 = vmax.f32 %v1554_v36, 0.0 }
 0x36d   :  { %2315 = vst [vmem:[#allocation2 + $0x50] sm:$0xff] %v2171_v10 }
 0x36e   :  { %v1386_v50 = vpop.f32.mrf.mxu0 }
 0x36f   :  { %v1387_v30 = vadd.f32 %v1386_v50, %v3725_v21  ;;  %v1555_v15 = vpop.f32.mrf.mxu1 }
 0x370   :  { %v2003_v46 = vpop.f32.mrf.mxu2 }
 0x371   :  { %v1556_v47 = vadd.f32 %v1555_v15, %v1387_v30  ;;  %v2004_v25 = vadd.f32 %v3811_v22, %v2003_v46 }
 0x372   :  { %v2172_v9 = vpop.f32.mrf.mxu3 }
 0x373   :  { %v1702_v29 = vmax.f32 %v1556_v47, 0.0  ;;  %v2173_v34 = vadd.f32 %v2172_v9, %v2004_v25 }
 0x375   :  { %2316 = vst [vmem:[#allocation2 + $0x58] sm:$0xff] %v2173_v34  ;;  %2045 = vmatmul.bf16.gmra.mxu2 %v3588_v27  ;;  %v1800_v35 = vpack.c.bf16 %v1702_v29, %v1700_v13 }
 0x376   :  { %v1389_v49 = vpop.f32.mrf.mxu0 }
 0x377   :  { %v1558_v63 = vpop.f32.mrf.mxu1  ;;  %2214 = vmatmul.bf16.gmra.mxu3 %v1800_v35  ;;  %v1390_v52 = vadd.f32 %v1389_v49, %v3725_v21 }
 0x378   :  { %v2006_v1 = vpop.f32.mrf.mxu2 }
 0x379   :  { %v2007_v41 = vadd.f32 %v3811_v22, %v2006_v1  ;;  %1428 = vmatmul.bf16.gmra.mxu0 %v3582_v20  ;;  %v1559_v45 = vadd.f32 %v1558_v63, %v1390_v52 }
 0x37a   :  { %1597 = vmatmul.bf16.gmra.mxu1 %v4063_v61  ;;  %v2175_v12 = vpop.f32.mrf.mxu3  ;;  %v4065_v61 = vld [vmem:[#allocation25_spill] sm:$0xff] }
 0x37b   :  { %v2176_v44 = vadd.f32 %v2175_v12, %v2007_v41  ;;  %v1704_v59 = vmax.f32 %v1559_v45, 0.0 }
 0x37d   :  { %2317 = vst [vmem:[#allocation2 + $0x60] sm:$0xff] %v2176_v44 }
 0x37e   :  { %v1391_v37 = vpop.f32.mrf.mxu0 }
 0x37f   :  { %v1392_v27 = vadd.f32 %v1391_v37, %v3725_v21  ;;  %v1560_v23 = vpop.f32.mrf.mxu1 }
 0x380   :  { %v2008_v40 = vpop.f32.mrf.mxu2 }
 0x381   :  { %v1561_v24 = vadd.f32 %v1560_v23, %v1392_v27  ;;  %v2009_v39 = vadd.f32 %v3811_v22, %v2008_v40 }
 0x382   :  { %v2177_v51 = vpop.f32.mrf.mxu3 }
 0x383   :  { %v1706_v56 = vmax.f32 %v1561_v24, 0.0  ;;  %v2178_v20 = vadd.f32 %v2177_v51, %v2009_v39 }
 0x385   :  { %2318 = vst [vmem:[#allocation2 + $0x68] sm:$0xff] %v2178_v20  ;;  %2050 = vmatmul.bf16.gmra.mxu2 %v3604_v58  ;;  %v1802_v42 = vpack.c.bf16 %v1706_v56, %v1704_v59 }
 0x386   :  { %v1394_v57 = vpop.f32.mrf.mxu0 }
 0x387   :  { %v1563_v43 = vpop.f32.mrf.mxu1  ;;  %2219 = vmatmul.bf16.gmra.mxu3 %v1802_v42  ;;  %v1395_v50 = vadd.f32 %v1394_v57, %v3725_v21 }
 0x388   :  { %v2011_v48 = vpop.f32.mrf.mxu2 }
 0x389   :  { %v2012_v32 = vadd.f32 %v3811_v22, %v2011_v48  ;;  %1433 = vmatmul.bf16.gmra.mxu0 %v3598_v2  ;;  %v1564_v15 = vadd.f32 %v1563_v43, %v1395_v50  ;;  %v4066_v48 = vld [vmem:[#allocation26_spill] sm:$0xff] }
 0x38a   :  { %1602 = vmatmul.bf16.gmra.mxu1 %v4064_v33  ;;  %v2180_v10 = vpop.f32.mrf.mxu3 }
 0x38b   :  { %v2181_v36 = vadd.f32 %v2180_v10, %v2012_v32  ;;  %v1708_v29 = vmax.f32 %v1564_v15, 0.0 }
 0x38d   :  { %2319 = vst [vmem:[#allocation2 + $0x70] sm:$0xff] %v2181_v36 }
 0x38e   :  { %v1396_v30 = vpop.f32.mrf.mxu0 }
 0x38f   :  { %v1397_v58 = vadd.f32 %v1396_v30, %v3725_v21  ;;  %v1565_v46 = vpop.f32.mrf.mxu1 }
 0x390   :  { %v2013_v47 = vpop.f32.mrf.mxu2 }
 0x391   :  { %v1566_v25 = vadd.f32 %v1565_v46, %v1397_v58  ;;  %v2014_v9 = vadd.f32 %v3811_v22, %v2013_v47 }
 0x392   :  { %v2182_v13 = vpop.f32.mrf.mxu3 }
 0x393   :  { %v1710_v34 = vmax.f32 %v1566_v25, 0.0  ;;  %v2183_v2 = vadd.f32 %v2182_v13, %v2014_v9 }
 0x395   :  { %2320 = vst [vmem:[#allocation2 + $0x78] sm:$0xff] %v2183_v2  ;;  %2055 = vmatmul.bf16.gmra.mxu2 %v3620_v4  ;;  %v1804_v35 = vpack.c.bf16 %v1710_v34, %v1708_v29 }
 0x396   :  { %v1399_v49 = vpop.f32.mrf.mxu0 }
 0x397   :  { %v1568_v63 = vpop.f32.mrf.mxu1  ;;  %2224 = vmatmul.bf16.gmra.mxu3 %v1804_v35  ;;  %v1400_v52 = vadd.f32 %v1399_v49, %v3725_v21  ;;  %v4067_v49 = vld [vmem:[#allocation27_spill] sm:$0xff] }
 0x398   :  { %v2016_v1 = vpop.f32.mrf.mxu2 }
 0x399   :  { %v2017_v41 = vadd.f32 %v3811_v22, %v2016_v1  ;;  %1438 = vmatmul.bf16.gmra.mxu0 %v3614_v14  ;;  %v1569_v45 = vadd.f32 %v1568_v63, %v1400_v52 }
 0x39a   :  { %1607 = vmatmul.bf16.gmra.mxu1 %v4065_v61  ;;  %v2185_v12 = vpop.f32.mrf.mxu3 }
 0x39b   :  { %v2186_v44 = vadd.f32 %v2185_v12, %v2017_v41  ;;  %v1712_v51 = vmax.f32 %v1569_v45, 0.0 }
 0x39d   :  { %2321 = vst [vmem:[#allocation2 + $0x80] sm:$0xff] %v2186_v44 }
 0x39e   :  { %v1401_v37 = vpop.f32.mrf.mxu0 }
 0x39f   :  { %v1402_v4 = vadd.f32 %v1401_v37, %v3725_v21  ;;  %v1570_v27 = vpop.f32.mrf.mxu1 }
 0x3a0   :  { %v2018_v23 = vpop.f32.mrf.mxu2 }
 0x3a1   :  { %v1571_v40 = vadd.f32 %v1570_v27, %v1402_v4  ;;  %v2019_v24 = vadd.f32 %v3811_v22, %v2018_v23 }
 0x3a2   :  { %v2187_v39 = vpop.f32.mrf.mxu3 }
 0x3a3   :  { %v1714_v59 = vmax.f32 %v1571_v40, 0.0  ;;  %v2188_v14 = vadd.f32 %v2187_v39, %v2019_v24 }
 0x3a5   :  { %2322 = vst [vmem:[#allocation2 + $0x88] sm:$0xff] %v2188_v14  ;;  %2060 = vmatmul.bf16.gmra.mxu2 %v3639_v17  ;;  %v1806_v56 = vpack.c.bf16 %v1714_v59, %v1712_v51  ;;  %v4068_v14 = vld [vmem:[#allocation28_spill] sm:$0xff] }
 0x3a6   :  { %v1404_v20 = vpop.f32.mrf.mxu0 }
 0x3a7   :  { %v1573_v42 = vpop.f32.mrf.mxu1  ;;  %2229 = vmatmul.bf16.gmra.mxu3 %v1806_v56  ;;  %v1405_v33 = vadd.f32 %v1404_v20, %v3725_v21 }
 0x3a8   :  { %v2021_v57 = vpop.f32.mrf.mxu2 }
 0x3a9   :  { %v2022_v43 = vadd.f32 %v3811_v22, %v2021_v57  ;;  %1443 = vmatmul.bf16.gmra.mxu0 %v3630_v54  ;;  %v1574_v36 = vadd.f32 %v1573_v42, %v1405_v33 }
 0x3aa   :  { %1612 = vmatmul.bf16.gmra.mxu1 %v4066_v48  ;;  %v2190_v32 = vpop.f32.mrf.mxu3 }
 0x3ab   :  { %v2191_v10 = vadd.f32 %v2190_v32, %v2022_v43  ;;  %v1716_v25 = vmax.f32 %v1574_v36, 0.0 }
 0x3ad   :  { %2323 = vst [vmem:[#allocation2 + $0x90] sm:$0xff] %v2191_v10 }
 0x3ae   :  { %v1406_v50 = vpop.f32.mrf.mxu0 }
 0x3af   :  { %v1407_v17 = vadd.f32 %v1406_v50, %v3725_v21  ;;  %v1575_v30 = vpop.f32.mrf.mxu1 }
 0x3b0   :  { %v2023_v15 = vpop.f32.mrf.mxu2 }
 0x3b1   :  { %v1576_v58 = vadd.f32 %v1575_v30, %v1407_v17  ;;  %v2024_v46 = vadd.f32 %v3811_v22, %v2023_v15 }
 0x3b2   :  { %v2192_v47 = vpop.f32.mrf.mxu3 }
 0x3b3   :  { %v1718_v9 = vmax.f32 %v1576_v58, 0.0  ;;  %v2193_v54 = vadd.f32 %v2192_v47, %v2024_v46 }
 0x3b5   :  { %2324 = vst [vmem:[#allocation2 + $0x98] sm:$0xff] %v2193_v54  ;;  %2065 = vmatmul.bf16.gmra.mxu2 %v3658_v8  ;;  %v1808_v13 = vpack.c.bf16 %v1718_v9, %v1716_v25  ;;  %v4069_v25 = vld [vmem:[#allocation29_spill] sm:$0xff] }
 0x3b6   :  { %v1409_v29 = vpop.f32.mrf.mxu0 }
 0x3b7   :  { %v1578_v34 = vpop.f32.mrf.mxu1  ;;  %2234 = vmatmul.bf16.gmra.mxu3 %v1808_v13  ;;  %v1410_v1 = vadd.f32 %v1409_v29, %v3725_v21 }
 0x3b8   :  { %v2026_v2 = vpop.f32.mrf.mxu2 }
 0x3b9   :  { %v2027_v35 = vadd.f32 %v3811_v22, %v2026_v2  ;;  %1448 = vmatmul.bf16.gmra.mxu0 %v3652_v5  ;;  %v1579_v12 = vadd.f32 %v1578_v34, %v1410_v1 }
 0x3ba   :  { %1617 = vmatmul.bf16.gmra.mxu1 %v4067_v49  ;;  %v2195_v63 = vpop.f32.mrf.mxu3 }
 0x3bb   :  { %v2196_v41 = vadd.f32 %v2195_v63, %v2027_v35  ;;  %v1720_v27 = vmax.f32 %v1579_v12, 0.0 }
 0x3bd   :  { %2325 = vst [vmem:[#allocation2 + $0xa0] sm:$0xff] %v2196_v41 }
 0x3be   :  { %v1411_v61 = vpop.f32.mrf.mxu0 }
 0x3bf   :  { %v1412_v8 = vadd.f32 %v1411_v61, %v3725_v21  ;;  %v1580_v52 = vpop.f32.mrf.mxu1 }
 0x3c0   :  { %v2028_v44 = vpop.f32.mrf.mxu2 }
 0x3c1   :  { %v1581_v37 = vadd.f32 %v1580_v52, %v1412_v8  ;;  %v2029_v45 = vadd.f32 %v3811_v22, %v2028_v44 }
 0x3c2   :  { %v2197_v4 = vpop.f32.mrf.mxu3 }
 0x3c3   :  { %v1722_v23 = vmax.f32 %v1581_v37, 0.0  ;;  %v2198_v5 = vadd.f32 %v2197_v4, %v2029_v45  ;;  %v4070_v45 = vld [vmem:[#allocation30_spill] sm:$0xff] }
 0x3c5   :  { %2326 = vst [vmem:[#allocation2 + $0xa8] sm:$0xff] %v2198_v5  ;;  %2070 = vmatmul.bf16.gmra.mxu2 %v3674_v7  ;;  %v1810_v40 = vpack.c.bf16 %v1722_v23, %v1720_v27 }
 0x3c6   :  { %v1414_v24 = vpop.f32.mrf.mxu0 }
 0x3c7   :  { %v1583_v39 = vpop.f32.mrf.mxu1  ;;  %2239 = vmatmul.bf16.gmra.mxu3 %v1810_v40  ;;  %v1415_v20 = vadd.f32 %v1414_v24, %v3725_v21 }
 0x3c8   :  { %v2031_v51 = vpop.f32.mrf.mxu2 }
 0x3c9   :  { %v2032_v59 = vadd.f32 %v3811_v22, %v2031_v51  ;;  %1453 = vmatmul.bf16.gmra.mxu0 %v3668_v3  ;;  %v1584_v43 = vadd.f32 %v1583_v39, %v1415_v20 }
 0x3ca   :  { %1622 = vmatmul.bf16.gmra.mxu1 %v4068_v14  ;;  %v2200_v56 = vpop.f32.mrf.mxu3 }
 0x3cb   :  { %v2201_v42 = vadd.f32 %v2200_v56, %v2032_v59  ;;  %v1724_v36 = vmax.f32 %v1584_v43, 0.0 }
 0x3cd   :  { %2327 = vst [vmem:[#allocation2 + $0xb0] sm:$0xff] %v2201_v42 }
 0x3ce   :  { %v1416_v57 = vpop.f32.mrf.mxu0 }
 0x3cf   :  { %v1417_v7 = vadd.f32 %v1416_v57, %v3725_v21  ;;  %v1585_v48 = vpop.f32.mrf.mxu1 }
 0x3d0   :  { %v2033_v32 = vpop.f32.mrf.mxu2 }
 0x3d1   :  { %v1586_v33 = vadd.f32 %v1585_v48, %v1417_v7  ;;  %v2034_v10 = vadd.f32 %v3811_v22, %v2033_v32  ;;  %v4071_v32 = vld [vmem:[#allocation31_spill] sm:$0xff] }
 0x3d2   :  { %v2202_v50 = vpop.f32.mrf.mxu3 }
 0x3d3   :  { %v1726_v17 = vmax.f32 %v1586_v33, 0.0  ;;  %v2203_v3 = vadd.f32 %v2202_v50, %v2034_v10  ;;  %v4072_v33 = vld [vmem:[#allocation32_spill] sm:$0xff] }
 0x3d5   :  { %v1812_v30 = vpack.c.bf16 %v1726_v17, %v1724_v36  ;;  %2328 = vst [vmem:[#allocation2 + $0xb8] sm:$0xff] %v2203_v3  ;;  %2075 = vmatmul.bf16.gmra.mxu2 %v3690_v28 }
 0x3d6   :  { %v1419_v15 = vpop.f32.mrf.mxu0 }
 0x3d7   :  { %v1588_v58 = vpop.f32.mrf.mxu1  ;;  %2244 = vmatmul.bf16.gmra.mxu3 %v1812_v30  ;;  %v1420_v54 = vadd.f32 %v1419_v15, %v3725_v21 }
 0x3d8   :  { %v2036_v46 = vpop.f32.mrf.mxu2 }
 0x3d9   :  { %v2037_v47 = vadd.f32 %v3811_v22, %v2036_v46  ;;  %1458 = vmatmul.bf16.gmra.mxu0 %v3684_v0  ;;  %v1589_v34 = vadd.f32 %v1588_v58, %v1420_v54 }
 0x3da   :  { %1627 = vmatmul.bf16.gmra.mxu1 %v4069_v25  ;;  %v2205_v9 = vpop.f32.mrf.mxu3 }
 0x3db   :  { %v2206_v13 = vadd.f32 %v2205_v9, %v2037_v47  ;;  %v1728_v41 = vmax.f32 %v1589_v34, 0.0 }
 0x3dd   :  { %2329 = vst [vmem:[#allocation2 + $0xc0] sm:$0xff] %v2206_v13 }
 0x3de   :  { %v1421_v29 = vpop.f32.mrf.mxu0 }
 0x3df   :  { %v1422_v2 = vadd.f32 %v1421_v29, %v3725_v21  ;;  %v1590_v28 = vpop.f32.mrf.mxu1 }
 0x3e0   :  { %v2038_v35 = vpop.f32.mrf.mxu2 }
 0x3e1   :  { %v1591_v49 = vadd.f32 %v1590_v28, %v1422_v2  ;;  %v2039_v63 = vadd.f32 %v3811_v22, %v2038_v35 }
 0x3e2   :  { %v2207_v1 = vpop.f32.mrf.mxu3 }
 0x3e3   :  { %v1730_v61 = vmax.f32 %v1591_v49, 0.0  ;;  %v2208_v0 = vadd.f32 %v2207_v1, %v2039_v63 }
 0x3e5   :  { %v1814_v12 = vpack.c.bf16 %v1730_v61, %v1728_v41  ;;  %2330 = vst [vmem:[#allocation2 + $0xc8] sm:$0xff] %v2208_v0  ;;  %2080 = vmatmul.bf16.gmra.mxu2 %v3706_v55 }
 0x3e6   :  { %v1424_v8 = vpop.f32.mrf.mxu0 }
 0x3e7   :  { %v1593_v52 = vpop.f32.mrf.mxu1  ;;  %2249 = vmatmul.bf16.gmra.mxu3 %v1814_v12  ;;  %v1425_v27 = vadd.f32 %v1424_v8, %v3725_v21 }
 0x3e8   :  { %v2041_v44 = vpop.f32.mrf.mxu2 }
 0x3e9   :  { %v2042_v37 = vadd.f32 %v3811_v22, %v2041_v44  ;;  %1463 = vmatmul.bf16.gmra.mxu0 %v3700_v6  ;;  %v1594_v40 = vadd.f32 %v1593_v52, %v1425_v27 }
 0x3ea   :  { %1632 = vmatmul.bf16.gmra.mxu1 %v4070_v45  ;;  %v2210_v4 = vpop.f32.mrf.mxu3 }
 0x3eb   :  { %v2211_v23 = vadd.f32 %v2210_v4, %v2042_v37  ;;  %v1732_v56 = vmax.f32 %v1594_v40, 0.0 }
 0x3ed   :  { %2331 = vst [vmem:[#allocation2 + $0xd0] sm:$0xff] %v2211_v23 }
 0x3ee   :  { %v1426_v5 = vpop.f32.mrf.mxu0 }
 0x3ef   :  { %v1427_v24 = vadd.f32 %v1426_v5, %v3725_v21  ;;  %v1595_v55 = vpop.f32.mrf.mxu1 }
 0x3f0   :  { %v2043_v39 = vpop.f32.mrf.mxu2 }
 0x3f1   :  { %v1596_v51 = vadd.f32 %v1595_v55, %v1427_v24  ;;  %v2044_v59 = vadd.f32 %v3811_v22, %v2043_v39 }
 0x3f2   :  { %v2212_v14 = vpop.f32.mrf.mxu3 }
 0x3f3   :  { %v1734_v20 = vmax.f32 %v1596_v51, 0.0  ;;  %v2213_v6 = vadd.f32 %v2212_v14, %v2044_v59 }
 0x3f5   :  { %v1816_v42 = vpack.c.bf16 %v1734_v20, %v1732_v56  ;;  %2332 = vst [vmem:[#allocation2 + $0xd8] sm:$0xff] %v2213_v6  ;;  %2085 = vmatmul.bf16.gmra.mxu2 %v3727_v26 }
 0x3f6   :  { %v1429_v57 = vpop.f32.mrf.mxu0 }
 0x3f7   :  { %v1598_v43 = vpop.f32.mrf.mxu1  ;;  %2254 = vmatmul.bf16.gmra.mxu3 %v1816_v42  ;;  %v1430_v50 = vadd.f32 %v1429_v57, %v3725_v21 }
 0x3f8   :  { %v2046_v7 = vpop.f32.mrf.mxu2 }
 0x3f9   :  { %v2047_v48 = vadd.f32 %v3811_v22, %v2046_v7  ;;  %1468 = vmatmul.bf16.gmra.mxu0 %v4071_v32  ;;  %v1599_v3 = vadd.f32 %v1598_v43, %v1430_v50 }
 0x3fa   :  { %1637 = vmatmul.bf16.gmra.mxu1 %v4072_v33  ;;  %v2215_v10 = vpop.f32.mrf.mxu3 }
 0x3fb   :  { %v2216_v36 = vadd.f32 %v2215_v10, %v2047_v48  ;;  %v1736_v25 = vmax.f32 %v1599_v3, 0.0 }
 0x3fd   :  { %2333 = vst [vmem:[#allocation2 + $0xe0] sm:$0xff] %v2216_v36 }
 0x3fe   :  { %v1431_v17 = vpop.f32.mrf.mxu0 }
 0x3ff   :  { %v1432_v30 = vadd.f32 %v1431_v17, %v3725_v21  ;;  %v1600_v26 = vpop.f32.mrf.mxu1 }
 0x400   :  { %v2048_v15 = vpop.f32.mrf.mxu2 }
 0x401   :  { %v1601_v58 = vadd.f32 %v1600_v26, %v1432_v30  ;;  %v2049_v46 = vadd.f32 %v3811_v22, %v2048_v15 }
 0x402   :  { %v2217_v47 = vpop.f32.mrf.mxu3 }
 0x403   :  { %v1738_v9 = vmax.f32 %v1601_v58, 0.0  ;;  %v2218_v54 = vadd.f32 %v2217_v47, %v2049_v46 }
 0x405   :  { %v1818_v13 = vpack.c.bf16 %v1738_v9, %v1736_v25  ;;  %2334 = vst [vmem:[#allocation2 + $0xe8] sm:$0xff] %v2218_v54  ;;  %2090 = vmatmul.bf16.gmra.mxu2 %v3736_v60 }
 0x406   :  { %v1434_v29 = vpop.f32.mrf.mxu0 }
 0x407   :  { %v1603_v34 = vpop.f32.mrf.mxu1  ;;  %2259 = vmatmul.bf16.gmra.mxu3 %v1818_v13  ;;  %v1435_v49 = vadd.f32 %v1434_v29, %v3725_v21 }
 0x408   :  { %v2051_v2 = vpop.f32.mrf.mxu2 }
 0x409   :  { %v2052_v28 = vadd.f32 %v3811_v22, %v2051_v2  ;;  %v1604_v41 = vadd.f32 %v1603_v34, %v1435_v49 }
 0x40a   :  { %v2220_v35 = vpop.f32.mrf.mxu3 }
 0x40b   :  { %v2221_v63 = vadd.f32 %v2220_v35, %v2052_v28  ;;  %v1740_v44 = vmax.f32 %v1604_v41, 0.0 }
 0x40d   :  { %2335 = vst [vmem:[#allocation2 + $0xf0] sm:$0xff] %v2221_v63 }
 0x40e   :  { %v1436_v1 = vpop.f32.mrf.mxu0 }
 0x40f   :  { %v1437_v61 = vadd.f32 %v1436_v1, %v3725_v21  ;;  %v1605_v0 = vpop.f32.mrf.mxu1 }
 0x410   :  { %v2053_v12 = vpop.f32.mrf.mxu2 }
 0x411   :  { %v1606_v8 = vadd.f32 %v1605_v0, %v1437_v61  ;;  %v2054_v60 = vadd.f32 %v3811_v22, %v2053_v12 }
 0x412   :  { %v2222_v52 = vpop.f32.mrf.mxu3 }
 0x413   :  { %v1742_v37 = vmax.f32 %v1606_v8, 0.0  ;;  %v2223_v45 = vadd.f32 %v2222_v52, %v2054_v60 }
 0x415   :  { %v1820_v4 = vpack.c.bf16 %v1742_v37, %v1740_v44  ;;  %2336 = vst [vmem:[#allocation2 + $0xf8] sm:$0xff] %v2223_v45  ;;  %2095 = vmatmul.bf16.gmra.mxu2 %v3745_v38 }
 0x416   :  { %v1439_v27 = vpop.f32.mrf.mxu0 }
 0x417   :  { %v1608_v23 = vpop.f32.mrf.mxu1  ;;  %2264 = vmatmul.bf16.gmra.mxu3 %v1820_v4  ;;  %v1440_v55 = vadd.f32 %v1439_v27, %v3725_v21 }
 0x418   :  { %v2056_v5 = vpop.f32.mrf.mxu2 }
 0x419   :  { %v2057_v40 = vadd.f32 %v3811_v22, %v2056_v5  ;;  %v1609_v59 = vadd.f32 %v1608_v23, %v1440_v55 }
 0x41a   :  { %v2225_v24 = vpop.f32.mrf.mxu3 }
 0x41b   :  { %v2226_v39 = vadd.f32 %v2225_v24, %v2057_v40  ;;  %v1744_v57 = vmax.f32 %v1609_v59, 0.0 }
 0x41d   :  { %2337 = vst [vmem:[#allocation2 + $0x100] sm:$0xff] %v2226_v39 }
 0x41e   :  { %v1441_v51 = vpop.f32.mrf.mxu0 }
 0x41f   :  { %v1442_v14 = vadd.f32 %v1441_v51, %v3725_v21  ;;  %v1610_v56 = vpop.f32.mrf.mxu1 }
 0x420   :  { %v2058_v20 = vpop.f32.mrf.mxu2 }
 0x421   :  { %v1611_v6 = vadd.f32 %v1610_v56, %v1442_v14  ;;  %v2059_v38 = vadd.f32 %v3811_v22, %v2058_v20 }
 0x422   :  { %v2227_v42 = vpop.f32.mrf.mxu3 }
 0x423   :  { %v1746_v43 = vmax.f32 %v1611_v6, 0.0  ;;  %v2228_v7 = vadd.f32 %v2227_v42, %v2059_v38 }
 0x425   :  { %v1822_v48 = vpack.c.bf16 %v1746_v43, %v1744_v57  ;;  %2338 = vst [vmem:[#allocation2 + $0x108] sm:$0xff] %v2228_v7  ;;  %2100 = vmatmul.bf16.gmra.mxu2 %v3754_v11 }
 0x426   :  { %v1444_v32 = vpop.f32.mrf.mxu0 }
 0x427   :  { %v1613_v33 = vpop.f32.mrf.mxu1  ;;  %2269 = vmatmul.bf16.gmra.mxu3 %v1822_v48  ;;  %v1445_v17 = vadd.f32 %v1444_v32, %v3725_v21 }
 0x428   :  { %v2061_v10 = vpop.f32.mrf.mxu2 }
 0x429   :  { %v2062_v50 = vadd.f32 %v3811_v22, %v2061_v10  ;;  %v1614_v26 = vadd.f32 %v1613_v33, %v1445_v17 }
 0x42a   :  { %v2230_v36 = vpop.f32.mrf.mxu3 }
 0x42b   :  { %v2231_v3 = vadd.f32 %v2230_v36, %v2062_v50  ;;  %v1748_v9 = vmax.f32 %v1614_v26, 0.0 }
 0x42d   :  { %2339 = vst [vmem:[#allocation2 + $0x110] sm:$0xff] %v2231_v3 }
 0x42e   :  { %v1446_v30 = vpop.f32.mrf.mxu0 }
 0x42f   :  { %v1447_v15 = vadd.f32 %v1446_v30, %v3725_v21  ;;  %v1615_v58 = vpop.f32.mrf.mxu1 }
 0x430   :  { %v2063_v46 = vpop.f32.mrf.mxu2 }
 0x431   :  { %v1616_v47 = vadd.f32 %v1615_v58, %v1447_v15  ;;  %v2064_v11 = vadd.f32 %v3811_v22, %v2063_v46 }
 0x432   :  { %v2232_v25 = vpop.f32.mrf.mxu3 }
 0x433   :  { %v1750_v54 = vmax.f32 %v1616_v47, 0.0  ;;  %v2233_v13 = vadd.f32 %v2232_v25, %v2064_v11 }
 0x435   :  { %v1824_v29 = vpack.c.bf16 %v1750_v54, %v1748_v9  ;;  %2340 = vst [vmem:[#allocation2 + $0x118] sm:$0xff] %v2233_v13  ;;  %2105 = vmatmul.bf16.gmra.mxu2 %v3763_v16 }
 0x436   :  { %v1449_v34 = vpop.f32.mrf.mxu0 }
 0x437   :  { %v1618_v2 = vpop.f32.mrf.mxu1  ;;  %2274 = vmatmul.bf16.gmra.mxu3 %v1824_v29  ;;  %v1450_v63 = vadd.f32 %v1449_v34, %v3725_v21 }
 0x438   :  { %v2066_v28 = vpop.f32.mrf.mxu2 }
 0x439   :  { %v2067_v35 = vadd.f32 %v3811_v22, %v2066_v28  ;;  %v1619_v61 = vadd.f32 %v1618_v2, %v1450_v63  ;;  %v3953_v2 = vld [vmem:[%s3992_s6] ss:$0 sm:$0xff]  ;;  %s2733_s6 = smov [#allocation2]  }
 0x43a   :  { %v2235_v49 = vpop.f32.mrf.mxu3  ;;  %s2373_s30 = sshll.u32 %s2733_s6, 4  ;;  %s2374_s30 = int_to_ptr.vmem [resolvable:$true] %s2373_s30 }
 0x43b   :  { %v2236_v1 = vadd.f32 %v2235_v49, %v2067_v35  ;;  %v1752_v44 = vmax.f32 %v1619_v61, 0.0 }
 0x43d   :  { %2341 = vst [vmem:[#allocation2 + $0x120] sm:$0xff] %v2236_v1 }
 0x43e   :  { %v1451_v41 = vpop.f32.mrf.mxu0 }
 0x43f   :  { %v1452_v0 = vadd.f32 %v1451_v41, %v3725_v21  ;;  %v1620_v12 = vpop.f32.mrf.mxu1 }
 0x440   :  { %v2068_v8 = vpop.f32.mrf.mxu2 }
 0x441   :  { %v1621_v60 = vadd.f32 %v1620_v12, %v1452_v0  ;;  %v2069_v16 = vadd.f32 %v3811_v22, %v2068_v8 }
 0x442   :  { %v2237_v52 = vpop.f32.mrf.mxu3 }
 0x443   :  { %v1754_v37 = vmax.f32 %v1621_v60, 0.0  ;;  %v2238_v45 = vadd.f32 %v2237_v52, %v2069_v16 }
 0x445   :  { %v1826_v4 = vpack.c.bf16 %v1754_v37, %v1752_v44  ;;  %2342 = vst [vmem:[#allocation2 + $0x128] sm:$0xff] %v2238_v45  ;;  %2110 = vmatmul.bf16.gmra.mxu2 %v3772_v19 }
 0x446   :  { %v1454_v27 = vpop.f32.mrf.mxu0 }
 0x447   :  { %v1623_v23 = vpop.f32.mrf.mxu1  ;;  %2279 = vmatmul.bf16.gmra.mxu3 %v1826_v4  ;;  %v1455_v55 = vadd.f32 %v1454_v27, %v3725_v21 }
 0x448   :  { %v2071_v5 = vpop.f32.mrf.mxu2 }
 0x449   :  { %v2072_v40 = vadd.f32 %v3811_v22, %v2071_v5  ;;  %v1624_v59 = vadd.f32 %v1623_v23, %v1455_v55 }
 0x44a   :  { %v2240_v24 = vpop.f32.mrf.mxu3 }
 0x44b   :  { %v2241_v39 = vadd.f32 %v2240_v24, %v2072_v40  ;;  %v1756_v42 = vmax.f32 %v1624_v59, 0.0 }
 0x44d   :  { %2343 = vst [vmem:[#allocation2 + $0x130] sm:$0xff] %v2241_v39 }
 0x44e   :  { %v1456_v51 = vpop.f32.mrf.mxu0 }
 0x44f   :  { %v1457_v14 = vadd.f32 %v1456_v51, %v3725_v21  ;;  %v1625_v56 = vpop.f32.mrf.mxu1 }
 0x450   :  { %v2073_v20 = vpop.f32.mrf.mxu2 }
 0x451   :  { %v1626_v6 = vadd.f32 %v1625_v56, %v1457_v14  ;;  %v2074_v19 = vadd.f32 %v3811_v22, %v2073_v20 }
 0x452   :  { %v2242_v38 = vpop.f32.mrf.mxu3 }
 0x453   :  { %v1758_v57 = vmax.f32 %v1626_v6, 0.0  ;;  %v2243_v43 = vadd.f32 %v2242_v38, %v2074_v19 }
 0x455   :  { %v1828_v7 = vpack.c.bf16 %v1758_v57, %v1756_v42  ;;  %2344 = vst [vmem:[#allocation2 + $0x138] sm:$0xff] %v2243_v43  ;;  %2115 = vmatmul.bf16.gmra.mxu2 %v3781_v31 }
 0x456   :  { %v1459_v48 = vpop.f32.mrf.mxu0 }
 0x457   :  { %v1628_v32 = vpop.f32.mrf.mxu1  ;;  %2284 = vmatmul.bf16.gmra.mxu3 %v1828_v7  ;;  %v1460_v36 = vadd.f32 %v1459_v48, %v3725_v21 }
 0x458   :  { %v2076_v33 = vpop.f32.mrf.mxu2 }
 0x459   :  { %v2077_v10 = vadd.f32 %v3811_v22, %v2076_v33  ;;  %v1629_v30 = vadd.f32 %v1628_v32, %v1460_v36 }
 0x45a   :  { %v2245_v50 = vpop.f32.mrf.mxu3 }
 0x45b   :  { %v2246_v17 = vadd.f32 %v2245_v50, %v2077_v10  ;;  %v1760_v11 = vmax.f32 %v1629_v30, 0.0 }
 0x45d   :  { %2345 = vst [vmem:[#allocation2 + $0x140] sm:$0xff] %v2246_v17 }
 0x45e   :  { %v1461_v3 = vpop.f32.mrf.mxu0 }
 0x45f   :  { %v1462_v26 = vadd.f32 %v1461_v3, %v3725_v21  ;;  %v1630_v15 = vpop.f32.mrf.mxu1 }
 0x460   :  { %v2078_v58 = vpop.f32.mrf.mxu2 }
 0x461   :  { %v1631_v46 = vadd.f32 %v1630_v15, %v1462_v26  ;;  %v2079_v31 = vadd.f32 %v3811_v22, %v2078_v58 }
 0x462   :  { %v2247_v47 = vpop.f32.mrf.mxu3 }
 0x463   :  { %v1762_v25 = vmax.f32 %v1631_v46, 0.0  ;;  %v2248_v9 = vadd.f32 %v2247_v47, %v2079_v31 }
 0x465   :  { %v1830_v54 = vpack.c.bf16 %v1762_v25, %v1760_v11  ;;  %2346 = vst [vmem:[#allocation2 + $0x148] sm:$0xff] %v2248_v9  ;;  %2120 = vmatmul.bf16.gmra.mxu2 %v3790_v62 }
 0x466   :  { %v1464_v13 = vpop.f32.mrf.mxu0 }
 0x467   :  { %v1633_v29 = vpop.f32.mrf.mxu1  ;;  %2289 = vmatmul.bf16.gmra.mxu3 %v1830_v54  ;;  %v1465_v35 = vadd.f32 %v1464_v13, %v3725_v21 }
 0x468   :  { %v2081_v34 = vpop.f32.mrf.mxu2 }
 0x469   :  { %v2082_v28 = vadd.f32 %v3953_v2, %v2081_v34  ;;  %v1634_v1 = vadd.f32 %v1633_v29, %v1465_v35 }
 0x46a   :  { %v2250_v22 = vpop.f32.mrf.mxu3 }
 0x46b   :  { %v2251_v49 = vadd.f32 %v2250_v22, %v2082_v28  ;;  %v1764_v60 = vmax.f32 %v1634_v1, 0.0 }
 0x46d   :  { %2347 = vst [vmem:[#allocation2 + $0x150] sm:$0xff] %v2251_v49 }
 0x46e   :  { %v1466_v63 = vpop.f32.mrf.mxu0 }
 0x46f   :  { %v1467_v62 = vadd.f32 %v1466_v63, %v3725_v21  ;;  %v1635_v41 = vpop.f32.mrf.mxu1 }
 0x470   :  { %v2083_v61 = vpop.f32.mrf.mxu2 }
 0x471   :  { %v1636_v0 = vadd.f32 %v1635_v41, %v1467_v62  ;;  %v2084_v12 = vadd.f32 %v3953_v2, %v2083_v61 }
 0x472   :  { %v2252_v8 = vpop.f32.mrf.mxu3 }
 0x473   :  { %v1766_v16 = vmax.f32 %v1636_v0, 0.0  ;;  %v2253_v52 = vadd.f32 %v2252_v8, %v2084_v12 }
 0x475   :  { %v1832_v44 = vpack.c.bf16 %v1766_v16, %v1764_v60  ;;  %2348 = vst [vmem:[#allocation2 + $0x158] sm:$0xff] %v2253_v52  ;;  %2125 = vmatmul.bf16.gmra.mxu2 %v3799_v53 }
 0x476   :  { %v1469_v37 = vpop.f32.mrf.mxu0 }
 0x477   :  { %v1638_v45 = vpop.f32.mrf.mxu1  ;;  %2294 = vmatmul.bf16.gmra.mxu3 %v1832_v44  ;;  %v1470_v5 = vadd.f32 %v1469_v37, %v3725_v21 }
 0x478   :  { %v2086_v4 = vpop.f32.mrf.mxu2 }
 0x479   :  { %v2087_v27 = vadd.f32 %v3953_v2, %v2086_v4  ;;  %v1639_v55 = vadd.f32 %v1638_v45, %v1470_v5 }
 0x47a   :  { %v2255_v23 = vpop.f32.mrf.mxu3 }
 0x47b   :  { %v2256_v40 = vadd.f32 %v2255_v23, %v2087_v27  ;;  %v1768_v20 = vmax.f32 %v1639_v55, 0.0 }
 0x47d   :  { %2349 = vst [vmem:[#allocation2 + $0x160] sm:$0xff] %v2256_v40 }
 0x47e   :  { %v1471_v24 = vpop.f32.mrf.mxu0 }
 0x47f   :  { %v1472_v39 = vadd.f32 %v1471_v24, %v3725_v21  ;;  %v1640_v51 = vpop.f32.mrf.mxu1 }
 0x480   :  { %v2088_v59 = vpop.f32.mrf.mxu2 }
 0x481   :  { %v1641_v14 = vadd.f32 %v1640_v51, %v1472_v39  ;;  %v2089_v53 = vadd.f32 %v3953_v2, %v2088_v59 }
 0x482   :  { %v2257_v56 = vpop.f32.mrf.mxu3 }
 0x483   :  { %v1770_v6 = vmax.f32 %v1641_v14, 0.0  ;;  %v2258_v19 = vadd.f32 %v2257_v56, %v2089_v53 }
 0x485   :  { %v1834_v38 = vpack.c.bf16 %v1770_v6, %v1768_v20  ;;  %2350 = vst [vmem:[#allocation2 + $0x168] sm:$0xff] %v2258_v19  ;;  %2130 = vmatmul.bf16.gmra.mxu2 %v3813_v18 }
 0x487   :  { %2299 = vmatmul.bf16.gmra.mxu3 %v1834_v38 }
 0x488   :  { %v2091_v42 = vpop.f32.mrf.mxu2 }
 0x489   :  { %v2092_v57 = vadd.f32 %v3953_v2, %v2091_v42 }
 0x48a   :  { %v2260_v43 = vpop.f32.mrf.mxu3 }
 0x48b   :  { %v2261_v7 = vadd.f32 %v2260_v43, %v2092_v57 }
 0x48d   :  { %2351 = vst [vmem:[#allocation2 + $0x170] sm:$0xff] %v2261_v7 }
 0x490   :  { %v2093_v21 = vpop.f32.mrf.mxu2 }
 0x491   :  { %v2094_v48 = vadd.f32 %v3953_v2, %v2093_v21 }
 0x492   :  { %v2262_v32 = vpop.f32.mrf.mxu3 }
 0x493   :  { %v2263_v33 = vadd.f32 %v2262_v32, %v2094_v48 }
 0x495   :  { %2352 = vst [vmem:[#allocation2 + $0x178] sm:$0xff] %v2263_v33 }
 0x498   :  { %v2096_v10 = vpop.f32.mrf.mxu2 }
 0x499   :  { %v2097_v50 = vadd.f32 %v3953_v2, %v2096_v10 }
 0x49a   :  { %v2265_v36 = vpop.f32.mrf.mxu3 }
 0x49b   :  { %v2266_v17 = vadd.f32 %v2265_v36, %v2097_v50 }
 0x49d   :  { %2353 = vst [vmem:[#allocation2 + $0x180] sm:$0xff] %v2266_v17 }
 0x4a0   :  { %v2098_v18 = vpop.f32.mrf.mxu2 }
 0x4a1   :  { %v2099_v3 = vadd.f32 %v3953_v2, %v2098_v18 }
 0x4a2   :  { %v2267_v30 = vpop.f32.mrf.mxu3 }
 0x4a3   :  { %v2268_v26 = vadd.f32 %v2267_v30, %v2099_v3 }
 0x4a5   :  { %2354 = vst [vmem:[#allocation2 + $0x188] sm:$0xff] %v2268_v26 }
 0x4a8   :  { %v2101_v15 = vpop.f32.mrf.mxu2 }
 0x4a9   :  { %v2102_v58 = vadd.f32 %v3953_v2, %v2101_v15 }
 0x4aa   :  { %v2270_v46 = vpop.f32.mrf.mxu3 }
 0x4ab   :  { %v2271_v31 = vadd.f32 %v2270_v46, %v2102_v58 }
 0x4ad   :  { %2355 = vst [vmem:[#allocation2 + $0x190] sm:$0xff] %v2271_v31 }
 0x4b0   :  { %v2103_v47 = vpop.f32.mrf.mxu2 }
 0x4b1   :  { %v2104_v11 = vadd.f32 %v3953_v2, %v2103_v47 }
 0x4b2   :  { %v2272_v25 = vpop.f32.mrf.mxu3 }
 0x4b3   :  { %v2273_v9 = vadd.f32 %v2272_v25, %v2104_v11 }
 0x4b5   :  { %2356 = vst [vmem:[#allocation2 + $0x198] sm:$0xff] %v2273_v9 }
 0x4b8   :  { %v2106_v54 = vpop.f32.mrf.mxu2 }
 0x4b9   :  { %v2107_v13 = vadd.f32 %v3953_v2, %v2106_v54 }
 0x4ba   :  { %v2275_v29 = vpop.f32.mrf.mxu3 }
 0x4bb   :  { %v2276_v34 = vadd.f32 %v2275_v29, %v2107_v13 }
 0x4bd   :  { %2357 = vst [vmem:[#allocation2 + $0x1a0] sm:$0xff] %v2276_v34 }
 0x4c0   :  { %v2108_v28 = vpop.f32.mrf.mxu2 }
 0x4c1   :  { %v2109_v22 = vadd.f32 %v3953_v2, %v2108_v28 }
 0x4c2   :  { %v2277_v35 = vpop.f32.mrf.mxu3 }
 0x4c3   :  { %v2278_v49 = vadd.f32 %v2277_v35, %v2109_v22 }
 0x4c5   :  { %2358 = vst [vmem:[#allocation2 + $0x1a8] sm:$0xff] %v2278_v49 }
 0x4c8   :  { %v2111_v63 = vpop.f32.mrf.mxu2 }
 0x4c9   :  { %v2112_v1 = vadd.f32 %v3953_v2, %v2111_v63 }
 0x4ca   :  { %v2280_v62 = vpop.f32.mrf.mxu3 }
 0x4cb   :  { %v2281_v41 = vadd.f32 %v2280_v62, %v2112_v1 }
 0x4cd   :  { %2359 = vst [vmem:[#allocation2 + $0x1b0] sm:$0xff] %v2281_v41 }
 0x4d0   :  { %v2113_v61 = vpop.f32.mrf.mxu2 }
 0x4d1   :  { %v2114_v0 = vadd.f32 %v3953_v2, %v2113_v61 }
 0x4d2   :  { %v2282_v12 = vpop.f32.mrf.mxu3 }
 0x4d3   :  { %v2283_v8 = vadd.f32 %v2282_v12, %v2114_v0 }
 0x4d5   :  { %2360 = vst [vmem:[#allocation2 + $0x1b8] sm:$0xff] %v2283_v8 }
 0x4d8   :  { %v2116_v60 = vpop.f32.mrf.mxu2 }
 0x4d9   :  { %v2117_v16 = vadd.f32 %v3953_v2, %v2116_v60 }
 0x4da   :  { %v2285_v52 = vpop.f32.mrf.mxu3 }
 0x4db   :  { %v2286_v44 = vadd.f32 %v2285_v52, %v2117_v16 }
 0x4dd   :  { %2361 = vst [vmem:[#allocation2 + $0x1c0] sm:$0xff] %v2286_v44 }
 0x4e0   :  { %v2118_v37 = vpop.f32.mrf.mxu2 }
 0x4e1   :  { %v2119_v45 = vadd.f32 %v3953_v2, %v2118_v37 }
 0x4e2   :  { %v2287_v4 = vpop.f32.mrf.mxu3 }
 0x4e3   :  { %v2288_v27 = vadd.f32 %v2287_v4, %v2119_v45 }
 0x4e5   :  { %2362 = vst [vmem:[#allocation2 + $0x1c8] sm:$0xff] %v2288_v27 }
 0x4e8   :  { %v2121_v23 = vpop.f32.mrf.mxu2 }
 0x4e9   :  { %v2122_v5 = vadd.f32 %v3953_v2, %v2121_v23 }
 0x4ea   :  { %v2290_v40 = vpop.f32.mrf.mxu3 }
 0x4eb   :  { %v2291_v24 = vadd.f32 %v2290_v40, %v2122_v5 }
 0x4ed   :  { %2363 = vst [vmem:[#allocation2 + $0x1d0] sm:$0xff] %v2291_v24 }
 0x4f0   :  { %v2123_v55 = vpop.f32.mrf.mxu2 }
 0x4f1   :  { %v2124_v39 = vadd.f32 %v3953_v2, %v2123_v55 }
 0x4f2   :  { %v2292_v51 = vpop.f32.mrf.mxu3 }
 0x4f3   :  { %v2293_v59 = vadd.f32 %v2292_v51, %v2124_v39 }
 0x4f5   :  { %2364 = vst [vmem:[#allocation2 + $0x1d8] sm:$0xff] %v2293_v59 }
 0x4f8   :  { %v2126_v14 = vpop.f32.mrf.mxu2 }
 0x4f9   :  { %v2127_v53 = vadd.f32 %v3953_v2, %v2126_v14 }
 0x4fa   :  { %v2295_v56 = vpop.f32.mrf.mxu3 }
 0x4fb   :  { %v2296_v20 = vadd.f32 %v2295_v56, %v2127_v53 }
 0x4fd   :  { %2365 = vst [vmem:[#allocation2 + $0x1e0] sm:$0xff] %v2296_v20 }
 0x500   :  { %v2128_v6 = vpop.f32.mrf.mxu2 }
 0x501   :  { %v2129_v19 = vadd.f32 %v3953_v2, %v2128_v6 }
 0x502   :  { %v2297_v38 = vpop.f32.mrf.mxu3 }
 0x503   :  { %v2298_v42 = vadd.f32 %v2297_v38, %v2129_v19 }
 0x505   :  { %2366 = vst [vmem:[#allocation2 + $0x1e8] sm:$0xff] %v2298_v42 }
 0x508   :  { %v2131_v57 = vpop.f32.mrf.mxu2 }
 0x509   :  { %v2132_v43 = vadd.f32 %v3953_v2, %v2131_v57 }
 0x50a   :  { %v2300_v7 = vpop.f32.mrf.mxu3 }
 0x50b   :  { %v2301_v21 = vadd.f32 %v2300_v7, %v2132_v43 }
 0x50d   :  { %2367 = vst [vmem:[#allocation2 + $0x1f0] sm:$0xff] %v2301_v21 }
 0x510   :  { %v2133_v48 = vpop.f32.mrf.mxu2 }
 0x511   :  { %v2134_v32 = vadd.f32 %v3953_v2, %v2133_v48 }
 0x512   :  { %v2302_v33 = vpop.f32.mrf.mxu3 }
 0x513   :  { %v2303_v10 = vadd.f32 %v2302_v33, %v2134_v32 }
 0x515   :  { %2368 = vst [vmem:[#allocation2 + $0x1f8] sm:$0xff] %v2303_v10 }
 0x516   :  { %2381 = dma.vmem_to_hbm [thread:$0]  %s2374_s30, 8192, %s2376_s10, [#allocation3], %s2734_s11, %s2734_s11, %s2735_s12  }
 0x517   :  { %2731 = dma.done.wait [#allocation3], 8192  }
 0x518   :  { %2732 = vsyncadd [#allocation3], 4294959104 }
 0x519   :  { %2386 = vsyncpa [#allocation3], 1 }

</bundles_post_ra>
